<compile_context>
chip_gen: v7x
topology: tpu7x:2x2x1
jax: 0.10.0
libtpu: 0.0.40
codegen_flags: <defaults>
</compile_context>

<pallas_src>
import functools
import numpy as np
import jax
import jax.numpy as jnp
from jax.experimental import pallas as pl
from jax.experimental.pallas import tpu as pltpu

# ----------------------------- config --------------------------------------
LOCAL_GRAPH_DIM = 8
LOCAL_ENCODER_HIDDEN_DIM = 32
LOCAL_GRAPH_ENCODER_REPEAT = 1
VOXEL_GRAPH_DIM = 8
Z_DIM = 16
GENERATOR_HIDDEN_DIM = 64
GENERATOR_MLP_ENCODER_REPEAT = 1
GENERATOR_ENCODER_REPEAT = 2
NUM_CLASSES = 6

BN_EPS = 1e-5
GN_EPS = 1e-5
LRELU_SLOPE = 0.2
GUMBEL_TAU = 1.0
LANE = 128  # lane-dense padded class dimension / slab field alignment


# ------------------------ architecture & slab layout ------------------------
def _arch_dims():
    local_enc = [(LOCAL_GRAPH_DIM, LOCAL_ENCODER_HIDDEN_DIM)]
    local_enc += [(LOCAL_ENCODER_HIDDEN_DIM, LOCAL_ENCODER_HIDDEN_DIM)
                  for _ in range(LOCAL_GRAPH_ENCODER_REPEAT)]
    cat1 = LOCAL_ENCODER_HIDDEN_DIM + VOXEL_GRAPH_DIM + Z_DIM
    mlp_enc = [(cat1, GENERATOR_HIDDEN_DIM)]
    mlp_enc += [(GENERATOR_HIDDEN_DIM, GENERATOR_HIDDEN_DIM)
                for _ in range(GENERATOR_MLP_ENCODER_REPEAT)]
    gcn = []
    oc = GENERATOR_HIDDEN_DIM
    for _ in range(GENERATOR_ENCODER_REPEAT):
        gcn.append((oc, oc // 2)); oc //= 2
    for _ in range(GENERATOR_ENCODER_REPEAT):
        gcn.append((oc, oc * 2)); oc *= 2
    cat2 = (oc + GENERATOR_HIDDEN_DIM + LOCAL_ENCODER_HIDDEN_DIM
            + VOXEL_GRAPH_DIM + Z_DIM)
    hdim = GENERATOR_HIDDEN_DIM
    dec = [(cat2, hdim), (hdim, hdim // 2), (hdim // 2, hdim // 4),
           (hdim // 4, hdim // 8)]
    return {"local_enc": local_enc, "mlp_enc": mlp_enc, "gcn": gcn, "dec": dec,
            "final": (hdim // 8, NUM_CLASSES)}


def _make_layout():
    """Row layout of the packed parameter slab.

    Per layer: `fin` weight rows followed by 8 "vector" rows (rows 0..3 used:
    bias / gamma-or-alpha / beta-or-gamma / unused-or-beta).  All row offsets
    are multiples of 8 (sublane-aligned static slices inside the kernel).
    """
    dims = _arch_dims()
    layout = {}
    row = 0
    for g in ("local_enc", "mlp_enc", "gcn", "dec"):
        entries = []
        for fin, fout in dims[g]:
            assert fin % 8 == 0 and fout <= LANE
            entries.append((row, row + fin, fin, fout))  # (w_row, v_row, fin, fout)
            row += fin + 8
        layout[g] = entries
    fin, _ = dims["final"]
    layout["final_fin"] = fin
    layout["final_w_row"] = row
    layout["final_b_row"] = row + fin
    layout["rows"] = row + fin + 8
    return layout


LAYOUT = _make_layout()


# ----------------------------- fused kernel ---------------------------------
def _fused_generator_kernel(params_ref, data_ref, lx_ref, a_ref, out_ref, *,
                            layout, n_local):
    f32 = jnp.float32
    bf16 = jnp.bfloat16
    n_voxel = out_ref.shape[0]
    inv_n = 1.0 / n_voxel

    def mm(x, w):
        # bf16 operands -> guaranteed single-pass MXU matmul; f32 accumulate.
        return jnp.dot(x.astype(bf16), w.astype(bf16),
                       preferred_element_type=f32)

    def w_of(entry):
        wr, _, fin, fout = entry
        return params_ref[wr:wr + fin, 0:fout]

    def bn_lrelu(h, entry):
        """bias + BatchNorm1d (batch stats, one-pass) + LeakyReLU(0.2)."""
        _, vr, _, fout = entry
        vec = params_ref[vr:vr + 4, 0:fout]   # rows: bias, gamma, beta, unused
        h = h + vec[0:1, :]
        # Independent reductions -> they can overlap on the XLU.
        s1 = jnp.sum(h, axis=0, keepdims=True)
        s2 = jnp.sum(h * h, axis=0, keepdims=True)
        mean = s1 * inv_n
        var = jnp.maximum(s2 * inv_n - mean * mean, 0.0)
        hn = (h - mean) * jax.lax.rsqrt(var + BN_EPS) * vec[1:2, :] + vec[2:3, :]
        return jnp.where(hn > 0.0, hn, LRELU_SLOPE * hn)

    def graphnorm_relu(h, entry):
        """GCN bias + GraphNorm (single graph, one-pass stats) + ReLU.
        Dropout(0.2) is identity in eval mode."""
        _, vr, _, fout = entry
        vec = params_ref[vr:vr + 4, 0:fout]   # rows: bias, alpha, gamma, beta
        h = h + vec[0:1, :]
        alpha = vec[1:2, :]
        s1 = jnp.sum(h, axis=0, keepdims=True)
        s2 = jnp.sum(h * h, axis=0, keepdims=True)
        mean = s1 * inv_n
        # Var[h - alpha*mean] = E[h^2] - (2*alpha - alpha^2) * mean^2
        var = jnp.maximum(
            s2 * inv_n - (2.0 * alpha - alpha * alpha) * (mean * mean), 0.0)
        hn = (h - alpha * mean) * jax.lax.rsqrt(var + GN_EPS) * vec[2:3, :] \
            + vec[3:4, :]
        return jnp.maximum(hn, 0.0)

    # ---- unpack per-node data slab (fields at lane-tile-aligned offsets) ----
    match = data_ref[:, 0:n_local]                               # (Nv, Nl)
    vxz = data_ref[:, LANE:LANE + VOXEL_GRAPH_DIM + Z_DIM]       # (Nv, 24)
    noise = data_ref[:, 2 * LANE:3 * LANE]                       # (Nv, 128)

    # ---- type matching: mean of local features of matching type -------------
    matched_x = mm(match, lx_ref[...])                           # (Nv, 8)

    # ---- local graph encoder -------------------------------------------------
    h = matched_x
    for entry in layout["local_enc"]:
        h = bn_lrelu(mm(h, w_of(entry)), entry)
    encoded_local = h                                            # (Nv, 32)

    # ---- mlp encoder: first layer = split matmul over [encoded_local | vxz] --
    e0 = layout["mlp_enc"][0]
    wr, _, fin, fout = e0
    split0 = LOCAL_ENCODER_HIDDEN_DIM
    h = (mm(encoded_local, params_ref[wr:wr + split0, 0:fout])
         + mm(vxz, params_ref[wr + split0:wr + fin, 0:fout]))
    h = bn_lrelu(h, e0)
    for entry in layout["mlp_enc"][1:]:
        h = bn_lrelu(mm(h, w_of(entry)), entry)
    x = h                                                        # (Nv, 64)

    # ---- GCN encoder: A loaded & cast once; widening layers do (A @ h) @ W ---
    a_bf = a_ref[...].astype(bf16)                               # (Nv, Nv)
    enc = x
    for entry in layout["gcn"]:
        _, _, fin, fout = entry
        w = w_of(entry)
        if fout >= fin:
            pre = mm(mm(a_bf, enc), w)   # widening: aggregate first (fewer flops)
        else:
            pre = mm(a_bf, mm(enc, w))   # narrowing: transform first
        enc = graphnorm_relu(pre, entry)
    encoded = enc                                                # (Nv, 64)

    # ---- decoder: first layer = split matmul over the 4-way concat -----------
    e0 = layout["dec"][0]
    wr, _, fin, fout = e0
    c0 = GENERATOR_HIDDEN_DIM
    c1 = c0 + GENERATOR_HIDDEN_DIM
    c2 = c1 + LOCAL_ENCODER_HIDDEN_DIM
    h = (mm(encoded, params_ref[wr:wr + c0, 0:fout])
         + mm(x, params_ref[wr + c0:wr + c1, 0:fout])
         + mm(encoded_local, params_ref[wr + c1:wr + c2, 0:fout])
         + mm(vxz, params_ref[wr + c2:wr + fin, 0:fout]))
    h = bn_lrelu(h, e0)
    for entry in layout["dec"][1:]:
        h = bn_lrelu(mm(h, w_of(entry)), entry)

    # ---- final classifier: weight padded to 128 lanes, pad bias = -1e9 -------
    fwr = layout["final_w_row"]
    fbr = layout["final_b_row"]
    logits = (mm(h, params_ref[fwr:fwr + layout["final_fin"], :])
              + params_ref[fbr:fbr + 1, :])

    # ---- gumbel softmax (soft) + one-hot argmax (hard), lane-dense -----------
    y = (logits + noise) * (1.0 / GUMBEL_TAU)
    m = jnp.max(y, axis=-1, keepdims=True)
    ey = jnp.exp(y - m)
    soft = ey / jnp.sum(ey, axis=-1, keepdims=True)  # exact divide: rows sum to 1

    iota = jax.lax.broadcasted_iota(jnp.int32, y.shape, 1)
    cand = jnp.where(y == m, iota, y.shape[-1])      # first max index on ties
    idx = jnp.min(cand, axis=-1, keepdims=True)
    hard = jnp.where(iota == idx, 1.0, 0.0).astype(f32)
    # TODO(synk): straight-through (hard - stop_gradient(soft) + soft) plus a
    #             custom_vjp are needed for training; forward value == hard.

    out_ref[:, 0:LANE] = soft
    out_ref[:, LANE:2 * LANE] = hard


# ----------------------------- parameter init & packing ---------------------
def _linear_wb(key, fin, fout):
    kw, kb = jax.random.split(key)
    lim = 1.0 / float(np.sqrt(fin))
    w = jax.random.uniform(kw, (fin, fout), jnp.float32, -lim, lim)
    b = jax.random.uniform(kb, (fout,), jnp.float32, -lim, lim)
    return w, b


def _mlp_block_params(key, fin, fout):
    w, b = _linear_wb(key, fin, fout)
    vec = jnp.stack([b,
                     jnp.ones((fout,), jnp.float32),    # bn gamma
                     jnp.zeros((fout,), jnp.float32),   # bn beta
                     jnp.zeros((fout,), jnp.float32)])  # unused
    return w, vec


def _gcn_block_params(key, fin, fout):
    w, b = _linear_wb(key, fin, fout)
    vec = jnp.stack([b,
                     jnp.ones((fout,), jnp.float32),    # graphnorm mean_scale
                     jnp.ones((fout,), jnp.float32),    # graphnorm gamma
                     jnp.zeros((fout,), jnp.float32)])  # graphnorm beta
    return w, vec


def init_params(key):
    dims = _arch_dims()
    keys = iter(jax.random.split(key, 64))
    params = {
        "local_enc": [_mlp_block_params(next(keys), i, o)
                      for i, o in dims["local_enc"]],
        "mlp_enc": [_mlp_block_params(next(keys), i, o)
                    for i, o in dims["mlp_enc"]],
        "gcn": [_gcn_block_params(next(keys), i, o) for i, o in dims["gcn"]],
        "dec_blocks": [_mlp_block_params(next(keys), i, o)
                       for i, o in dims["dec"]],
    }
    fin, nclass = dims["final"]
    params["dec_final"] = _linear_wb(next(keys), fin, nclass)
    return params


def pack_params(params):
    """Pack every weight / norm vector / final bias into ONE lane-padded f32
    slab so the kernel performs a single parameter DMA (done once, host-side)."""
    slab = np.zeros((LAYOUT["rows"], LANE), np.float32)
    groups = (("local_enc", params["local_enc"]),
              ("mlp_enc", params["mlp_enc"]),
              ("gcn", params["gcn"]),
              ("dec", params["dec_blocks"]))
    for gname, plist in groups:
        for (wr, vr, fin, fout), (w, vec) in zip(LAYOUT[gname], plist):
            slab[wr:wr + fin, :fout] = np.asarray(w)
            slab[vr:vr + 4, :fout] = np.asarray(vec)
    fw, fb = params["dec_final"]
    fwr, fbr, ffin = LAYOUT["final_w_row"], LAYOUT["final_b_row"], LAYOUT["final_fin"]
    slab[fwr:fwr + ffin, :NUM_CLASSES] = np.asarray(fw)
    slab[fbr, :] = -1e9                 # padded logits vanish in softmax/argmax
    slab[fbr, :NUM_CLASSES] = np.asarray(fb)
    return jnp.asarray(slab)


# ----------------------------- host-side glue --------------------------------
def build_normalized_adjacency_np(edge_index, num_nodes):
    """Dense GCN normalization D^-1/2 (A + I) D^-1/2 precomputed on host
    (static graph -> no scatter on the hot path)."""
    src = np.asarray(edge_index[0])
    dst = np.asarray(edge_index[1])
    a = np.zeros((num_nodes, num_nodes), np.float32)
    np.add.at(a, (dst, src), 1.0)          # messages flow src -> dst
    a += np.eye(num_nodes, dtype=np.float32)
    deg = a.sum(axis=1)
    dinv = 1.0 / np.sqrt(np.maximum(deg, 1e-12))
    return (a * dinv[:, None] * dinv[None, :]).astype(np.float32)


def _cost_estimate(n_voxel, n_local, bytes_accessed):
    flops = 2 * n_voxel * n_local * LOCAL_GRAPH_DIM
    for g in ("local_enc", "mlp_enc", "gcn", "dec"):
        for (_, _, fin, fout) in LAYOUT[g]:
            flops += 2 * n_voxel * fin * fout
    for (_, _, fin, fout) in LAYOUT["gcn"]:
        flops += 2 * n_voxel * n_voxel * min(fin, fout)   # adjacency aggregation
    flops += 2 * n_voxel * LAYOUT["final_fin"] * LANE
    transcendentals = n_voxel * LANE + 16 * n_voxel       # exp + rsqrt-ish
    return pl.CostEstimate(flops=flops, transcendentals=transcendentals,
                           bytes_accessed=bytes_accessed)


def _vmem_spec():
    return pl.BlockSpec(memory_space=pltpu.MemorySpace.VMEM)


def voxel_gnn_generator_forward(param_slab, local_x, local_type, voxel_x,
                                voxel_type, a_norm, z, gumbel_noise):
    n_voxel = voxel_x.shape[0]
    n_local = local_x.shape[0]
    assert n_local <= LANE and (VOXEL_GRAPH_DIM + Z_DIM) <= LANE

    # Type-match matrix built in the wrapper (per perf review): rows with no
    # matching local type are all-zero, matching the PyTorch zeros default.
    vt = voxel_type.astype(jnp.int32).reshape(n_voxel, 1)
    lt = local_type.astype(jnp.int32).reshape(1, n_local)
    eq = (vt == lt).astype(jnp.float32)
    cnt = jnp.sum(eq, axis=1, keepdims=True)
    match = eq / jnp.maximum(cnt, 1.0)

    # Host-side concat of voxel features and z: their weight rows are
    # contiguous in the packed slab -> fewer MXU pushes in the concat layers.
    vxz = jnp.concatenate(
        [voxel_x.astype(jnp.float32),
         jnp.reshape(z, (n_voxel, Z_DIM)).astype(jnp.float32)], axis=-1)

    # One per-node data slab; every field starts at a lane-tile boundary.
    data = jnp.zeros((n_voxel, 3 * LANE), jnp.float32)
    data = data.at[:, :n_local].set(match)
    data = data.at[:, LANE:LANE + vxz.shape[1]].set(vxz)
    data = data.at[:, 2 * LANE:2 * LANE + NUM_CLASSES].set(
        gumbel_noise.astype(jnp.float32))

    lx = local_x.astype(jnp.float32)
    a = a_norm.astype(jnp.float32)

    in_bytes = 4 * (param_slab.size + data.size + lx.size + a.size)
    out_bytes = 4 * n_voxel * 2 * LANE

    kernel = functools.partial(_fused_generator_kernel, layout=LAYOUT,
                               n_local=n_local)
    out = pl.pallas_call(
        kernel,
        out_shape=jax.ShapeDtypeStruct((n_voxel, 2 * LANE), jnp.float32),
        in_specs=[_vmem_spec() for _ in range(4)],
        out_specs=_vmem_spec(),
        cost_estimate=_cost_estimate(n_voxel, n_local, in_bytes + out_bytes),
    )(param_slab, data, lx, a)
    # TODO(synk): to batch multiple graphs, add a leading "parallel" grid axis
    #             so v7x shards graphs across both TensorCores.
    # NOTE: a_norm is the only O(N^2) tensor; for very large graphs stream it
    #       from HBM (pl.ANY + make_async_copy) instead of a single VMEM block.

    label_soft = out[:, :NUM_CLASSES]
    label_hard = out[:, LANE:LANE + NUM_CLASSES]
    return label_hard, label_soft


# ----------------------------- main ------------------------------------------
if __name__ == "__main__":
    key = jax.random.PRNGKey(0)
    k_param, k_lx, k_lt, k_vx, k_vt, k_z, k_g = jax.random.split(key, 7)

    n_local = 16
    n_voxel = 64
    n_types = 4

    params = init_params(k_param)
    param_slab = pack_params(params)          # one-time host-side packing

    local_x = jax.random.normal(k_lx, (n_local, LOCAL_GRAPH_DIM), jnp.float32)
    local_type = jax.random.randint(k_lt, (n_local,), 0, n_types)
    voxel_x = jax.random.normal(k_vx, (n_voxel, VOXEL_GRAPH_DIM), jnp.float32)
    voxel_type = jax.random.randint(k_vt, (n_voxel,), 0, n_types)
    z = jax.random.normal(k_z, (1, n_voxel, Z_DIM), jnp.float32)
    gumbel_noise = jax.random.gumbel(k_g, (n_voxel, NUM_CLASSES), jnp.float32)

    # deterministic undirected ring graph over voxel nodes (static graph).
    idx = np.arange(n_voxel)
    src = np.concatenate([idx, (idx + 1) % n_voxel])
    dst = np.concatenate([(idx + 1) % n_voxel, idx])
    edge_index = np.stack([src, dst]).astype(np.int32)
    a_norm = jnp.asarray(build_normalized_adjacency_np(edge_index, n_voxel))

    fwd = jax.jit(voxel_gnn_generator_forward)
    label_hard, label_soft = fwd(param_slab, local_x, local_type, voxel_x,
                                 voxel_type, a_norm, z, gumbel_noise)
    jax.block_until_ready((label_hard, label_soft))

    assert label_hard.shape == (n_voxel, NUM_CLASSES)
    assert label_soft.shape == (n_voxel, NUM_CLASSES)
    assert bool(jnp.all(jnp.isfinite(label_soft)))
    assert bool(jnp.all(jnp.isfinite(label_hard)))
    # hard rows are exact one-hots
    assert bool(jnp.allclose(jnp.sum(label_hard, axis=-1), 1.0, atol=1e-5))
    # soft rows sum to 1 (exact-divide softmax)
    assert bool(jnp.allclose(jnp.sum(label_soft, axis=-1), 1.0, atol=1e-4))

    print("KERNEL_OK")
</pallas_src>

<mosaic_0001>
module attributes {stable_mosaic.version = 11 : i64} {
  func.func @_fused_generator_kernel(%arg0: memref<712x128xf32, #tpu.memory_space<vmem>>, %arg1: memref<64x384xf32, #tpu.memory_space<vmem>>, %arg2: memref<16x8xf32, #tpu.memory_space<vmem>>, %arg3: memref<64x64xf32, #tpu.memory_space<vmem>>, %arg4: memref<64x256xf32, #tpu.memory_space<vmem>>) attributes {dimension_semantics = [], scalar_prefetch = 0 : i64, scratch_operands = 0 : i64, tpu.core_type = #tpu.core_type<tc>} {
    %c0 = arith.constant 0 : index
    %c0_0 = arith.constant 0 : index
    %0 = vector.load %arg1[%c0, %c0_0] : memref<64x384xf32, #tpu.memory_space<vmem>>, vector<64x16xf32>
    %c0_1 = arith.constant 0 : index
    %c128 = arith.constant 128 : index
    %1 = vector.load %arg1[%c0_1, %c128] : memref<64x384xf32, #tpu.memory_space<vmem>>, vector<64x24xf32>
    %c0_2 = arith.constant 0 : index
    %c256 = arith.constant 256 : index
    %2 = vector.load %arg1[%c0_2, %c256] : memref<64x384xf32, #tpu.memory_space<vmem>>, vector<64x128xf32>
    %c0_3 = arith.constant 0 : index
    %c0_4 = arith.constant 0 : index
    %3 = vector.load %arg2[%c0_3, %c0_4] : memref<16x8xf32, #tpu.memory_space<vmem>>, vector<16x8xf32>
    %4 = arith.truncf %0 : vector<64x16xf32> to vector<64x16xbf16>
    %5 = arith.truncf %3 : vector<16x8xf32> to vector<16x8xbf16>
    %cst = arith.constant dense<0.000000e+00> : vector<64x8xf32>
    %6 = tpu.matmul %4, %5, %cst {dimension_numbers = #tpu.dot_dimension_numbers<[1], [0], [0], [1], [0, 0, 1, 1], [], []>} : vector<64x16xbf16>, vector<16x8xbf16>, vector<64x8xf32> -> vector<64x8xf32>
    %c0_5 = arith.constant 0 : index
    %c0_6 = arith.constant 0 : index
    %7 = vector.load %arg0[%c0_5, %c0_6] : memref<712x128xf32, #tpu.memory_space<vmem>>, vector<8x32xf32>
    %8 = arith.truncf %6 : vector<64x8xf32> to vector<64x8xbf16>
    %9 = arith.truncf %7 : vector<8x32xf32> to vector<8x32xbf16>
    %cst_7 = arith.constant dense<0.000000e+00> : vector<64x32xf32>
    %10 = tpu.matmul %8, %9, %cst_7 {dimension_numbers = #tpu.dot_dimension_numbers<[1], [0], [0], [1], [0, 0, 1, 1], [], []>} : vector<64x8xbf16>, vector<8x32xbf16>, vector<64x32xf32> -> vector<64x32xf32>
    %c8 = arith.constant 8 : index
    %c0_8 = arith.constant 0 : index
    %11 = vector.load %arg0[%c8, %c0_8] : memref<712x128xf32, #tpu.memory_space<vmem>>, vector<4x32xf32>
    %12 = vector.extract_strided_slice %11 {offsets = [0, 0], sizes = [1, 32], strides = [1, 1]} : vector<4x32xf32> to vector<1x32xf32>
    %13 = vector.broadcast %12 : vector<1x32xf32> to vector<64x32xf32>
    %14 = arith.addf %10, %13 : vector<64x32xf32>
    %cst_9 = arith.constant dense<0.000000e+00> : vector<32xf32>
    %15 = vector.multi_reduction <add>, %14, %cst_9 [0] : vector<64x32xf32> to vector<32xf32>
    %16 = vector.shape_cast %15 : vector<32xf32> to vector<1x32xf32>
    %17 = arith.mulf %14, %14 : vector<64x32xf32>
    %cst_10 = arith.constant dense<0.000000e+00> : vector<32xf32>
    %18 = vector.multi_reduction <add>, %17, %cst_10 [0] : vector<64x32xf32> to vector<32xf32>
    %19 = vector.shape_cast %18 : vector<32xf32> to vector<1x32xf32>
    %cst_11 = arith.constant 1.562500e-02 : f32
    %20 = vector.broadcast %cst_11 : f32 to vector<1x32xf32>
    %21 = arith.mulf %16, %20 : vector<1x32xf32>
    %cst_12 = arith.constant 1.562500e-02 : f32
    %22 = vector.broadcast %cst_12 : f32 to vector<1x32xf32>
    %23 = arith.mulf %19, %22 : vector<1x32xf32>
    %24 = arith.mulf %21, %21 : vector<1x32xf32>
    %25 = arith.subf %23, %24 : vector<1x32xf32>
    %cst_13 = arith.constant 0.000000e+00 : f32
    %26 = vector.broadcast %cst_13 : f32 to vector<1x32xf32>
    %27 = arith.maximumf %25, %26 : vector<1x32xf32>
    %28 = vector.broadcast %21 : vector<1x32xf32> to vector<64x32xf32>
    %29 = arith.subf %14, %28 : vector<64x32xf32>
    %cst_14 = arith.constant 9.99999974E-6 : f32
    %30 = vector.broadcast %cst_14 : f32 to vector<1x32xf32>
    %31 = arith.addf %27, %30 : vector<1x32xf32>
    %32 = math.rsqrt %31 : vector<1x32xf32>
    %33 = vector.broadcast %32 : vector<1x32xf32> to vector<64x32xf32>
    %34 = arith.mulf %29, %33 : vector<64x32xf32>
    %35 = vector.extract_strided_slice %11 {offsets = [1, 0], sizes = [1, 32], strides = [1, 1]} : vector<4x32xf32> to vector<1x32xf32>
    %36 = vector.broadcast %35 : vector<1x32xf32> to vector<64x32xf32>
    %37 = arith.mulf %34, %36 : vector<64x32xf32>
    %38 = vector.extract_strided_slice %11 {offsets = [2, 0], sizes = [1, 32], strides = [1, 1]} : vector<4x32xf32> to vector<1x32xf32>
    %39 = vector.broadcast %38 : vector<1x32xf32> to vector<64x32xf32>
    %40 = arith.addf %37, %39 : vector<64x32xf32>
    %cst_15 = arith.constant 0.000000e+00 : f32
    %41 = vector.broadcast %cst_15 : f32 to vector<64x32xf32>
    %42 = arith.cmpf ogt, %40, %41 : vector<64x32xf32>
    %cst_16 = arith.constant 2.000000e-01 : f32
    %43 = vector.broadcast %cst_16 : f32 to vector<64x32xf32>
    %44 = arith.mulf %43, %40 : vector<64x32xf32>
    %45 = arith.select %42, %40, %44 : vector<64x32xi1>, vector<64x32xf32>
    %c16 = arith.constant 16 : index
    %c0_17 = arith.constant 0 : index
    %46 = vector.load %arg0[%c16, %c0_17] : memref<712x128xf32, #tpu.memory_space<vmem>>, vector<32x32xf32>
    %47 = arith.truncf %45 : vector<64x32xf32> to vector<64x32xbf16>
    %48 = arith.truncf %46 : vector<32x32xf32> to vector<32x32xbf16>
    %cst_18 = arith.constant dense<0.000000e+00> : vector<64x32xf32>
    %49 = tpu.matmul %47, %48, %cst_18 {dimension_numbers = #tpu.dot_dimension_numbers<[1], [0], [0], [1], [0, 0, 1, 1], [], []>} : vector<64x32xbf16>, vector<32x32xbf16>, vector<64x32xf32> -> vector<64x32xf32>
    %c48 = arith.constant 48 : index
    %c0_19 = arith.constant 0 : index
    %50 = vector.load %arg0[%c48, %c0_19] : memref<712x128xf32, #tpu.memory_space<vmem>>, vector<4x32xf32>
    %51 = vector.extract_strided_slice %50 {offsets = [0, 0], sizes = [1, 32], strides = [1, 1]} : vector<4x32xf32> to vector<1x32xf32>
    %52 = vector.broadcast %51 : vector<1x32xf32> to vector<64x32xf32>
    %53 = arith.addf %49, %52 : vector<64x32xf32>
    %cst_20 = arith.constant dense<0.000000e+00> : vector<32xf32>
    %54 = vector.multi_reduction <add>, %53, %cst_20 [0] : vector<64x32xf32> to vector<32xf32>
    %55 = vector.shape_cast %54 : vector<32xf32> to vector<1x32xf32>
    %56 = arith.mulf %53, %53 : vector<64x32xf32>
    %cst_21 = arith.constant dense<0.000000e+00> : vector<32xf32>
    %57 = vector.multi_reduction <add>, %56, %cst_21 [0] : vector<64x32xf32> to vector<32xf32>
    %58 = vector.shape_cast %57 : vector<32xf32> to vector<1x32xf32>
    %cst_22 = arith.constant 1.562500e-02 : f32
    %59 = vector.broadcast %cst_22 : f32 to vector<1x32xf32>
    %60 = arith.mulf %55, %59 : vector<1x32xf32>
    %cst_23 = arith.constant 1.562500e-02 : f32
    %61 = vector.broadcast %cst_23 : f32 to vector<1x32xf32>
    %62 = arith.mulf %58, %61 : vector<1x32xf32>
    %63 = arith.mulf %60, %60 : vector<1x32xf32>
    %64 = arith.subf %62, %63 : vector<1x32xf32>
    %cst_24 = arith.constant 0.000000e+00 : f32
    %65 = vector.broadcast %cst_24 : f32 to vector<1x32xf32>
    %66 = arith.maximumf %64, %65 : vector<1x32xf32>
    %67 = vector.broadcast %60 : vector<1x32xf32> to vector<64x32xf32>
    %68 = arith.subf %53, %67 : vector<64x32xf32>
    %cst_25 = arith.constant 9.99999974E-6 : f32
    %69 = vector.broadcast %cst_25 : f32 to vector<1x32xf32>
    %70 = arith.addf %66, %69 : vector<1x32xf32>
    %71 = math.rsqrt %70 : vector<1x32xf32>
    %72 = vector.broadcast %71 : vector<1x32xf32> to vector<64x32xf32>
    %73 = arith.mulf %68, %72 : vector<64x32xf32>
    %74 = vector.extract_strided_slice %50 {offsets = [1, 0], sizes = [1, 32], strides = [1, 1]} : vector<4x32xf32> to vector<1x32xf32>
    %75 = vector.broadcast %74 : vector<1x32xf32> to vector<64x32xf32>
    %76 = arith.mulf %73, %75 : vector<64x32xf32>
    %77 = vector.extract_strided_slice %50 {offsets = [2, 0], sizes = [1, 32], strides = [1, 1]} : vector<4x32xf32> to vector<1x32xf32>
    %78 = vector.broadcast %77 : vector<1x32xf32> to vector<64x32xf32>
    %79 = arith.addf %76, %78 : vector<64x32xf32>
    %cst_26 = arith.constant 0.000000e+00 : f32
    %80 = vector.broadcast %cst_26 : f32 to vector<64x32xf32>
    %81 = arith.cmpf ogt, %79, %80 : vector<64x32xf32>
    %cst_27 = arith.constant 2.000000e-01 : f32
    %82 = vector.broadcast %cst_27 : f32 to vector<64x32xf32>
    %83 = arith.mulf %82, %79 : vector<64x32xf32>
    %84 = arith.select %81, %79, %83 : vector<64x32xi1>, vector<64x32xf32>
    %c56 = arith.constant 56 : index
    %c0_28 = arith.constant 0 : index
    %85 = vector.load %arg0[%c56, %c0_28] : memref<712x128xf32, #tpu.memory_space<vmem>>, vector<32x64xf32>
    %86 = arith.truncf %84 : vector<64x32xf32> to vector<64x32xbf16>
    %87 = arith.truncf %85 : vector<32x64xf32> to vector<32x64xbf16>
    %cst_29 = arith.constant dense<0.000000e+00> : vector<64x64xf32>
    %88 = tpu.matmul %86, %87, %cst_29 {dimension_numbers = #tpu.dot_dimension_numbers<[1], [0], [0], [1], [0, 0, 1, 1], [], []>} : vector<64x32xbf16>, vector<32x64xbf16>, vector<64x64xf32> -> vector<64x64xf32>
    %c88 = arith.constant 88 : index
    %c0_30 = arith.constant 0 : index
    %89 = vector.load %arg0[%c88, %c0_30] : memref<712x128xf32, #tpu.memory_space<vmem>>, vector<24x64xf32>
    %90 = arith.truncf %1 : vector<64x24xf32> to vector<64x24xbf16>
    %91 = arith.truncf %89 : vector<24x64xf32> to vector<24x64xbf16>
    %cst_31 = arith.constant dense<0.000000e+00> : vector<64x64xf32>
    %92 = tpu.matmul %90, %91, %cst_31 {dimension_numbers = #tpu.dot_dimension_numbers<[1], [0], [0], [1], [0, 0, 1, 1], [], []>} : vector<64x24xbf16>, vector<24x64xbf16>, vector<64x64xf32> -> vector<64x64xf32>
    %93 = arith.addf %88, %92 : vector<64x64xf32>
    %c112 = arith.constant 112 : index
    %c0_32 = arith.constant 0 : index
    %94 = vector.load %arg0[%c112, %c0_32] : memref<712x128xf32, #tpu.memory_space<vmem>>, vector<4x64xf32>
    %95 = vector.extract_strided_slice %94 {offsets = [0, 0], sizes = [1, 64], strides = [1, 1]} : vector<4x64xf32> to vector<1x64xf32>
    %96 = vector.broadcast %95 : vector<1x64xf32> to vector<64x64xf32>
    %97 = arith.addf %93, %96 : vector<64x64xf32>
    %cst_33 = arith.constant dense<0.000000e+00> : vector<64xf32>
    %98 = vector.multi_reduction <add>, %97, %cst_33 [0] : vector<64x64xf32> to vector<64xf32>
    %99 = vector.shape_cast %98 : vector<64xf32> to vector<1x64xf32>
    %100 = arith.mulf %97, %97 : vector<64x64xf32>
    %cst_34 = arith.constant dense<0.000000e+00> : vector<64xf32>
    %101 = vector.multi_reduction <add>, %100, %cst_34 [0] : vector<64x64xf32> to vector<64xf32>
    %102 = vector.shape_cast %101 : vector<64xf32> to vector<1x64xf32>
    %cst_35 = arith.constant 1.562500e-02 : f32
    %103 = vector.broadcast %cst_35 : f32 to vector<1x64xf32>
    %104 = arith.mulf %99, %103 : vector<1x64xf32>
    %cst_36 = arith.constant 1.562500e-02 : f32
    %105 = vector.broadcast %cst_36 : f32 to vector<1x64xf32>
    %106 = arith.mulf %102, %105 : vector<1x64xf32>
    %107 = arith.mulf %104, %104 : vector<1x64xf32>
    %108 = arith.subf %106, %107 : vector<1x64xf32>
    %cst_37 = arith.constant 0.000000e+00 : f32
    %109 = vector.broadcast %cst_37 : f32 to vector<1x64xf32>
    %110 = arith.maximumf %108, %109 : vector<1x64xf32>
    %111 = vector.broadcast %104 : vector<1x64xf32> to vector<64x64xf32>
    %112 = arith.subf %97, %111 : vector<64x64xf32>
    %cst_38 = arith.constant 9.99999974E-6 : f32
    %113 = vector.broadcast %cst_38 : f32 to vector<1x64xf32>
    %114 = arith.addf %110, %113 : vector<1x64xf32>
    %115 = math.rsqrt %114 : vector<1x64xf32>
    %116 = vector.broadcast %115 : vector<1x64xf32> to vector<64x64xf32>
    %117 = arith.mulf %112, %116 : vector<64x64xf32>
    %118 = vector.extract_strided_slice %94 {offsets = [1, 0], sizes = [1, 64], strides = [1, 1]} : vector<4x64xf32> to vector<1x64xf32>
    %119 = vector.broadcast %118 : vector<1x64xf32> to vector<64x64xf32>
    %120 = arith.mulf %117, %119 : vector<64x64xf32>
    %121 = vector.extract_strided_slice %94 {offsets = [2, 0], sizes = [1, 64], strides = [1, 1]} : vector<4x64xf32> to vector<1x64xf32>
    %122 = vector.broadcast %121 : vector<1x64xf32> to vector<64x64xf32>
    %123 = arith.addf %120, %122 : vector<64x64xf32>
    %cst_39 = arith.constant 0.000000e+00 : f32
    %124 = vector.broadcast %cst_39 : f32 to vector<64x64xf32>
    %125 = arith.cmpf ogt, %123, %124 : vector<64x64xf32>
    %cst_40 = arith.constant 2.000000e-01 : f32
    %126 = vector.broadcast %cst_40 : f32 to vector<64x64xf32>
    %127 = arith.mulf %126, %123 : vector<64x64xf32>
    %128 = arith.select %125, %123, %127 : vector<64x64xi1>, vector<64x64xf32>
    %c120 = arith.constant 120 : index
    %c0_41 = arith.constant 0 : index
    %129 = vector.load %arg0[%c120, %c0_41] : memref<712x128xf32, #tpu.memory_space<vmem>>, vector<64x64xf32>
    %130 = arith.truncf %128 : vector<64x64xf32> to vector<64x64xbf16>
    %131 = arith.truncf %129 : vector<64x64xf32> to vector<64x64xbf16>
    %cst_42 = arith.constant dense<0.000000e+00> : vector<64x64xf32>
    %132 = tpu.matmul %130, %131, %cst_42 {dimension_numbers = #tpu.dot_dimension_numbers<[1], [0], [0], [1], [0, 0, 1, 1], [], []>} : vector<64x64xbf16>, vector<64x64xbf16>, vector<64x64xf32> -> vector<64x64xf32>
    %c184 = arith.constant 184 : index
    %c0_43 = arith.constant 0 : index
    %133 = vector.load %arg0[%c184, %c0_43] : memref<712x128xf32, #tpu.memory_space<vmem>>, vector<4x64xf32>
    %134 = vector.extract_strided_slice %133 {offsets = [0, 0], sizes = [1, 64], strides = [1, 1]} : vector<4x64xf32> to vector<1x64xf32>
    %135 = vector.broadcast %134 : vector<1x64xf32> to vector<64x64xf32>
    %136 = arith.addf %132, %135 : vector<64x64xf32>
    %cst_44 = arith.constant dense<0.000000e+00> : vector<64xf32>
    %137 = vector.multi_reduction <add>, %136, %cst_44 [0] : vector<64x64xf32> to vector<64xf32>
    %138 = vector.shape_cast %137 : vector<64xf32> to vector<1x64xf32>
    %139 = arith.mulf %136, %136 : vector<64x64xf32>
    %cst_45 = arith.constant dense<0.000000e+00> : vector<64xf32>
    %140 = vector.multi_reduction <add>, %139, %cst_45 [0] : vector<64x64xf32> to vector<64xf32>
    %141 = vector.shape_cast %140 : vector<64xf32> to vector<1x64xf32>
    %cst_46 = arith.constant 1.562500e-02 : f32
    %142 = vector.broadcast %cst_46 : f32 to vector<1x64xf32>
    %143 = arith.mulf %138, %142 : vector<1x64xf32>
    %cst_47 = arith.constant 1.562500e-02 : f32
    %144 = vector.broadcast %cst_47 : f32 to vector<1x64xf32>
    %145 = arith.mulf %141, %144 : vector<1x64xf32>
    %146 = arith.mulf %143, %143 : vector<1x64xf32>
    %147 = arith.subf %145, %146 : vector<1x64xf32>
    %cst_48 = arith.constant 0.000000e+00 : f32
    %148 = vector.broadcast %cst_48 : f32 to vector<1x64xf32>
    %149 = arith.maximumf %147, %148 : vector<1x64xf32>
    %150 = vector.broadcast %143 : vector<1x64xf32> to vector<64x64xf32>
    %151 = arith.subf %136, %150 : vector<64x64xf32>
    %cst_49 = arith.constant 9.99999974E-6 : f32
    %152 = vector.broadcast %cst_49 : f32 to vector<1x64xf32>
    %153 = arith.addf %149, %152 : vector<1x64xf32>
    %154 = math.rsqrt %153 : vector<1x64xf32>
    %155 = vector.broadcast %154 : vector<1x64xf32> to vector<64x64xf32>
    %156 = arith.mulf %151, %155 : vector<64x64xf32>
    %157 = vector.extract_strided_slice %133 {offsets = [1, 0], sizes = [1, 64], strides = [1, 1]} : vector<4x64xf32> to vector<1x64xf32>
    %158 = vector.broadcast %157 : vector<1x64xf32> to vector<64x64xf32>
    %159 = arith.mulf %156, %158 : vector<64x64xf32>
    %160 = vector.extract_strided_slice %133 {offsets = [2, 0], sizes = [1, 64], strides = [1, 1]} : vector<4x64xf32> to vector<1x64xf32>
    %161 = vector.broadcast %160 : vector<1x64xf32> to vector<64x64xf32>
    %162 = arith.addf %159, %161 : vector<64x64xf32>
    %cst_50 = arith.constant 0.000000e+00 : f32
    %163 = vector.broadcast %cst_50 : f32 to vector<64x64xf32>
    %164 = arith.cmpf ogt, %162, %163 : vector<64x64xf32>
    %cst_51 = arith.constant 2.000000e-01 : f32
    %165 = vector.broadcast %cst_51 : f32 to vector<64x64xf32>
    %166 = arith.mulf %165, %162 : vector<64x64xf32>
    %167 = arith.select %164, %162, %166 : vector<64x64xi1>, vector<64x64xf32>
    %c0_52 = arith.constant 0 : index
    %c0_53 = arith.constant 0 : index
    %168 = vector.load %arg3[%c0_52, %c0_53] : memref<64x64xf32, #tpu.memory_space<vmem>>, vector<64x64xf32>
    %169 = arith.truncf %168 : vector<64x64xf32> to vector<64x64xbf16>
    %c192 = arith.constant 192 : index
    %c0_54 = arith.constant 0 : index
    %170 = vector.load %arg0[%c192, %c0_54] : memref<712x128xf32, #tpu.memory_space<vmem>>, vector<64x32xf32>
    %171 = arith.truncf %167 : vector<64x64xf32> to vector<64x64xbf16>
    %172 = arith.truncf %170 : vector<64x32xf32> to vector<64x32xbf16>
    %cst_55 = arith.constant dense<0.000000e+00> : vector<64x32xf32>
    %173 = tpu.matmul %171, %172, %cst_55 {dimension_numbers = #tpu.dot_dimension_numbers<[1], [0], [0], [1], [0, 0, 1, 1], [], []>} : vector<64x64xbf16>, vector<64x32xbf16>, vector<64x32xf32> -> vector<64x32xf32>
    %174 = arith.truncf %173 : vector<64x32xf32> to vector<64x32xbf16>
    %cst_56 = arith.constant dense<0.000000e+00> : vector<64x32xf32>
    %175 = tpu.matmul %169, %174, %cst_56 {dimension_numbers = #tpu.dot_dimension_numbers<[1], [0], [0], [1], [0, 0, 1, 1], [], []>} : vector<64x64xbf16>, vector<64x32xbf16>, vector<64x32xf32> -> vector<64x32xf32>
    %c256_57 = arith.constant 256 : index
    %c0_58 = arith.constant 0 : index
    %176 = vector.load %arg0[%c256_57, %c0_58] : memref<712x128xf32, #tpu.memory_space<vmem>>, vector<4x32xf32>
    %177 = vector.extract_strided_slice %176 {offsets = [0, 0], sizes = [1, 32], strides = [1, 1]} : vector<4x32xf32> to vector<1x32xf32>
    %178 = vector.broadcast %177 : vector<1x32xf32> to vector<64x32xf32>
    %179 = arith.addf %175, %178 : vector<64x32xf32>
    %180 = vector.extract_strided_slice %176 {offsets = [1, 0], sizes = [1, 32], strides = [1, 1]} : vector<4x32xf32> to vector<1x32xf32>
    %cst_59 = arith.constant dense<0.000000e+00> : vector<32xf32>
    %181 = vector.multi_reduction <add>, %179, %cst_59 [0] : vector<64x32xf32> to vector<32xf32>
    %182 = vector.shape_cast %181 : vector<32xf32> to vector<1x32xf32>
    %183 = arith.mulf %179, %179 : vector<64x32xf32>
    %cst_60 = arith.constant dense<0.000000e+00> : vector<32xf32>
    %184 = vector.multi_reduction <add>, %183, %cst_60 [0] : vector<64x32xf32> to vector<32xf32>
    %185 = vector.shape_cast %184 : vector<32xf32> to vector<1x32xf32>
    %cst_61 = arith.constant 1.562500e-02 : f32
    %186 = vector.broadcast %cst_61 : f32 to vector<1x32xf32>
    %187 = arith.mulf %182, %186 : vector<1x32xf32>
    %cst_62 = arith.constant 1.562500e-02 : f32
    %188 = vector.broadcast %cst_62 : f32 to vector<1x32xf32>
    %189 = arith.mulf %185, %188 : vector<1x32xf32>
    %cst_63 = arith.constant 2.000000e+00 : f32
    %190 = vector.broadcast %cst_63 : f32 to vector<1x32xf32>
    %191 = arith.mulf %190, %180 : vector<1x32xf32>
    %192 = arith.mulf %180, %180 : vector<1x32xf32>
    %193 = arith.subf %191, %192 : vector<1x32xf32>
    %194 = arith.mulf %187, %187 : vector<1x32xf32>
    %195 = arith.mulf %193, %194 : vector<1x32xf32>
    %196 = arith.subf %189, %195 : vector<1x32xf32>
    %cst_64 = arith.constant 0.000000e+00 : f32
    %197 = vector.broadcast %cst_64 : f32 to vector<1x32xf32>
    %198 = arith.maximumf %196, %197 : vector<1x32xf32>
    %199 = arith.mulf %180, %187 : vector<1x32xf32>
    %200 = vector.broadcast %199 : vector<1x32xf32> to vector<64x32xf32>
    %201 = arith.subf %179, %200 : vector<64x32xf32>
    %cst_65 = arith.constant 9.99999974E-6 : f32
    %202 = vector.broadcast %cst_65 : f32 to vector<1x32xf32>
    %203 = arith.addf %198, %202 : vector<1x32xf32>
    %204 = math.rsqrt %203 : vector<1x32xf32>
    %205 = vector.broadcast %204 : vector<1x32xf32> to vector<64x32xf32>
    %206 = arith.mulf %201, %205 : vector<64x32xf32>
    %207 = vector.extract_strided_slice %176 {offsets = [2, 0], sizes = [1, 32], strides = [1, 1]} : vector<4x32xf32> to vector<1x32xf32>
    %208 = vector.broadcast %207 : vector<1x32xf32> to vector<64x32xf32>
    %209 = arith.mulf %206, %208 : vector<64x32xf32>
    %210 = vector.extract_strided_slice %176 {offsets = [3, 0], sizes = [1, 32], strides = [1, 1]} : vector<4x32xf32> to vector<1x32xf32>
    %211 = vector.broadcast %210 : vector<1x32xf32> to vector<64x32xf32>
    %212 = arith.addf %209, %211 : vector<64x32xf32>
    %cst_66 = arith.constant 0.000000e+00 : f32
    %213 = vector.broadcast %cst_66 : f32 to vector<64x32xf32>
    %214 = arith.maximumf %212, %213 : vector<64x32xf32>
    %c264 = arith.constant 264 : index
    %c0_67 = arith.constant 0 : index
    %215 = vector.load %arg0[%c264, %c0_67] : memref<712x128xf32, #tpu.memory_space<vmem>>, vector<32x16xf32>
    %216 = arith.truncf %214 : vector<64x32xf32> to vector<64x32xbf16>
    %217 = arith.truncf %215 : vector<32x16xf32> to vector<32x16xbf16>
    %cst_68 = arith.constant dense<0.000000e+00> : vector<64x16xf32>
    %218 = tpu.matmul %216, %217, %cst_68 {dimension_numbers = #tpu.dot_dimension_numbers<[1], [0], [0], [1], [0, 0, 1, 1], [], []>} : vector<64x32xbf16>, vector<32x16xbf16>, vector<64x16xf32> -> vector<64x16xf32>
    %219 = arith.truncf %218 : vector<64x16xf32> to vector<64x16xbf16>
    %cst_69 = arith.constant dense<0.000000e+00> : vector<64x16xf32>
    %220 = tpu.matmul %169, %219, %cst_69 {dimension_numbers = #tpu.dot_dimension_numbers<[1], [0], [0], [1], [0, 0, 1, 1], [], []>} : vector<64x64xbf16>, vector<64x16xbf16>, vector<64x16xf32> -> vector<64x16xf32>
    %c296 = arith.constant 296 : index
    %c0_70 = arith.constant 0 : index
    %221 = vector.load %arg0[%c296, %c0_70] : memref<712x128xf32, #tpu.memory_space<vmem>>, vector<4x16xf32>
    %222 = vector.extract_strided_slice %221 {offsets = [0, 0], sizes = [1, 16], strides = [1, 1]} : vector<4x16xf32> to vector<1x16xf32>
    %223 = vector.broadcast %222 : vector<1x16xf32> to vector<64x16xf32>
    %224 = arith.addf %220, %223 : vector<64x16xf32>
    %225 = vector.extract_strided_slice %221 {offsets = [1, 0], sizes = [1, 16], strides = [1, 1]} : vector<4x16xf32> to vector<1x16xf32>
    %cst_71 = arith.constant dense<0.000000e+00> : vector<16xf32>
    %226 = vector.multi_reduction <add>, %224, %cst_71 [0] : vector<64x16xf32> to vector<16xf32>
    %227 = vector.shape_cast %226 : vector<16xf32> to vector<1x16xf32>
    %228 = arith.mulf %224, %224 : vector<64x16xf32>
    %cst_72 = arith.constant dense<0.000000e+00> : vector<16xf32>
    %229 = vector.multi_reduction <add>, %228, %cst_72 [0] : vector<64x16xf32> to vector<16xf32>
    %230 = vector.shape_cast %229 : vector<16xf32> to vector<1x16xf32>
    %cst_73 = arith.constant 1.562500e-02 : f32
    %231 = vector.broadcast %cst_73 : f32 to vector<1x16xf32>
    %232 = arith.mulf %227, %231 : vector<1x16xf32>
    %cst_74 = arith.constant 1.562500e-02 : f32
    %233 = vector.broadcast %cst_74 : f32 to vector<1x16xf32>
    %234 = arith.mulf %230, %233 : vector<1x16xf32>
    %cst_75 = arith.constant 2.000000e+00 : f32
    %235 = vector.broadcast %cst_75 : f32 to vector<1x16xf32>
    %236 = arith.mulf %235, %225 : vector<1x16xf32>
    %237 = arith.mulf %225, %225 : vector<1x16xf32>
    %238 = arith.subf %236, %237 : vector<1x16xf32>
    %239 = arith.mulf %232, %232 : vector<1x16xf32>
    %240 = arith.mulf %238, %239 : vector<1x16xf32>
    %241 = arith.subf %234, %240 : vector<1x16xf32>
    %cst_76 = arith.constant 0.000000e+00 : f32
    %242 = vector.broadcast %cst_76 : f32 to vector<1x16xf32>
    %243 = arith.maximumf %241, %242 : vector<1x16xf32>
    %244 = arith.mulf %225, %232 : vector<1x16xf32>
    %245 = vector.broadcast %244 : vector<1x16xf32> to vector<64x16xf32>
    %246 = arith.subf %224, %245 : vector<64x16xf32>
    %cst_77 = arith.constant 9.99999974E-6 : f32
    %247 = vector.broadcast %cst_77 : f32 to vector<1x16xf32>
    %248 = arith.addf %243, %247 : vector<1x16xf32>
    %249 = math.rsqrt %248 : vector<1x16xf32>
    %250 = vector.broadcast %249 : vector<1x16xf32> to vector<64x16xf32>
    %251 = arith.mulf %246, %250 : vector<64x16xf32>
    %252 = vector.extract_strided_slice %221 {offsets = [2, 0], sizes = [1, 16], strides = [1, 1]} : vector<4x16xf32> to vector<1x16xf32>
    %253 = vector.broadcast %252 : vector<1x16xf32> to vector<64x16xf32>
    %254 = arith.mulf %251, %253 : vector<64x16xf32>
    %255 = vector.extract_strided_slice %221 {offsets = [3, 0], sizes = [1, 16], strides = [1, 1]} : vector<4x16xf32> to vector<1x16xf32>
    %256 = vector.broadcast %255 : vector<1x16xf32> to vector<64x16xf32>
    %257 = arith.addf %254, %256 : vector<64x16xf32>
    %cst_78 = arith.constant 0.000000e+00 : f32
    %258 = vector.broadcast %cst_78 : f32 to vector<64x16xf32>
    %259 = arith.maximumf %257, %258 : vector<64x16xf32>
    %c304 = arith.constant 304 : index
    %c0_79 = arith.constant 0 : index
    %260 = vector.load %arg0[%c304, %c0_79] : memref<712x128xf32, #tpu.memory_space<vmem>>, vector<16x32xf32>
    %261 = arith.truncf %259 : vector<64x16xf32> to vector<64x16xbf16>
    %cst_80 = arith.constant dense<0.000000e+00> : vector<64x16xf32>
    %262 = tpu.matmul %169, %261, %cst_80 {dimension_numbers = #tpu.dot_dimension_numbers<[1], [0], [0], [1], [0, 0, 1, 1], [], []>} : vector<64x64xbf16>, vector<64x16xbf16>, vector<64x16xf32> -> vector<64x16xf32>
    %263 = arith.truncf %262 : vector<64x16xf32> to vector<64x16xbf16>
    %264 = arith.truncf %260 : vector<16x32xf32> to vector<16x32xbf16>
    %cst_81 = arith.constant dense<0.000000e+00> : vector<64x32xf32>
    %265 = tpu.matmul %263, %264, %cst_81 {dimension_numbers = #tpu.dot_dimension_numbers<[1], [0], [0], [1], [0, 0, 1, 1], [], []>} : vector<64x16xbf16>, vector<16x32xbf16>, vector<64x32xf32> -> vector<64x32xf32>
    %c320 = arith.constant 320 : index
    %c0_82 = arith.constant 0 : index
    %266 = vector.load %arg0[%c320, %c0_82] : memref<712x128xf32, #tpu.memory_space<vmem>>, vector<4x32xf32>
    %267 = vector.extract_strided_slice %266 {offsets = [0, 0], sizes = [1, 32], strides = [1, 1]} : vector<4x32xf32> to vector<1x32xf32>
    %268 = vector.broadcast %267 : vector<1x32xf32> to vector<64x32xf32>
    %269 = arith.addf %265, %268 : vector<64x32xf32>
    %270 = vector.extract_strided_slice %266 {offsets = [1, 0], sizes = [1, 32], strides = [1, 1]} : vector<4x32xf32> to vector<1x32xf32>
    %cst_83 = arith.constant dense<0.000000e+00> : vector<32xf32>
    %271 = vector.multi_reduction <add>, %269, %cst_83 [0] : vector<64x32xf32> to vector<32xf32>
    %272 = vector.shape_cast %271 : vector<32xf32> to vector<1x32xf32>
    %273 = arith.mulf %269, %269 : vector<64x32xf32>
    %cst_84 = arith.constant dense<0.000000e+00> : vector<32xf32>
    %274 = vector.multi_reduction <add>, %273, %cst_84 [0] : vector<64x32xf32> to vector<32xf32>
    %275 = vector.shape_cast %274 : vector<32xf32> to vector<1x32xf32>
    %cst_85 = arith.constant 1.562500e-02 : f32
    %276 = vector.broadcast %cst_85 : f32 to vector<1x32xf32>
    %277 = arith.mulf %272, %276 : vector<1x32xf32>
    %cst_86 = arith.constant 1.562500e-02 : f32
    %278 = vector.broadcast %cst_86 : f32 to vector<1x32xf32>
    %279 = arith.mulf %275, %278 : vector<1x32xf32>
    %cst_87 = arith.constant 2.000000e+00 : f32
    %280 = vector.broadcast %cst_87 : f32 to vector<1x32xf32>
    %281 = arith.mulf %280, %270 : vector<1x32xf32>
    %282 = arith.mulf %270, %270 : vector<1x32xf32>
    %283 = arith.subf %281, %282 : vector<1x32xf32>
    %284 = arith.mulf %277, %277 : vector<1x32xf32>
    %285 = arith.mulf %283, %284 : vector<1x32xf32>
    %286 = arith.subf %279, %285 : vector<1x32xf32>
    %cst_88 = arith.constant 0.000000e+00 : f32
    %287 = vector.broadcast %cst_88 : f32 to vector<1x32xf32>
    %288 = arith.maximumf %286, %287 : vector<1x32xf32>
    %289 = arith.mulf %270, %277 : vector<1x32xf32>
    %290 = vector.broadcast %289 : vector<1x32xf32> to vector<64x32xf32>
    %291 = arith.subf %269, %290 : vector<64x32xf32>
    %cst_89 = arith.constant 9.99999974E-6 : f32
    %292 = vector.broadcast %cst_89 : f32 to vector<1x32xf32>
    %293 = arith.addf %288, %292 : vector<1x32xf32>
    %294 = math.rsqrt %293 : vector<1x32xf32>
    %295 = vector.broadcast %294 : vector<1x32xf32> to vector<64x32xf32>
    %296 = arith.mulf %291, %295 : vector<64x32xf32>
    %297 = vector.extract_strided_slice %266 {offsets = [2, 0], sizes = [1, 32], strides = [1, 1]} : vector<4x32xf32> to vector<1x32xf32>
    %298 = vector.broadcast %297 : vector<1x32xf32> to vector<64x32xf32>
    %299 = arith.mulf %296, %298 : vector<64x32xf32>
    %300 = vector.extract_strided_slice %266 {offsets = [3, 0], sizes = [1, 32], strides = [1, 1]} : vector<4x32xf32> to vector<1x32xf32>
    %301 = vector.broadcast %300 : vector<1x32xf32> to vector<64x32xf32>
    %302 = arith.addf %299, %301 : vector<64x32xf32>
    %cst_90 = arith.constant 0.000000e+00 : f32
    %303 = vector.broadcast %cst_90 : f32 to vector<64x32xf32>
    %304 = arith.maximumf %302, %303 : vector<64x32xf32>
    %c328 = arith.constant 328 : index
    %c0_91 = arith.constant 0 : index
    %305 = vector.load %arg0[%c328, %c0_91] : memref<712x128xf32, #tpu.memory_space<vmem>>, vector<32x64xf32>
    %306 = arith.truncf %304 : vector<64x32xf32> to vector<64x32xbf16>
    %cst_92 = arith.constant dense<0.000000e+00> : vector<64x32xf32>
    %307 = tpu.matmul %169, %306, %cst_92 {dimension_numbers = #tpu.dot_dimension_numbers<[1], [0], [0], [1], [0, 0, 1, 1], [], []>} : vector<64x64xbf16>, vector<64x32xbf16>, vector<64x32xf32> -> vector<64x32xf32>
    %308 = arith.truncf %307 : vector<64x32xf32> to vector<64x32xbf16>
    %309 = arith.truncf %305 : vector<32x64xf32> to vector<32x64xbf16>
    %cst_93 = arith.constant dense<0.000000e+00> : vector<64x64xf32>
    %310 = tpu.matmul %308, %309, %cst_93 {dimension_numbers = #tpu.dot_dimension_numbers<[1], [0], [0], [1], [0, 0, 1, 1], [], []>} : vector<64x32xbf16>, vector<32x64xbf16>, vector<64x64xf32> -> vector<64x64xf32>
    %c360 = arith.constant 360 : index
    %c0_94 = arith.constant 0 : index
    %311 = vector.load %arg0[%c360, %c0_94] : memref<712x128xf32, #tpu.memory_space<vmem>>, vector<4x64xf32>
    %312 = vector.extract_strided_slice %311 {offsets = [0, 0], sizes = [1, 64], strides = [1, 1]} : vector<4x64xf32> to vector<1x64xf32>
    %313 = vector.broadcast %312 : vector<1x64xf32> to vector<64x64xf32>
    %314 = arith.addf %310, %313 : vector<64x64xf32>
    %315 = vector.extract_strided_slice %311 {offsets = [1, 0], sizes = [1, 64], strides = [1, 1]} : vector<4x64xf32> to vector<1x64xf32>
    %cst_95 = arith.constant dense<0.000000e+00> : vector<64xf32>
    %316 = vector.multi_reduction <add>, %314, %cst_95 [0] : vector<64x64xf32> to vector<64xf32>
    %317 = vector.shape_cast %316 : vector<64xf32> to vector<1x64xf32>
    %318 = arith.mulf %314, %314 : vector<64x64xf32>
    %cst_96 = arith.constant dense<0.000000e+00> : vector<64xf32>
    %319 = vector.multi_reduction <add>, %318, %cst_96 [0] : vector<64x64xf32> to vector<64xf32>
    %320 = vector.shape_cast %319 : vector<64xf32> to vector<1x64xf32>
    %cst_97 = arith.constant 1.562500e-02 : f32
    %321 = vector.broadcast %cst_97 : f32 to vector<1x64xf32>
    %322 = arith.mulf %317, %321 : vector<1x64xf32>
    %cst_98 = arith.constant 1.562500e-02 : f32
    %323 = vector.broadcast %cst_98 : f32 to vector<1x64xf32>
    %324 = arith.mulf %320, %323 : vector<1x64xf32>
    %cst_99 = arith.constant 2.000000e+00 : f32
    %325 = vector.broadcast %cst_99 : f32 to vector<1x64xf32>
    %326 = arith.mulf %325, %315 : vector<1x64xf32>
    %327 = arith.mulf %315, %315 : vector<1x64xf32>
    %328 = arith.subf %326, %327 : vector<1x64xf32>
    %329 = arith.mulf %322, %322 : vector<1x64xf32>
    %330 = arith.mulf %328, %329 : vector<1x64xf32>
    %331 = arith.subf %324, %330 : vector<1x64xf32>
    %cst_100 = arith.constant 0.000000e+00 : f32
    %332 = vector.broadcast %cst_100 : f32 to vector<1x64xf32>
    %333 = arith.maximumf %331, %332 : vector<1x64xf32>
    %334 = arith.mulf %315, %322 : vector<1x64xf32>
    %335 = vector.broadcast %334 : vector<1x64xf32> to vector<64x64xf32>
    %336 = arith.subf %314, %335 : vector<64x64xf32>
    %cst_101 = arith.constant 9.99999974E-6 : f32
    %337 = vector.broadcast %cst_101 : f32 to vector<1x64xf32>
    %338 = arith.addf %333, %337 : vector<1x64xf32>
    %339 = math.rsqrt %338 : vector<1x64xf32>
    %340 = vector.broadcast %339 : vector<1x64xf32> to vector<64x64xf32>
    %341 = arith.mulf %336, %340 : vector<64x64xf32>
    %342 = vector.extract_strided_slice %311 {offsets = [2, 0], sizes = [1, 64], strides = [1, 1]} : vector<4x64xf32> to vector<1x64xf32>
    %343 = vector.broadcast %342 : vector<1x64xf32> to vector<64x64xf32>
    %344 = arith.mulf %341, %343 : vector<64x64xf32>
    %345 = vector.extract_strided_slice %311 {offsets = [3, 0], sizes = [1, 64], strides = [1, 1]} : vector<4x64xf32> to vector<1x64xf32>
    %346 = vector.broadcast %345 : vector<1x64xf32> to vector<64x64xf32>
    %347 = arith.addf %344, %346 : vector<64x64xf32>
    %cst_102 = arith.constant 0.000000e+00 : f32
    %348 = vector.broadcast %cst_102 : f32 to vector<64x64xf32>
    %349 = arith.maximumf %347, %348 : vector<64x64xf32>
    %c368 = arith.constant 368 : index
    %c0_103 = arith.constant 0 : index
    %350 = vector.load %arg0[%c368, %c0_103] : memref<712x128xf32, #tpu.memory_space<vmem>>, vector<64x64xf32>
    %351 = arith.truncf %349 : vector<64x64xf32> to vector<64x64xbf16>
    %352 = arith.truncf %350 : vector<64x64xf32> to vector<64x64xbf16>
    %cst_104 = arith.constant dense<0.000000e+00> : vector<64x64xf32>
    %353 = tpu.matmul %351, %352, %cst_104 {dimension_numbers = #tpu.dot_dimension_numbers<[1], [0], [0], [1], [0, 0, 1, 1], [], []>} : vector<64x64xbf16>, vector<64x64xbf16>, vector<64x64xf32> -> vector<64x64xf32>
    %c432 = arith.constant 432 : index
    %c0_105 = arith.constant 0 : index
    %354 = vector.load %arg0[%c432, %c0_105] : memref<712x128xf32, #tpu.memory_space<vmem>>, vector<64x64xf32>
    %355 = arith.truncf %167 : vector<64x64xf32> to vector<64x64xbf16>
    %356 = arith.truncf %354 : vector<64x64xf32> to vector<64x64xbf16>
    %cst_106 = arith.constant dense<0.000000e+00> : vector<64x64xf32>
    %357 = tpu.matmul %355, %356, %cst_106 {dimension_numbers = #tpu.dot_dimension_numbers<[1], [0], [0], [1], [0, 0, 1, 1], [], []>} : vector<64x64xbf16>, vector<64x64xbf16>, vector<64x64xf32> -> vector<64x64xf32>
    %358 = arith.addf %353, %357 : vector<64x64xf32>
    %c496 = arith.constant 496 : index
    %c0_107 = arith.constant 0 : index
    %359 = vector.load %arg0[%c496, %c0_107] : memref<712x128xf32, #tpu.memory_space<vmem>>, vector<32x64xf32>
    %360 = arith.truncf %84 : vector<64x32xf32> to vector<64x32xbf16>
    %361 = arith.truncf %359 : vector<32x64xf32> to vector<32x64xbf16>
    %cst_108 = arith.constant dense<0.000000e+00> : vector<64x64xf32>
    %362 = tpu.matmul %360, %361, %cst_108 {dimension_numbers = #tpu.dot_dimension_numbers<[1], [0], [0], [1], [0, 0, 1, 1], [], []>} : vector<64x32xbf16>, vector<32x64xbf16>, vector<64x64xf32> -> vector<64x64xf32>
    %363 = arith.addf %358, %362 : vector<64x64xf32>
    %c528 = arith.constant 528 : index
    %c0_109 = arith.constant 0 : index
    %364 = vector.load %arg0[%c528, %c0_109] : memref<712x128xf32, #tpu.memory_space<vmem>>, vector<24x64xf32>
    %365 = arith.truncf %1 : vector<64x24xf32> to vector<64x24xbf16>
    %366 = arith.truncf %364 : vector<24x64xf32> to vector<24x64xbf16>
    %cst_110 = arith.constant dense<0.000000e+00> : vector<64x64xf32>
    %367 = tpu.matmul %365, %366, %cst_110 {dimension_numbers = #tpu.dot_dimension_numbers<[1], [0], [0], [1], [0, 0, 1, 1], [], []>} : vector<64x24xbf16>, vector<24x64xbf16>, vector<64x64xf32> -> vector<64x64xf32>
    %368 = arith.addf %363, %367 : vector<64x64xf32>
    %c552 = arith.constant 552 : index
    %c0_111 = arith.constant 0 : index
    %369 = vector.load %arg0[%c552, %c0_111] : memref<712x128xf32, #tpu.memory_space<vmem>>, vector<4x64xf32>
    %370 = vector.extract_strided_slice %369 {offsets = [0, 0], sizes = [1, 64], strides = [1, 1]} : vector<4x64xf32> to vector<1x64xf32>
    %371 = vector.broadcast %370 : vector<1x64xf32> to vector<64x64xf32>
    %372 = arith.addf %368, %371 : vector<64x64xf32>
    %cst_112 = arith.constant dense<0.000000e+00> : vector<64xf32>
    %373 = vector.multi_reduction <add>, %372, %cst_112 [0] : vector<64x64xf32> to vector<64xf32>
    %374 = vector.shape_cast %373 : vector<64xf32> to vector<1x64xf32>
    %375 = arith.mulf %372, %372 : vector<64x64xf32>
    %cst_113 = arith.constant dense<0.000000e+00> : vector<64xf32>
    %376 = vector.multi_reduction <add>, %375, %cst_113 [0] : vector<64x64xf32> to vector<64xf32>
    %377 = vector.shape_cast %376 : vector<64xf32> to vector<1x64xf32>
    %cst_114 = arith.constant 1.562500e-02 : f32
    %378 = vector.broadcast %cst_114 : f32 to vector<1x64xf32>
    %379 = arith.mulf %374, %378 : vector<1x64xf32>
    %cst_115 = arith.constant 1.562500e-02 : f32
    %380 = vector.broadcast %cst_115 : f32 to vector<1x64xf32>
    %381 = arith.mulf %377, %380 : vector<1x64xf32>
    %382 = arith.mulf %379, %379 : vector<1x64xf32>
    %383 = arith.subf %381, %382 : vector<1x64xf32>
    %cst_116 = arith.constant 0.000000e+00 : f32
    %384 = vector.broadcast %cst_116 : f32 to vector<1x64xf32>
    %385 = arith.maximumf %383, %384 : vector<1x64xf32>
    %386 = vector.broadcast %379 : vector<1x64xf32> to vector<64x64xf32>
    %387 = arith.subf %372, %386 : vector<64x64xf32>
    %cst_117 = arith.constant 9.99999974E-6 : f32
    %388 = vector.broadcast %cst_117 : f32 to vector<1x64xf32>
    %389 = arith.addf %385, %388 : vector<1x64xf32>
    %390 = math.rsqrt %389 : vector<1x64xf32>
    %391 = vector.broadcast %390 : vector<1x64xf32> to vector<64x64xf32>
    %392 = arith.mulf %387, %391 : vector<64x64xf32>
    %393 = vector.extract_strided_slice %369 {offsets = [1, 0], sizes = [1, 64], strides = [1, 1]} : vector<4x64xf32> to vector<1x64xf32>
    %394 = vector.broadcast %393 : vector<1x64xf32> to vector<64x64xf32>
    %395 = arith.mulf %392, %394 : vector<64x64xf32>
    %396 = vector.extract_strided_slice %369 {offsets = [2, 0], sizes = [1, 64], strides = [1, 1]} : vector<4x64xf32> to vector<1x64xf32>
    %397 = vector.broadcast %396 : vector<1x64xf32> to vector<64x64xf32>
    %398 = arith.addf %395, %397 : vector<64x64xf32>
    %cst_118 = arith.constant 0.000000e+00 : f32
    %399 = vector.broadcast %cst_118 : f32 to vector<64x64xf32>
    %400 = arith.cmpf ogt, %398, %399 : vector<64x64xf32>
    %cst_119 = arith.constant 2.000000e-01 : f32
    %401 = vector.broadcast %cst_119 : f32 to vector<64x64xf32>
    %402 = arith.mulf %401, %398 : vector<64x64xf32>
    %403 = arith.select %400, %398, %402 : vector<64x64xi1>, vector<64x64xf32>
    %c560 = arith.constant 560 : index
    %c0_120 = arith.constant 0 : index
    %404 = vector.load %arg0[%c560, %c0_120] : memref<712x128xf32, #tpu.memory_space<vmem>>, vector<64x32xf32>
    %405 = arith.truncf %403 : vector<64x64xf32> to vector<64x64xbf16>
    %406 = arith.truncf %404 : vector<64x32xf32> to vector<64x32xbf16>
    %cst_121 = arith.constant dense<0.000000e+00> : vector<64x32xf32>
    %407 = tpu.matmul %405, %406, %cst_121 {dimension_numbers = #tpu.dot_dimension_numbers<[1], [0], [0], [1], [0, 0, 1, 1], [], []>} : vector<64x64xbf16>, vector<64x32xbf16>, vector<64x32xf32> -> vector<64x32xf32>
    %c624 = arith.constant 624 : index
    %c0_122 = arith.constant 0 : index
    %408 = vector.load %arg0[%c624, %c0_122] : memref<712x128xf32, #tpu.memory_space<vmem>>, vector<4x32xf32>
    %409 = vector.extract_strided_slice %408 {offsets = [0, 0], sizes = [1, 32], strides = [1, 1]} : vector<4x32xf32> to vector<1x32xf32>
    %410 = vector.broadcast %409 : vector<1x32xf32> to vector<64x32xf32>
    %411 = arith.addf %407, %410 : vector<64x32xf32>
    %cst_123 = arith.constant dense<0.000000e+00> : vector<32xf32>
    %412 = vector.multi_reduction <add>, %411, %cst_123 [0] : vector<64x32xf32> to vector<32xf32>
    %413 = vector.shape_cast %412 : vector<32xf32> to vector<1x32xf32>
    %414 = arith.mulf %411, %411 : vector<64x32xf32>
    %cst_124 = arith.constant dense<0.000000e+00> : vector<32xf32>
    %415 = vector.multi_reduction <add>, %414, %cst_124 [0] : vector<64x32xf32> to vector<32xf32>
    %416 = vector.shape_cast %415 : vector<32xf32> to vector<1x32xf32>
    %cst_125 = arith.constant 1.562500e-02 : f32
    %417 = vector.broadcast %cst_125 : f32 to vector<1x32xf32>
    %418 = arith.mulf %413, %417 : vector<1x32xf32>
    %cst_126 = arith.constant 1.562500e-02 : f32
    %419 = vector.broadcast %cst_126 : f32 to vector<1x32xf32>
    %420 = arith.mulf %416, %419 : vector<1x32xf32>
    %421 = arith.mulf %418, %418 : vector<1x32xf32>
    %422 = arith.subf %420, %421 : vector<1x32xf32>
    %cst_127 = arith.constant 0.000000e+00 : f32
    %423 = vector.broadcast %cst_127 : f32 to vector<1x32xf32>
    %424 = arith.maximumf %422, %423 : vector<1x32xf32>
    %425 = vector.broadcast %418 : vector<1x32xf32> to vector<64x32xf32>
    %426 = arith.subf %411, %425 : vector<64x32xf32>
    %cst_128 = arith.constant 9.99999974E-6 : f32
    %427 = vector.broadcast %cst_128 : f32 to vector<1x32xf32>
    %428 = arith.addf %424, %427 : vector<1x32xf32>
    %429 = math.rsqrt %428 : vector<1x32xf32>
    %430 = vector.broadcast %429 : vector<1x32xf32> to vector<64x32xf32>
    %431 = arith.mulf %426, %430 : vector<64x32xf32>
    %432 = vector.extract_strided_slice %408 {offsets = [1, 0], sizes = [1, 32], strides = [1, 1]} : vector<4x32xf32> to vector<1x32xf32>
    %433 = vector.broadcast %432 : vector<1x32xf32> to vector<64x32xf32>
    %434 = arith.mulf %431, %433 : vector<64x32xf32>
    %435 = vector.extract_strided_slice %408 {offsets = [2, 0], sizes = [1, 32], strides = [1, 1]} : vector<4x32xf32> to vector<1x32xf32>
    %436 = vector.broadcast %435 : vector<1x32xf32> to vector<64x32xf32>
    %437 = arith.addf %434, %436 : vector<64x32xf32>
    %cst_129 = arith.constant 0.000000e+00 : f32
    %438 = vector.broadcast %cst_129 : f32 to vector<64x32xf32>
    %439 = arith.cmpf ogt, %437, %438 : vector<64x32xf32>
    %cst_130 = arith.constant 2.000000e-01 : f32
    %440 = vector.broadcast %cst_130 : f32 to vector<64x32xf32>
    %441 = arith.mulf %440, %437 : vector<64x32xf32>
    %442 = arith.select %439, %437, %441 : vector<64x32xi1>, vector<64x32xf32>
    %c632 = arith.constant 632 : index
    %c0_131 = arith.constant 0 : index
    %443 = vector.load %arg0[%c632, %c0_131] : memref<712x128xf32, #tpu.memory_space<vmem>>, vector<32x16xf32>
    %444 = arith.truncf %442 : vector<64x32xf32> to vector<64x32xbf16>
    %445 = arith.truncf %443 : vector<32x16xf32> to vector<32x16xbf16>
    %cst_132 = arith.constant dense<0.000000e+00> : vector<64x16xf32>
    %446 = tpu.matmul %444, %445, %cst_132 {dimension_numbers = #tpu.dot_dimension_numbers<[1], [0], [0], [1], [0, 0, 1, 1], [], []>} : vector<64x32xbf16>, vector<32x16xbf16>, vector<64x16xf32> -> vector<64x16xf32>
    %c664 = arith.constant 664 : index
    %c0_133 = arith.constant 0 : index
    %447 = vector.load %arg0[%c664, %c0_133] : memref<712x128xf32, #tpu.memory_space<vmem>>, vector<4x16xf32>
    %448 = vector.extract_strided_slice %447 {offsets = [0, 0], sizes = [1, 16], strides = [1, 1]} : vector<4x16xf32> to vector<1x16xf32>
    %449 = vector.broadcast %448 : vector<1x16xf32> to vector<64x16xf32>
    %450 = arith.addf %446, %449 : vector<64x16xf32>
    %cst_134 = arith.constant dense<0.000000e+00> : vector<16xf32>
    %451 = vector.multi_reduction <add>, %450, %cst_134 [0] : vector<64x16xf32> to vector<16xf32>
    %452 = vector.shape_cast %451 : vector<16xf32> to vector<1x16xf32>
    %453 = arith.mulf %450, %450 : vector<64x16xf32>
    %cst_135 = arith.constant dense<0.000000e+00> : vector<16xf32>
    %454 = vector.multi_reduction <add>, %453, %cst_135 [0] : vector<64x16xf32> to vector<16xf32>
    %455 = vector.shape_cast %454 : vector<16xf32> to vector<1x16xf32>
    %cst_136 = arith.constant 1.562500e-02 : f32
    %456 = vector.broadcast %cst_136 : f32 to vector<1x16xf32>
    %457 = arith.mulf %452, %456 : vector<1x16xf32>
    %cst_137 = arith.constant 1.562500e-02 : f32
    %458 = vector.broadcast %cst_137 : f32 to vector<1x16xf32>
    %459 = arith.mulf %455, %458 : vector<1x16xf32>
    %460 = arith.mulf %457, %457 : vector<1x16xf32>
    %461 = arith.subf %459, %460 : vector<1x16xf32>
    %cst_138 = arith.constant 0.000000e+00 : f32
    %462 = vector.broadcast %cst_138 : f32 to vector<1x16xf32>
    %463 = arith.maximumf %461, %462 : vector<1x16xf32>
    %464 = vector.broadcast %457 : vector<1x16xf32> to vector<64x16xf32>
    %465 = arith.subf %450, %464 : vector<64x16xf32>
    %cst_139 = arith.constant 9.99999974E-6 : f32
    %466 = vector.broadcast %cst_139 : f32 to vector<1x16xf32>
    %467 = arith.addf %463, %466 : vector<1x16xf32>
    %468 = math.rsqrt %467 : vector<1x16xf32>
    %469 = vector.broadcast %468 : vector<1x16xf32> to vector<64x16xf32>
    %470 = arith.mulf %465, %469 : vector<64x16xf32>
    %471 = vector.extract_strided_slice %447 {offsets = [1, 0], sizes = [1, 16], strides = [1, 1]} : vector<4x16xf32> to vector<1x16xf32>
    %472 = vector.broadcast %471 : vector<1x16xf32> to vector<64x16xf32>
    %473 = arith.mulf %470, %472 : vector<64x16xf32>
    %474 = vector.extract_strided_slice %447 {offsets = [2, 0], sizes = [1, 16], strides = [1, 1]} : vector<4x16xf32> to vector<1x16xf32>
    %475 = vector.broadcast %474 : vector<1x16xf32> to vector<64x16xf32>
    %476 = arith.addf %473, %475 : vector<64x16xf32>
    %cst_140 = arith.constant 0.000000e+00 : f32
    %477 = vector.broadcast %cst_140 : f32 to vector<64x16xf32>
    %478 = arith.cmpf ogt, %476, %477 : vector<64x16xf32>
    %cst_141 = arith.constant 2.000000e-01 : f32
    %479 = vector.broadcast %cst_141 : f32 to vector<64x16xf32>
    %480 = arith.mulf %479, %476 : vector<64x16xf32>
    %481 = arith.select %478, %476, %480 : vector<64x16xi1>, vector<64x16xf32>
    %c672 = arith.constant 672 : index
    %c0_142 = arith.constant 0 : index
    %482 = vector.load %arg0[%c672, %c0_142] : memref<712x128xf32, #tpu.memory_space<vmem>>, vector<16x8xf32>
    %483 = arith.truncf %481 : vector<64x16xf32> to vector<64x16xbf16>
    %484 = arith.truncf %482 : vector<16x8xf32> to vector<16x8xbf16>
    %cst_143 = arith.constant dense<0.000000e+00> : vector<64x8xf32>
    %485 = tpu.matmul %483, %484, %cst_143 {dimension_numbers = #tpu.dot_dimension_numbers<[1], [0], [0], [1], [0, 0, 1, 1], [], []>} : vector<64x16xbf16>, vector<16x8xbf16>, vector<64x8xf32> -> vector<64x8xf32>
    %c688 = arith.constant 688 : index
    %c0_144 = arith.constant 0 : index
    %486 = vector.load %arg0[%c688, %c0_144] : memref<712x128xf32, #tpu.memory_space<vmem>>, vector<4x8xf32>
    %487 = vector.extract_strided_slice %486 {offsets = [0, 0], sizes = [1, 8], strides = [1, 1]} : vector<4x8xf32> to vector<1x8xf32>
    %488 = vector.broadcast %487 : vector<1x8xf32> to vector<64x8xf32>
    %489 = arith.addf %485, %488 : vector<64x8xf32>
    %cst_145 = arith.constant dense<0.000000e+00> : vector<8xf32>
    %490 = vector.multi_reduction <add>, %489, %cst_145 [0] : vector<64x8xf32> to vector<8xf32>
    %491 = vector.shape_cast %490 : vector<8xf32> to vector<1x8xf32>
    %492 = arith.mulf %489, %489 : vector<64x8xf32>
    %cst_146 = arith.constant dense<0.000000e+00> : vector<8xf32>
    %493 = vector.multi_reduction <add>, %492, %cst_146 [0] : vector<64x8xf32> to vector<8xf32>
    %494 = vector.shape_cast %493 : vector<8xf32> to vector<1x8xf32>
    %cst_147 = arith.constant 1.562500e-02 : f32
    %495 = vector.broadcast %cst_147 : f32 to vector<1x8xf32>
    %496 = arith.mulf %491, %495 : vector<1x8xf32>
    %cst_148 = arith.constant 1.562500e-02 : f32
    %497 = vector.broadcast %cst_148 : f32 to vector<1x8xf32>
    %498 = arith.mulf %494, %497 : vector<1x8xf32>
    %499 = arith.mulf %496, %496 : vector<1x8xf32>
    %500 = arith.subf %498, %499 : vector<1x8xf32>
    %cst_149 = arith.constant 0.000000e+00 : f32
    %501 = vector.broadcast %cst_149 : f32 to vector<1x8xf32>
    %502 = arith.maximumf %500, %501 : vector<1x8xf32>
    %503 = vector.broadcast %496 : vector<1x8xf32> to vector<64x8xf32>
    %504 = arith.subf %489, %503 : vector<64x8xf32>
    %cst_150 = arith.constant 9.99999974E-6 : f32
    %505 = vector.broadcast %cst_150 : f32 to vector<1x8xf32>
    %506 = arith.addf %502, %505 : vector<1x8xf32>
    %507 = math.rsqrt %506 : vector<1x8xf32>
    %508 = vector.broadcast %507 : vector<1x8xf32> to vector<64x8xf32>
    %509 = arith.mulf %504, %508 : vector<64x8xf32>
    %510 = vector.extract_strided_slice %486 {offsets = [1, 0], sizes = [1, 8], strides = [1, 1]} : vector<4x8xf32> to vector<1x8xf32>
    %511 = vector.broadcast %510 : vector<1x8xf32> to vector<64x8xf32>
    %512 = arith.mulf %509, %511 : vector<64x8xf32>
    %513 = vector.extract_strided_slice %486 {offsets = [2, 0], sizes = [1, 8], strides = [1, 1]} : vector<4x8xf32> to vector<1x8xf32>
    %514 = vector.broadcast %513 : vector<1x8xf32> to vector<64x8xf32>
    %515 = arith.addf %512, %514 : vector<64x8xf32>
    %cst_151 = arith.constant 0.000000e+00 : f32
    %516 = vector.broadcast %cst_151 : f32 to vector<64x8xf32>
    %517 = arith.cmpf ogt, %515, %516 : vector<64x8xf32>
    %cst_152 = arith.constant 2.000000e-01 : f32
    %518 = vector.broadcast %cst_152 : f32 to vector<64x8xf32>
    %519 = arith.mulf %518, %515 : vector<64x8xf32>
    %520 = arith.select %517, %515, %519 : vector<64x8xi1>, vector<64x8xf32>
    %c696 = arith.constant 696 : index
    %c0_153 = arith.constant 0 : index
    %521 = vector.load %arg0[%c696, %c0_153] : memref<712x128xf32, #tpu.memory_space<vmem>>, vector<8x128xf32>
    %522 = arith.truncf %520 : vector<64x8xf32> to vector<64x8xbf16>
    %523 = arith.truncf %521 : vector<8x128xf32> to vector<8x128xbf16>
    %cst_154 = arith.constant dense<0.000000e+00> : vector<64x128xf32>
    %524 = tpu.matmul %522, %523, %cst_154 {dimension_numbers = #tpu.dot_dimension_numbers<[1], [0], [0], [1], [0, 0, 1, 1], [], []>} : vector<64x8xbf16>, vector<8x128xbf16>, vector<64x128xf32> -> vector<64x128xf32>
    %c704 = arith.constant 704 : index
    %c0_155 = arith.constant 0 : index
    %525 = vector.load %arg0[%c704, %c0_155] : memref<712x128xf32, #tpu.memory_space<vmem>>, vector<1x128xf32>
    %526 = vector.broadcast %525 : vector<1x128xf32> to vector<64x128xf32>
    %527 = arith.addf %524, %526 : vector<64x128xf32>
    %528 = arith.addf %527, %2 : vector<64x128xf32>
    %cst_156 = arith.constant 1.000000e+00 : f32
    %529 = vector.broadcast %cst_156 : f32 to vector<64x128xf32>
    %530 = arith.mulf %528, %529 : vector<64x128xf32>
    %cst_157 = arith.constant dense<0xFF800000> : vector<64xf32>
    %531 = vector.multi_reduction <maximumf>, %530, %cst_157 [1] : vector<64x128xf32> to vector<64xf32>
    %532 = vector.shape_cast %531 : vector<64xf32> to vector<64x1xf32>
    %533 = vector.broadcast %532 : vector<64x1xf32> to vector<64x128xf32>
    %534 = arith.subf %530, %533 : vector<64x128xf32>
    %535 = math.exp %534 : vector<64x128xf32>
    %cst_158 = arith.constant dense<0.000000e+00> : vector<64xf32>
    %536 = vector.multi_reduction <add>, %535, %cst_158 [1] : vector<64x128xf32> to vector<64xf32>
    %537 = vector.shape_cast %536 : vector<64xf32> to vector<64x1xf32>
    %538 = vector.broadcast %537 : vector<64x1xf32> to vector<64x128xf32>
    %539 = arith.divf %535, %538 : vector<64x128xf32>
    %540 = tpu.iota {dimensions = array<i32: 1>} : vector<64x128xi32>
    %541 = vector.broadcast %532 : vector<64x1xf32> to vector<64x128xf32>
    %542 = arith.cmpf oeq, %530, %541 : vector<64x128xf32>
    %c128_i32 = arith.constant 128 : i32
    %543 = vector.broadcast %c128_i32 : i32 to vector<64x128xi32>
    %544 = arith.select %542, %540, %543 : vector<64x128xi1>, vector<64x128xi32>
    %cst_159 = arith.constant dense<2147483647> : vector<64xi32>
    %545 = vector.multi_reduction <minsi>, %544, %cst_159 [1] : vector<64x128xi32> to vector<64xi32>
    %546 = vector.shape_cast %545 : vector<64xi32> to vector<64x1xi32>
    %547 = vector.broadcast %546 : vector<64x1xi32> to vector<64x128xi32>
    %548 = arith.cmpi eq, %540, %547 : vector<64x128xi32>
    %cst_160 = arith.constant 1.000000e+00 : f32
    %cst_161 = arith.constant 0.000000e+00 : f32
    %549 = vector.broadcast %cst_160 : f32 to vector<64x128xf32>
    %550 = vector.broadcast %cst_161 : f32 to vector<64x128xf32>
    %551 = arith.select %548, %549, %550 : vector<64x128xi1>, vector<64x128xf32>
    %c0_162 = arith.constant 0 : index
    %c0_163 = arith.constant 0 : index
    %552 = vector.load %arg4[%c0_162, %c0_163] : memref<64x256xf32, #tpu.memory_space<vmem>>, vector<64x128xf32>
    tpu.vector_store %arg4[%c0_162, %c0_163], %539 {strides = array<i32>} : memref<64x256xf32, #tpu.memory_space<vmem>>, vector<64x128xf32>,
    %c0_164 = arith.constant 0 : index
    %c128_165 = arith.constant 128 : index
    %553 = vector.load %arg4[%c0_164, %c128_165] : memref<64x256xf32, #tpu.memory_space<vmem>>, vector<64x128xf32>
    tpu.vector_store %arg4[%c0_164, %c128_165], %551 {strides = array<i32>} : memref<64x256xf32, #tpu.memory_space<vmem>>, vector<64x128xf32>,
    return
  }
}

</mosaic_0001>

<bundles_post_ra>
// kernel: voxel_gnn_generator_forward.1
= control target key start
LH: loop header
LB: loop body
LE: loop exit
PB: predicated region body
PF: predicated region fallthrough
CT: control target
= control target key end

     0   :  { %vm49_vm0 = vcmask 130048   ;;  %vm151_vm1 = vcmask 1043456   ;;  %vm138_vm2 = vcmask 64512   ;;  %v134_v36 = vlaneseq  ;;  %s5859_s2 = inlined_call_operand.vmem [shape: f32[16,8], index: 2, kind: input, shape index: {}]   ;;  %s5860_s1 = inlined_call_operand.vmem [shape: f32[64,384], index: 1, kind: input, shape index: {}]   ;;  %s5861_s0 = inlined_call_operand.vmem [shape: f32[712,128], index: 0, kind: input, shape index: {}]   ;;  %s5862_s3 = inlined_call_operand.vmem [shape: f32[64,64], index: 3, kind: input, shape index: {}]   ;;  %s5863_s4 = inlined_call_operand.vmem [shape: f32[64,256], index: 4, kind: output, shape index: {}]  }
   0x1   :  { %v42_v0 = vld [vmem:[%s5859_s2] sm:$0xff]  ;;  %v43_v1 = vld [vmem:[%s5859_s2 + $0x8] sm:$0xff]  ;;  %v19_v4 = vld [vmem:[%s5860_s1 + $0x18] sm:$0xff]  ;;  %vm220_vm3 = vcmask 261120   ;;  %vm574_vm12 = vcmask 195584  }
   0x2   :  { %v18_v2 = vld [vmem:[%s5860_s1] sm:$0xff]  ;;  %v48_v3 = vpack.c.bf16 %v43_v1, %v42_v0  ;;  %v20_v5 = vld [vmem:[%s5860_s1 + $0x30] sm:$0xff]  ;;  %v21_v6 = vld [vmem:[%s5860_s1 + $0x48] sm:$0xff]  ;;  %v4371_v37 = vshrl.u32 %v134_v36, 7 }
   0x3   :  { %v44_v7 = vpack.c.bf16 %v19_v4, %v18_v2  ;;  %v22_v8 = vld [vmem:[%s5860_s1 + $0x60] sm:$0xff]  ;;  %v23_v9 = vld [vmem:[%s5860_s1 + $0x78] sm:$0xff]  ;;  %v45_v10 = vpack.c.bf16 %v21_v6, %v20_v5  ;;  %v24_v12 = vld [vmem:[%s5860_s1 + $0x90] sm:$0xff] }
   0x4   :  { %3906 = vmatprep.subr.bf16.mxu0 %v48_v3  ;;  %v46_v11 = vpack.c.bf16 %v23_v9, %v22_v8  ;;  %v25_v13 = vld [vmem:[%s5860_s1 + $0xa8] sm:$0xff]  ;;  %v127_v15 = vld [vmem:[%s5861_s0] sm:$0xff]  ;;  %v342_v30 = vld [vmem:[%s5861_s0 + $0x10] sm:$0xff]  ;;  %v4374_v38 = vsub.s32 0, %v4371_v37 }
   0x5   :  { %3907 = vmatpush3.bf16.msra.mxu0 %v48_v3  ;;  %3908 = vmatprep.mubr.msk.bf16.mxu0 %vm49_vm0, %v44_v7  ;;  %v47_v14 = vpack.c.bf16 %v25_v13, %v24_v12  ;;  %v132_v16 = vpack.c.bf16 %v127_v15, %v127_v15  ;;  %v343_v31 = vld [vmem:[%s5861_s0 + $0x18] sm:$0xff]  ;;  %v344_v33 = vld [vmem:[%s5861_s0 + $0x20] sm:$0xff]  ;;  %v345_v34 = vld [vmem:[%s5861_s0 + $0x28] sm:$0xff] }
   0x6   :  { %v350_v32 = vpack.c.bf16 %v343_v31, %v342_v30  ;;  %v351_v35 = vpack.c.bf16 %v345_v34, %v344_v33  ;;  %v4379_v39 = vld [vmem:[%s5861_s0 + $0x8] sm:$0xf] }
   0x7   :  { %4228 = vmatprep.subr.msk.bf16.mxu1 %vm151_vm1, %v132_v16  ;;  %v153_v17 = vsel %vm151_vm1, %v132_v16, 0  ;;  %v137_v40 = vrot.slane %v4379_v39, %v4374_v38 }
   0x8   :  { %3909 = vmatmul.mubr.msk.bf16.vlgmr.msra.gmra.mrb[0].mxu0 %vm49_vm0, %v45_v10  ;;  %3917 = vmatpush3.bf16.msra.mxu1 %v153_v17 }
   0x9   :  { %3912 = vmatprep.mubr.msk.bf16.mxu0 %vm49_vm0, %v46_v11  ;;  %3926 = vmatprep.subr.bf16.mxu0 %v350_v32 }
   0xa   :  { %3927 = vmatpush3.bf16.msra.mxu0 %v350_v32 }
   0xb   :  { %3928 = vmatprep.subr.bf16.mxu0 %v351_v35 }
   0xe   :  { %3929 = vmatpush3.bf16.msra.mxu0 %v351_v35 }
  0x10   :  { %3913 = vmatmul.mubr.msk.bf16.gmra.mrb[4].mxu0 %vm49_vm0, %v47_v14 }
  0xdb   :  { %v3910_v18 = vpop.f32.mrb[0].mxu0 }
  0xdc   :  { %v96_v19 = vpop.f32.mrb[1].mxu0 }
  0xdd   :  { %v3911_v20 = vpop.f32.mrb[2].mxu0 }
  0xde   :  { %v129_v21 = vpack.c.bf16 %v3911_v20, %v3910_v18  ;;  %v99_v22 = vpop.f32.mrb[3].mxu0 }
  0xdf   :  { %v128_v23 = vpack.c.bf16 %v99_v22, %v96_v19 }
  0xe1   :  { %3918 = vmatprep.mubr.msk.bf16.mxu1 %vm138_vm2, %v128_v23 }
  0xe2   :  { %3919 = vmatmul.mubr.msk.bf16.vlgmr.msra.gmra.mrb[0].mxu1 %vm138_vm2, %v129_v21 }
  0xe3   :  { %v3914_v24 = vpop.f32.mrb[4].mxu0 }
  0xe4   :  { %v112_v25 = vpop.f32.mrb[5].mxu0 }
  0xe5   :  { %v3915_v26 = vpop.f32.mrb[6].mxu0 }
  0xe6   :  { %v131_v27 = vpack.c.bf16 %v3915_v26, %v3914_v24  ;;  %v115_v28 = vpop.f32.mrb[7].mxu0 }
  0xe7   :  { %v130_v29 = vpack.c.bf16 %v115_v28, %v112_v25 }
  0xe9   :  { %3922 = vmatprep.mubr.msk.bf16.mxu1 %vm138_vm2, %v130_v29 }
  0xea   :  { %3923 = vmatmul.mubr.msk.bf16.gmra.mrb[4].mxu1 %vm138_vm2, %v131_v27 }
 0x1b5   :  { %v3920_v41 = vpop.f32.mrb[0].mxu1 }
 0x1b6   :  { %v189_v42 = vpop.f32.mrb[1].mxu1  ;;  %v4383_v43 = vadd.f32 %v3920_v41, %v137_v40 }
 0x1b7   :  { %v4385_v44 = vadd.f32 %v189_v42, %v137_v40  ;;  %v3921_v45 = vpop.f32.mrb[2].mxu1 }
 0x1b8   :  { %v192_v46 = vpop.f32.mrb[3].mxu1  ;;  %v4389_v48 = vadd.f32 %v3921_v45, %v137_v40  ;;  %v244_v50 = vmul.f32 %v4383_v43, %v4383_v43  ;;  %v224_v55 = vsel %vm220_vm3, %v4383_v43, 0.0 }
 0x1b9   :  { %v242_v47 = vmul.f32 %v4385_v44, %v4385_v44  ;;  %v4391_v49 = vadd.f32 %v192_v46, %v137_v40  ;;  %v221_v51 = vsel %vm220_vm3, %v4385_v44, 0.0 }
 0x1ba   :  { %v245_v57 = vmul.f32 %v4389_v48, %v4389_v48  ;;  %v253_v63 = vsel %vm220_vm3, %v244_v50, 0.0  ;;  %v226_v0 = vsel %vm220_vm3, %v4389_v48, 0.0 }
 0x1bb   :  { %v222_v52 = vsel %vm220_vm3, %v4391_v49, 0.0  ;;  %v243_v53 = vmul.f32 %v4391_v49, %v4391_v49  ;;  %v250_v56 = vsel %vm220_vm3, %v242_v47, 0.0 }
 0x1bc   :  { %v223_v54 = vadd.f32 %v222_v52, %v221_v51  ;;  %v255_v7 = vsel %vm220_vm3, %v245_v57, 0.0 }
 0x1bd   :  { %v251_v58 = vsel %vm220_vm3, %v243_v53, 0.0  ;;  %v3924_v59 = vpop.f32.mrb[4].mxu1 }
 0x1be   :  { %v225_v60 = vadd.f32 %v224_v55, %v223_v54  ;;  %v252_v61 = vadd.f32 %v251_v58, %v250_v56  ;;  %v205_v62 = vpop.f32.mrb[5].mxu1  ;;  %v4412_v4 = vadd.f32 %v3924_v59, %v137_v40 }
 0x1bf   :  { %v4410_v1 = vadd.f32 %v205_v62, %v137_v40  ;;  %v3925_v2 = vpop.f32.mrb[6].mxu1 }
 0x1c0   :  { %v254_v3 = vadd.f32 %v253_v63, %v252_v61  ;;  %v227_v5 = vadd.f32 %v226_v0, %v225_v60  ;;  %v208_v6 = vpop.f32.mrb[7].mxu1  ;;  %v217_v13 = vadd.f32 %v3925_v2, %v137_v40  ;;  %v248_v16 = vmul.f32 %v4412_v4, %v4412_v4 }
 0x1c1   :  { %v228_v8 = vsel %vm220_vm3, %v4410_v1, 0.0  ;;  %v246_v9 = vmul.f32 %v4410_v1, %v4410_v1  ;;  %v209_v10 = vadd.f32 %v208_v6, %v137_v40  ;;  %v232_v20 = vsel %vm220_vm3, %v4412_v4, 0.0 }
 0x1c2   :  { %v229_v11 = vadd.f32 %v228_v8, %v227_v5  ;;  %v256_v12 = vadd.f32 %v255_v7, %v254_v3  ;;  %v249_v21 = vmul.f32 %v217_v13, %v217_v13  ;;  %v234_v24 = vsel %vm220_vm3, %v217_v13, 0.0 }
 0x1c3   :  { %v257_v14 = vsel %vm220_vm3, %v246_v9, 0.0  ;;  %v230_v15 = vsel %vm220_vm3, %v209_v10, 0.0  ;;  %v247_v19 = vmul.f32 %v209_v10, %v209_v10  ;;  %v261_v26 = vsel %vm220_vm3, %v248_v16, 0.0 }
 0x1c4   :  { %v258_v17 = vadd.f32 %v257_v14, %v256_v12  ;;  %v231_v18 = vadd.f32 %v230_v15, %v229_v11  ;;  %v263_v29 = vsel %vm220_vm3, %v249_v21, 0.0  ;;  %v4436_v2 = vsub.s32 1, %v4371_v37 }
 0x1c5   :  { %v259_v23 = vsel %vm220_vm3, %v247_v19, 0.0 }
 0x1c6   :  { %v233_v22 = vadd.f32 %v232_v20, %v231_v18  ;;  %v260_v25 = vadd.f32 %v259_v23, %v258_v17 }
 0x1c8   :  { %v235_v27 = vadd.f32 %v234_v24, %v233_v22  ;;  %v262_v28 = vadd.f32 %v261_v26, %v260_v25 }
 0x1ca   :  { %v236_v30 = vrot.slane %v235_v27, 4  ;;  %v264_v31 = vadd.f32 %v263_v29, %v262_v28 }
 0x1cc   :  { %v237_v32 = vadd.f32 %v236_v30, %v235_v27  ;;  %v265_v33 = vrot.slane %v264_v31, 4 }
 0x1ce   :  { %v238_v34 = vrot.slane %v237_v32, 2  ;;  %v266_v35 = vadd.f32 %v265_v33, %v264_v31 }
 0x1d0   :  { %v239_v40 = vadd.f32 %v238_v34, %v237_v32  ;;  %v267_v41 = vrot.slane %v266_v35, 2 }
 0x1d2   :  { %v240_v42 = vrot.slane %v239_v40, 1  ;;  %v268_v45 = vadd.f32 %v267_v41, %v266_v35 }
 0x1d4   :  { %v241_v46 = vadd.f32 %v240_v42, %v239_v40  ;;  %v269_v47 = vrot.slane %v268_v45, 1 }
 0x1d6   :  { %v271_v50 = vmul.f32 0.015625, %v241_v46  ;;  %v270_v51 = vadd.f32 %v269_v47, %v268_v45 }
 0x1d8   :  { %v273_v52 = vmul.f32 %v271_v50, %v271_v50  ;;  %v281_v53 = vsub.f32 %v209_v10, %v271_v50  ;;  %v276_v54 = vsub.f32 %v4385_v44, %v271_v50  ;;  %v277_v55 = vsub.f32 %v4391_v49, %v271_v50 }
 0x1d9   :  { %v272_v56 = vmul.f32 0.015625, %v270_v51  ;;  %v278_v57 = vsub.f32 %v4383_v43, %v271_v50  ;;  %v279_v58 = vsub.f32 %v4389_v48, %v271_v50  ;;  %v280_v59 = vsub.f32 %v4410_v1, %v271_v50 }
 0x1da   :  { %v282_v60 = vsub.f32 %v4412_v4, %v271_v50  ;;  %v283_v61 = vsub.f32 %v217_v13, %v271_v50  ;;  %v4439_v44 = vsub.s32 2, %v4371_v37  ;;  %v297_v43 = vrot.slane %v4379_v39, %v4436_v2 }
 0x1db   :  { %v274_v62 = vsub.f32 %v272_v56, %v273_v52  ;;  %v567_v56 = vld [vmem:[%s5861_s0 + $0x68] sm:$0xff] }
 0x1dc   :  { %v309_v48 = vrot.slane %v4379_v39, %v4439_v44 }
 0x1dd   :  { %v275_v63 = vmax.f32 %v274_v62, 0.0  ;;  %v28_v62 = vld [vmem:[%s5860_s1 + $0x38] sm:$0xff] }
 0x1df   :  { %v284_v0 = vadd.f32 1e-05, %v275_v63  ;;  %v29_v63 = vld [vmem:[%s5860_s1 + $0x50] sm:$0xff] }
 0x1e1   :  { %4233 = vrsqrt.f32 %v284_v0  ;;  %v4474_v0 = vpack.c.bf16 %v29_v63, %v28_v62 }
 0x1eb   :  { %v4234_v49 = vpop.eup %4233 }
 0x1ec   :  { %v291_v1 = vmul.f32 %v4234_v49, %v281_v53  ;;  %v286_v3 = vmul.f32 %v4234_v49, %v276_v54  ;;  %v287_v4 = vmul.f32 %v4234_v49, %v277_v55  ;;  %v288_v5 = vmul.f32 %v4234_v49, %v278_v57  ;;  %v565_v53 = vld [vmem:[%s5861_s0 + $0x58] sm:$0xff]  ;;  %v566_v54 = vld [vmem:[%s5861_s0 + $0x60] sm:$0xff] }
 0x1ed   :  { %v289_v6 = vmul.f32 %v4234_v49, %v279_v58  ;;  %v290_v7 = vmul.f32 %v4234_v49, %v280_v59  ;;  %v292_v8 = vmul.f32 %v4234_v49, %v282_v60  ;;  %v293_v9 = vmul.f32 %v4234_v49, %v283_v61  ;;  %v26_v59 = vld [vmem:[%s5860_s1 + $0x8] sm:$0xff]  ;;  %v27_v60 = vld [vmem:[%s5860_s1 + $0x20] sm:$0xff] }
 0x1ee   :  { %v303_v10 = vmul.f32 %v297_v43, %v291_v1  ;;  %v298_v11 = vmul.f32 %v297_v43, %v286_v3  ;;  %v299_v12 = vmul.f32 %v297_v43, %v287_v4  ;;  %v300_v13 = vmul.f32 %v297_v43, %v288_v5  ;;  %v556_v49 = vld [vmem:[%s5861_s0 + $0x40] sm:$0xff]  ;;  %v32_v4 = vld [vmem:[%s5860_s1 + $0x98] sm:$0xff]  ;;  %v33_v5 = vld [vmem:[%s5860_s1 + $0xb0] sm:$0xff] }
 0x1ef   :  { %v301_v14 = vmul.f32 %v297_v43, %v289_v6  ;;  %v302_v15 = vmul.f32 %v297_v43, %v290_v7  ;;  %v304_v16 = vmul.f32 %v297_v43, %v292_v8  ;;  %v305_v17 = vmul.f32 %v297_v43, %v293_v9  ;;  %v555_v43 = vld [vmem:[%s5861_s0 + $0x38] sm:$0xff]  ;;  %v31_v3 = vld [vmem:[%s5860_s1 + $0x80] sm:$0xff]  ;;  %v557_v8 = vld [vmem:[%s5861_s0 + $0x48] sm:$0xff] }
 0x1f0   :  { %v315_v18 = vadd.f32 %v309_v48, %v303_v10  ;;  %v310_v19 = vadd.f32 %v309_v48, %v298_v11  ;;  %v311_v20 = vadd.f32 %v309_v48, %v299_v12  ;;  %v312_v39 = vadd.f32 %v309_v48, %v300_v13  ;;  %v558_v9 = vld [vmem:[%s5861_s0 + $0x50] sm:$0xff] }
 0x1f1   :  { %v313_v21 = vadd.f32 %v309_v48, %v301_v14  ;;  %v314_v22 = vadd.f32 %v309_v48, %v302_v15  ;;  %v316_v23 = vadd.f32 %v309_v48, %v304_v16  ;;  %v317_v24 = vadd.f32 %v309_v48, %v305_v17  ;;  %v30_v48 = vld [vmem:[%s5860_s1 + $0x68] sm:$0xff]  ;;  %v4515_v11 = vld [vmem:[%s5861_s0 + $0x30] sm:$0xf] }
 0x1f2   :  { %vm318_vm4 = vcmp.gt.f32.partialorder %v310_v19, 0.0  ;;  %vm319_vm5 = vcmp.gt.f32.partialorder %v311_v20, 0.0  ;;  %v326_v25 = vmul.f32 0.2, %v310_v19  ;;  %v327_v26 = vmul.f32 0.2, %v311_v20 }
 0x1f3   :  { %vm320_vm6 = vcmp.gt.f32.partialorder %v312_v39, 0.0  ;;  %vm321_vm7 = vcmp.gt.f32.partialorder %v313_v21, 0.0  ;;  %v328_v27 = vmul.f32 0.2, %v312_v39  ;;  %v329_v28 = vmul.f32 0.2, %v313_v21 }
 0x1f4   :  { %v334_v29 = vsel %vm318_vm4, %v310_v19, %v326_v25  ;;  %v335_v30 = vsel %vm319_vm5, %v311_v20, %v327_v26  ;;  %vm322_vm8 = vcmp.gt.f32.partialorder %v314_v22, 0.0  ;;  %vm323_vm9 = vcmp.gt.f32.partialorder %v315_v18, 0.0 }
 0x1f5   :  { %v346_v31 = vpack.c.bf16 %v335_v30, %v334_v29  ;;  %v336_v32 = vsel %vm320_vm6, %v312_v39, %v328_v27  ;;  %v337_v33 = vsel %vm321_vm7, %v313_v21, %v329_v28  ;;  %v330_v34 = vmul.f32 0.2, %v314_v22 }
 0x1f6   :  { %v347_v35 = vpack.c.bf16 %v337_v33, %v336_v32  ;;  %v331_v40 = vmul.f32 0.2, %v315_v18  ;;  %vm324_vm10 = vcmp.gt.f32.partialorder %v316_v23, 0.0  ;;  %vm325_vm11 = vcmp.gt.f32.partialorder %v317_v24, 0.0 }
 0x1f7   :  { %3930 = vmatprep.mubr.msk.bf16.mxu0 %vm220_vm3, %v346_v31  ;;  %v338_v41 = vsel %vm322_vm8, %v314_v22, %v330_v34  ;;  %v332_v42 = vmul.f32 0.2, %v316_v23  ;;  %v333_v45 = vmul.f32 0.2, %v317_v24  ;;  %v572_v55 = vpack.c.bf16 %v566_v54, %v565_v53 }
 0x1f8   :  { %3931 = vmatmul.mubr.msk.bf16.vlgmr.msra.gmra.mrb[8].mxu0 %vm220_vm3, %v347_v35  ;;  %v339_v46 = vsel %vm323_vm9, %v315_v18, %v331_v40  ;;  %v573_v57 = vpack.c.bf16 %v567_v56, %v567_v56  ;;  %v4466_v61 = vpack.c.bf16 %v27_v60, %v26_v59  ;;  %v563_v1 = vpack.c.bf16 %v556_v49, %v555_v43 }
 0x1f9   :  { %v348_v47 = vpack.c.bf16 %v339_v46, %v338_v41  ;;  %v340_v50 = vsel %vm324_vm10, %v316_v23, %v332_v42  ;;  %v341_v51 = vsel %vm325_vm11, %v317_v24, %v333_v45  ;;  %3938 = vmatprep.subr.bf16.mxu1 %v572_v55  ;;  %v4498_v6 = vpack.c.bf16 %v31_v3, %v30_v48 }
 0x1fa   :  { %v349_v52 = vpack.c.bf16 %v341_v51, %v340_v50  ;;  %3939 = vmatpush3.bf16.msra.mxu1 %v572_v55  ;;  %v588_v58 = vsel %vm151_vm1, %v573_v57, 0  ;;  %3942 = vmatprep.mubr.msk.bf16.mxu1 %vm574_vm12, %v4466_v61  ;;  %v4500_v7 = vpack.c.bf16 %v33_v5, %v32_v4  ;;  %v564_v10 = vpack.c.bf16 %v558_v9, %v557_v8 }
 0x1fb   :  { %3934 = vmatprep.mubr.msk.bf16.mxu0 %vm220_vm3, %v348_v47  ;;  %4229 = vmatprep.subr.msk.bf16.mxu1 %vm151_vm1, %v573_v57  ;;  %v356_v12 = vrot.slane %v4515_v11, %v4374_v38  ;;  %vm745_vm9 = vcmask 523264  }
 0x1fe   :  { %3941 = vmatpush3.bf16.msra.mxu1 %v588_v58 }
 0x1ff   :  { %3950 = vmatprep.subr.bf16.mxu1 %v563_v1 }
 0x200   :  { %3935 = vmatmul.mubr.msk.bf16.gmra.mrb[12].mxu0 %vm220_vm3, %v349_v52 }
 0x201   :  { %3943 = vmatmul.mubr.msk.bf16.vlgmr.msra.gmra.mrb[8].mxu1 %vm574_vm12, %v4474_v0 }
 0x202   :  { %3951 = vmatpush3.bf16.msra.mxu1 %v563_v1  ;;  %3946 = vmatprep.mubr.msk.bf16.mxu1 %vm574_vm12, %v4498_v6 }
 0x203   :  { %3952 = vmatprep.subr.bf16.mxu1 %v564_v10 }
 0x206   :  { %3953 = vmatpush3.bf16.msra.mxu1 %v564_v10 }
 0x209   :  { %3947 = vmatmul.mubr.msk.bf16.gmra.mrb[12].mxu1 %vm574_vm12, %v4500_v7 }
 0x2cb   :  { %v3932_v13 = vpop.f32.mrb[8].mxu0 }
 0x2cc   :  { %v403_v14 = vpop.f32.mrb[9].mxu0  ;;  %v4519_v15 = vadd.f32 %v3932_v13, %v356_v12 }
 0x2cd   :  { %v4521_v16 = vadd.f32 %v403_v14, %v356_v12  ;;  %v3933_v17 = vpop.f32.mrb[10].mxu0 }
 0x2ce   :  { %v406_v18 = vpop.f32.mrb[11].mxu0  ;;  %v4525_v20 = vadd.f32 %v3933_v17, %v356_v12  ;;  %v457_v21 = vmul.f32 %v4519_v15, %v4519_v15  ;;  %v437_v26 = vsel %vm220_vm3, %v4519_v15, 0.0 }
 0x2cf   :  { %v455_v19 = vmul.f32 %v4521_v16, %v4521_v16  ;;  %v4527_v39 = vadd.f32 %v406_v18, %v356_v12  ;;  %v434_v22 = vsel %vm220_vm3, %v4521_v16, 0.0 }
 0x2d0   :  { %v458_v28 = vmul.f32 %v4525_v20, %v4525_v20  ;;  %v466_v34 = vsel %vm220_vm3, %v457_v21, 0.0  ;;  %v439_v35 = vsel %vm220_vm3, %v4525_v20, 0.0 }
 0x2d1   :  { %v435_v23 = vsel %vm220_vm3, %v4527_v39, 0.0  ;;  %v456_v24 = vmul.f32 %v4527_v39, %v4527_v39  ;;  %v463_v27 = vsel %vm220_vm3, %v455_v19, 0.0 }
 0x2d2   :  { %v436_v25 = vadd.f32 %v435_v23, %v434_v22  ;;  %v468_v50 = vsel %vm220_vm3, %v458_v28, 0.0 }
 0x2d3   :  { %v464_v29 = vsel %vm220_vm3, %v456_v24, 0.0  ;;  %v3936_v30 = vpop.f32.mrb[12].mxu0 }
 0x2d4   :  { %v438_v31 = vadd.f32 %v437_v26, %v436_v25  ;;  %v465_v32 = vadd.f32 %v464_v29, %v463_v27  ;;  %v419_v33 = vpop.f32.mrb[13].mxu0  ;;  %v4548_v45 = vadd.f32 %v3936_v30, %v356_v12 }
 0x2d5   :  { %v4546_v40 = vadd.f32 %v419_v33, %v356_v12  ;;  %v3937_v41 = vpop.f32.mrb[14].mxu0 }
 0x2d6   :  { %v467_v42 = vadd.f32 %v466_v34, %v465_v32  ;;  %v440_v46 = vadd.f32 %v439_v35, %v438_v31  ;;  %v422_v47 = vpop.f32.mrb[15].mxu0  ;;  %v431_v56 = vadd.f32 %v3937_v41, %v356_v12  ;;  %v461_v59 = vmul.f32 %v4548_v45, %v4548_v45 }
 0x2d7   :  { %v441_v51 = vsel %vm220_vm3, %v4546_v40, 0.0  ;;  %v459_v52 = vmul.f32 %v4546_v40, %v4546_v40  ;;  %v423_v53 = vadd.f32 %v422_v47, %v356_v12  ;;  %v445_v43 = vsel %vm220_vm3, %v4548_v45, 0.0 }
 0x2d8   :  { %v442_v54 = vadd.f32 %v441_v51, %v440_v46  ;;  %v469_v55 = vadd.f32 %v468_v50, %v467_v42  ;;  %v462_v49 = vmul.f32 %v431_v56, %v431_v56  ;;  %v447_v3 = vsel %vm220_vm3, %v431_v56, 0.0 }
 0x2d9   :  { %v470_v57 = vsel %vm220_vm3, %v459_v52, 0.0  ;;  %v443_v58 = vsel %vm220_vm3, %v423_v53, 0.0  ;;  %v460_v63 = vmul.f32 %v423_v53, %v423_v53  ;;  %v474_v5 = vsel %vm220_vm3, %v461_v59, 0.0 }
 0x2da   :  { %v471_v60 = vadd.f32 %v470_v57, %v469_v55  ;;  %v444_v62 = vadd.f32 %v443_v58, %v442_v54  ;;  %v476_v10 = vsel %vm220_vm3, %v462_v49, 0.0  ;;  %v510_v52 = vrot.slane %v4515_v11, %v4436_v2 }
 0x2db   :  { %v472_v1 = vsel %vm220_vm3, %v460_v63, 0.0 }
 0x2dc   :  { %v446_v48 = vadd.f32 %v445_v43, %v444_v62  ;;  %v473_v4 = vadd.f32 %v472_v1, %v471_v60 }
 0x2de   :  { %v448_v8 = vadd.f32 %v447_v3, %v446_v48  ;;  %v475_v9 = vadd.f32 %v474_v5, %v473_v4 }
 0x2e0   :  { %v449_v12 = vrot.slane %v448_v8, 4  ;;  %v477_v13 = vadd.f32 %v476_v10, %v475_v9 }
 0x2e2   :  { %v450_v14 = vadd.f32 %v449_v12, %v448_v8  ;;  %v478_v17 = vrot.slane %v477_v13, 4 }
 0x2e4   :  { %v451_v18 = vrot.slane %v450_v14, 2  ;;  %v479_v19 = vadd.f32 %v478_v17, %v477_v13 }
 0x2e6   :  { %v452_v21 = vadd.f32 %v451_v18, %v450_v14  ;;  %v480_v22 = vrot.slane %v479_v19, 2 }
 0x2e8   :  { %v453_v23 = vrot.slane %v452_v21, 1  ;;  %v481_v24 = vadd.f32 %v480_v22, %v479_v19 }
 0x2ea   :  { %v454_v25 = vadd.f32 %v453_v23, %v452_v21  ;;  %v482_v26 = vrot.slane %v481_v24, 1 }
 0x2ec   :  { %v484_v27 = vmul.f32 0.015625, %v454_v25  ;;  %v483_v28 = vadd.f32 %v482_v26, %v481_v24 }
 0x2ee   :  { %v486_v29 = vmul.f32 %v484_v27, %v484_v27  ;;  %v494_v30 = vsub.f32 %v423_v53, %v484_v27  ;;  %v489_v31 = vsub.f32 %v4521_v16, %v484_v27  ;;  %v490_v32 = vsub.f32 %v4527_v39, %v484_v27 }
 0x2ef   :  { %v485_v33 = vmul.f32 0.015625, %v483_v28  ;;  %v491_v34 = vsub.f32 %v4519_v15, %v484_v27  ;;  %v492_v35 = vsub.f32 %v4525_v20, %v484_v27  ;;  %v493_v41 = vsub.f32 %v4546_v40, %v484_v27 }
 0x2f0   :  { %v495_v42 = vsub.f32 %v4548_v45, %v484_v27  ;;  %v496_v46 = vsub.f32 %v431_v56, %v484_v27  ;;  %v522_v39 = vrot.slane %v4515_v11, %v4439_v44 }
 0x2f1   :  { %v487_v47 = vsub.f32 %v485_v33, %v486_v29 }
 0x2f3   :  { %v488_v50 = vmax.f32 %v487_v47, 0.0 }
 0x2f5   :  { %v497_v51 = vadd.f32 1e-05, %v488_v50  ;;  %v871_v50 = vld [vmem:[%s5861_s0 + $0x98] sm:$0xff] }
 0x2f7   :  { %4235 = vrsqrt.f32 %v497_v51  ;;  %v872_v51 = vld [vmem:[%s5861_s0 + $0xa0] sm:$0xff] }
 0x301   :  { %v4236_v16 = vpop.eup %4235 }
 0x302   :  { %v504_v53 = vmul.f32 %v4236_v16, %v494_v30  ;;  %v499_v15 = vmul.f32 %v4236_v16, %v489_v31  ;;  %v500_v54 = vmul.f32 %v4236_v16, %v490_v32  ;;  %v501_v20 = vmul.f32 %v4236_v16, %v491_v34  ;;  %v867_v34 = vld [vmem:[%s5861_s0 + $0x78] sm:$0xff] }
 0x303   :  { %v502_v55 = vmul.f32 %v4236_v16, %v492_v35  ;;  %v503_v40 = vmul.f32 %v4236_v16, %v493_v41  ;;  %v505_v57 = vmul.f32 %v4236_v16, %v495_v42  ;;  %v506_v45 = vmul.f32 %v4236_v16, %v496_v46  ;;  %v868_v35 = vld [vmem:[%s5861_s0 + $0x80] sm:$0xff]  ;;  %v869_v42 = vld [vmem:[%s5861_s0 + $0x88] sm:$0xff]  ;;  %v870_v46 = vld [vmem:[%s5861_s0 + $0x90] sm:$0xff] }
 0x304   :  { %v516_v56 = vmul.f32 %v510_v52, %v504_v53  ;;  %v511_v58 = vmul.f32 %v510_v52, %v499_v15  ;;  %v512_v59 = vmul.f32 %v510_v52, %v500_v54  ;;  %v513_v60 = vmul.f32 %v510_v52, %v501_v20  ;;  %v4618_v15 = vld [vmem:[%s5861_s0 + $0x70] sm:$0xf] }
 0x305   :  { %v514_v62 = vmul.f32 %v510_v52, %v502_v55  ;;  %v515_v63 = vmul.f32 %v510_v52, %v503_v40  ;;  %v517_v43 = vmul.f32 %v510_v52, %v505_v57  ;;  %v518_v49 = vmul.f32 %v510_v52, %v506_v45  ;;  %v873_v52 = vld [vmem:[%s5861_s0 + $0xa8] sm:$0xff] }
 0x306   :  { %v528_v48 = vadd.f32 %v522_v39, %v516_v56  ;;  %v523_v1 = vadd.f32 %v522_v39, %v511_v58  ;;  %v524_v3 = vadd.f32 %v522_v39, %v512_v59  ;;  %v525_v11 = vadd.f32 %v522_v39, %v513_v60 }
 0x307   :  { %v526_v4 = vadd.f32 %v522_v39, %v514_v62  ;;  %v527_v5 = vadd.f32 %v522_v39, %v515_v63  ;;  %v529_v8 = vadd.f32 %v522_v39, %v517_v43  ;;  %v530_v9 = vadd.f32 %v522_v39, %v518_v49  ;;  %v874_v39 = vld [vmem:[%s5861_s0 + $0xb0] sm:$0xff] }
 0x308   :  { %vm531_vm13 = vcmp.gt.f32.partialorder %v523_v1, 0.0  ;;  %vm532_vm14 = vcmp.gt.f32.partialorder %v524_v3, 0.0  ;;  %v539_v10 = vmul.f32 0.2, %v523_v1  ;;  %v540_v12 = vmul.f32 0.2, %v524_v3 }
 0x309   :  { %vm533_vm15 = vcmp.gt.f32.partialorder %v525_v11, 0.0  ;;  %vm534_vm4 = vcmp.gt.f32.partialorder %v526_v4, 0.0  ;;  %v541_v13 = vmul.f32 0.2, %v525_v11  ;;  %v542_v14 = vmul.f32 0.2, %v526_v4 }
 0x30a   :  { %v547_v17 = vsel %vm531_vm13, %v523_v1, %v539_v10  ;;  %v548_v18 = vsel %vm532_vm14, %v524_v3, %v540_v12  ;;  %vm535_vm5 = vcmp.gt.f32.partialorder %v527_v5, 0.0  ;;  %vm536_vm6 = vcmp.gt.f32.partialorder %v528_v48, 0.0 }
 0x30b   :  { %v4575_v19 = vpack.c.bf16 %v548_v18, %v547_v17  ;;  %v549_v21 = vsel %vm533_vm15, %v525_v11, %v541_v13  ;;  %v550_v22 = vsel %vm534_vm4, %v526_v4, %v542_v14  ;;  %v543_v23 = vmul.f32 0.2, %v527_v5 }
 0x30c   :  { %v4577_v24 = vpack.c.bf16 %v550_v22, %v549_v21  ;;  %v544_v25 = vmul.f32 0.2, %v528_v48  ;;  %vm537_vm7 = vcmp.gt.f32.partialorder %v529_v8, 0.0  ;;  %vm538_vm8 = vcmp.gt.f32.partialorder %v530_v9, 0.0 }
 0x30d   :  { %3954 = vmatprep.mubr.msk.bf16.mxu1 %vm220_vm3, %v4575_v19  ;;  %v551_v26 = vsel %vm535_vm5, %v527_v5, %v543_v23  ;;  %v545_v27 = vmul.f32 0.2, %v529_v8  ;;  %v546_v28 = vmul.f32 0.2, %v530_v9  ;;  %v879_v41 = vpack.c.bf16 %v868_v35, %v867_v34 }
 0x30e   :  { %3955 = vmatmul.mubr.msk.bf16.vlgmr.msra.gmra.mrb[8].mxu1 %vm220_vm3, %v4577_v24  ;;  %v552_v29 = vsel %vm536_vm6, %v528_v48, %v544_v25  ;;  %v880_v47 = vpack.c.bf16 %v870_v46, %v869_v42  ;;  %v881_v16 = vpack.c.bf16 %v872_v51, %v871_v50  ;;  %v882_v53 = vpack.c.bf16 %v874_v39, %v873_v52 }
 0x30f   :  { %v4583_v30 = vpack.c.bf16 %v552_v29, %v551_v26  ;;  %v553_v31 = vsel %vm537_vm7, %v529_v8, %v545_v27  ;;  %v554_v32 = vsel %vm538_vm8, %v530_v9, %v546_v28  ;;  %3962 = vmatprep.subr.bf16.mxu0 %v879_v41  ;;  %v736_v54 = vrot.slane %v4618_v15, %v4374_v38 }
 0x310   :  { %v4585_v33 = vpack.c.bf16 %v554_v32, %v553_v31  ;;  %3963 = vmatpush3.bf16.msra.mxu0 %v879_v41 }
 0x311   :  { %3958 = vmatprep.mubr.msk.bf16.mxu1 %vm220_vm3, %v4583_v30  ;;  %3964 = vmatprep.subr.bf16.mxu0 %v880_v47 }
 0x314   :  { %3965 = vmatpush3.bf16.msra.mxu0 %v880_v47 }
 0x315   :  { %3966 = vmatprep.subr.bf16.mxu0 %v881_v16 }
 0x316   :  { %3959 = vmatmul.mubr.msk.bf16.gmra.mrb[12].mxu1 %vm220_vm3, %v4585_v33 }
 0x318   :  { %3967 = vmatpush3.bf16.msra.mxu0 %v881_v16 }
 0x319   :  { %3968 = vmatprep.subr.bf16.mxu0 %v882_v53 }
 0x31c   :  { %3969 = vmatpush3.bf16.msra.mxu0 %v882_v53 }
 0x3e1   :  { %v3956_v20 = vpop.f32.mrb[8].mxu1 }
 0x3e2   :  { %v701_v55 = vpop.f32.mrb[9].mxu1  ;;  %v4622_v40 = vadd.f32 %v3956_v20, %v736_v54 }
 0x3e3   :  { %v4624_v57 = vadd.f32 %v736_v54, %v701_v55  ;;  %v3957_v45 = vpop.f32.mrb[10].mxu1 }
 0x3e4   :  { %v704_v56 = vpop.f32.mrb[11].mxu1  ;;  %v4628_v59 = vadd.f32 %v3957_v45, %v736_v54  ;;  %v769_v62 = vmul.f32 %v4622_v40, %v4622_v40  ;;  %v749_v1 = vsel %vm745_vm9, %v4622_v40, 0.0 }
 0x3e5   :  { %v767_v58 = vmul.f32 %v4624_v57, %v4624_v57  ;;  %v4630_v60 = vadd.f32 %v736_v54, %v704_v56  ;;  %v746_v63 = vsel %vm745_vm9, %v4624_v57, 0.0 }
 0x3e6   :  { %v770_v11 = vmul.f32 %v4628_v59, %v4628_v59  ;;  %v778_v12 = vsel %vm745_vm9, %v769_v62, 0.0  ;;  %v751_v13 = vsel %vm745_vm9, %v4628_v59, 0.0 }
 0x3e7   :  { %v747_v43 = vsel %vm745_vm9, %v4630_v60, 0.0  ;;  %v768_v49 = vmul.f32 %v4630_v60, %v4630_v60  ;;  %v775_v3 = vsel %vm745_vm9, %v767_v58, 0.0 }
 0x3e8   :  { %v748_v48 = vadd.f32 %v747_v43, %v746_v63  ;;  %v780_v25 = vsel %vm745_vm9, %v770_v11, 0.0 }
 0x3e9   :  { %v776_v4 = vsel %vm745_vm9, %v768_v49, 0.0  ;;  %v3960_v5 = vpop.f32.mrb[12].mxu1 }
 0x3ea   :  { %v750_v8 = vadd.f32 %v749_v1, %v748_v48  ;;  %v777_v9 = vadd.f32 %v776_v4, %v775_v3  ;;  %v717_v10 = vpop.f32.mrb[13].mxu1  ;;  %v4651_v21 = vadd.f32 %v3960_v5, %v736_v54 }
 0x3eb   :  { %v4649_v14 = vadd.f32 %v736_v54, %v717_v10  ;;  %v3961_v17 = vpop.f32.mrb[14].mxu1 }
 0x3ec   :  { %v779_v18 = vadd.f32 %v778_v12, %v777_v9  ;;  %v752_v22 = vadd.f32 %v751_v13, %v750_v8  ;;  %v720_v23 = vpop.f32.mrb[15].mxu1  ;;  %v744_v32 = vadd.f32 %v3961_v17, %v736_v54  ;;  %v773_v41 = vmul.f32 %v4651_v21, %v4651_v21 }
 0x3ed   :  { %v753_v26 = vsel %vm745_vm9, %v4649_v14, 0.0  ;;  %v771_v27 = vmul.f32 %v4649_v14, %v4649_v14  ;;  %v742_v28 = vadd.f32 %v736_v54, %v720_v23  ;;  %v757_v50 = vsel %vm745_vm9, %v4651_v21, 0.0 }
 0x3ee   :  { %v754_v29 = vadd.f32 %v753_v26, %v752_v22  ;;  %v781_v31 = vadd.f32 %v780_v25, %v779_v18  ;;  %v774_v51 = vmul.f32 %v744_v32, %v744_v32  ;;  %v759_v39 = vsel %vm745_vm9, %v744_v32, 0.0 }
 0x3ef   :  { %v782_v34 = vsel %vm745_vm9, %v771_v27, 0.0  ;;  %v755_v35 = vsel %vm745_vm9, %v742_v28, 0.0  ;;  %v772_v47 = vmul.f32 %v742_v28, %v742_v28  ;;  %v786_v54 = vsel %vm745_vm9, %v773_v41, 0.0 }
 0x3f0   :  { %v783_v42 = vadd.f32 %v782_v34, %v781_v31  ;;  %v756_v46 = vadd.f32 %v755_v35, %v754_v29  ;;  %v788_v45 = vsel %vm745_vm9, %v774_v51, 0.0 }
 0x3f1   :  { %v784_v16 = vsel %vm745_vm9, %v772_v47, 0.0 }
 0x3f2   :  { %v758_v52 = vadd.f32 %v757_v50, %v756_v46  ;;  %v785_v53 = vadd.f32 %v784_v16, %v783_v42 }
 0x3f4   :  { %v760_v20 = vadd.f32 %v759_v39, %v758_v52  ;;  %v787_v55 = vadd.f32 %v786_v54, %v785_v53 }
 0x3f6   :  { %v761_v56 = vrot.slane %v760_v20, 4  ;;  %v789_v58 = vadd.f32 %v788_v45, %v787_v55 }
 0x3f8   :  { %v762_v62 = vadd.f32 %v761_v56, %v760_v20  ;;  %v790_v63 = vrot.slane %v789_v58, 4 }
 0x3fa   :  { %v763_v43 = vrot.slane %v762_v62, 2  ;;  %v791_v49 = vadd.f32 %v790_v63, %v789_v58 }
 0x3fc   :  { %v764_v48 = vadd.f32 %v763_v43, %v762_v62  ;;  %v792_v1 = vrot.slane %v791_v49, 2 }
 0x3fe   :  { %v765_v3 = vrot.slane %v764_v48, 1  ;;  %v793_v11 = vadd.f32 %v792_v1, %v791_v49 }
 0x400   :  { %v766_v4 = vadd.f32 %v765_v3, %v764_v48  ;;  %v794_v5 = vrot.slane %v793_v11, 1 }
 0x402   :  { %v796_v8 = vmul.f32 0.015625, %v766_v4  ;;  %v795_v9 = vadd.f32 %v794_v5, %v793_v11 }
 0x404   :  { %v798_v10 = vmul.f32 %v796_v8, %v796_v8  ;;  %v806_v12 = vsub.f32 %v742_v28, %v796_v8  ;;  %v801_v13 = vsub.f32 %v4624_v57, %v796_v8  ;;  %v802_v17 = vsub.f32 %v4630_v60, %v796_v8 }
 0x405   :  { %v797_v18 = vmul.f32 0.015625, %v795_v9  ;;  %v803_v22 = vsub.f32 %v4622_v40, %v796_v8  ;;  %v804_v23 = vsub.f32 %v4628_v59, %v796_v8  ;;  %v805_v25 = vsub.f32 %v4649_v14, %v796_v8 }
 0x406   :  { %v807_v26 = vsub.f32 %v4651_v21, %v796_v8  ;;  %v808_v27 = vsub.f32 %v744_v32, %v796_v8  ;;  %v822_v28 = vrot.slane %v4618_v15, %v4436_v2  ;;  %v834_v60 = vrot.slane %v4618_v15, %v4439_v44 }
 0x407   :  { %v799_v29 = vsub.f32 %v797_v18, %v798_v10 }
 0x409   :  { %v800_v31 = vmax.f32 %v799_v29, 0.0  ;;  %v1099_v29 = vld [vmem:[%s5861_s0 + $0xc8] sm:$0xff] }
 0x40b   :  { %v809_v34 = vadd.f32 1e-05, %v800_v31 }
 0x40d   :  { %4237 = vrsqrt.f32 %v809_v34  ;;  %v1100_v34 = vld [vmem:[%s5861_s0 + $0xd0] sm:$0xff] }
 0x417   :  { %v4238_v57 = vpop.eup %4237 }
 0x418   :  { %v816_v35 = vmul.f32 %v4238_v57, %v806_v12  ;;  %v811_v40 = vmul.f32 %v4238_v57, %v801_v13  ;;  %v812_v41 = vmul.f32 %v4238_v57, %v802_v17  ;;  %v813_v59 = vmul.f32 %v4238_v57, %v803_v22 }
 0x419   :  { %v814_v42 = vmul.f32 %v4238_v57, %v804_v23  ;;  %v815_v14 = vmul.f32 %v4238_v57, %v805_v25  ;;  %v817_v46 = vmul.f32 %v4238_v57, %v807_v26  ;;  %v818_v21 = vmul.f32 %v4238_v57, %v808_v27  ;;  %v1098_v27 = vld [vmem:[%s5861_s0 + $0xc0] sm:$0xff] }
 0x41a   :  { %v828_v32 = vmul.f32 %v822_v28, %v816_v35  ;;  %v823_v47 = vmul.f32 %v822_v28, %v811_v40  ;;  %v824_v50 = vmul.f32 %v822_v28, %v812_v41  ;;  %v825_v51 = vmul.f32 %v822_v28, %v813_v59  ;;  %v1103_v35 = vld [vmem:[%s5861_s0 + $0xe8] sm:$0xff]  ;;  %v1104_v40 = vld [vmem:[%s5861_s0 + $0xf0] sm:$0xff]  ;;  %v1105_v59 = vld [vmem:[%s5861_s0 + $0xf8] sm:$0xff] }
 0x41b   :  { %v826_v52 = vmul.f32 %v822_v28, %v814_v42  ;;  %v827_v16 = vmul.f32 %v822_v28, %v815_v14  ;;  %v829_v39 = vmul.f32 %v822_v28, %v817_v46  ;;  %v830_v53 = vmul.f32 %v822_v28, %v818_v21  ;;  %v1101_v28 = vld [vmem:[%s5861_s0 + $0xd8] sm:$0xff] }
 0x41c   :  { %v840_v54 = vadd.f32 %v834_v60, %v828_v32  ;;  %v835_v20 = vadd.f32 %v834_v60, %v823_v47  ;;  %v836_v55 = vadd.f32 %v834_v60, %v824_v50  ;;  %v837_v15 = vadd.f32 %v834_v60, %v825_v51  ;;  %v4709_v14 = vld [vmem:[%s5861_s0 + $0xb8] sm:$0xf] }
 0x41d   :  { %v838_v45 = vadd.f32 %v834_v60, %v826_v52  ;;  %v839_v56 = vadd.f32 %v834_v60, %v827_v16  ;;  %v841_v58 = vadd.f32 %v834_v60, %v829_v39  ;;  %v842_v62 = vadd.f32 %v834_v60, %v830_v53  ;;  %v1102_v60 = vld [vmem:[%s5861_s0 + $0xe0] sm:$0xff] }
 0x41e   :  { %vm843_vm10 = vcmp.gt.f32.partialorder %v835_v20, 0.0  ;;  %vm844_vm11 = vcmp.gt.f32.partialorder %v836_v55, 0.0  ;;  %v851_v63 = vmul.f32 0.2, %v835_v20  ;;  %v852_v43 = vmul.f32 0.2, %v836_v55 }
 0x41f   :  { %vm845_vm13 = vcmp.gt.f32.partialorder %v837_v15, 0.0  ;;  %vm846_vm14 = vcmp.gt.f32.partialorder %v838_v45, 0.0  ;;  %v853_v49 = vmul.f32 0.2, %v837_v15  ;;  %v854_v48 = vmul.f32 0.2, %v838_v45 }
 0x420   :  { %v859_v1 = vsel %vm843_vm10, %v835_v20, %v851_v63  ;;  %v860_v3 = vsel %vm844_vm11, %v836_v55, %v852_v43  ;;  %vm847_vm15 = vcmp.gt.f32.partialorder %v839_v56, 0.0  ;;  %vm848_vm4 = vcmp.gt.f32.partialorder %v840_v54, 0.0 }
 0x421   :  { %v875_v11 = vpack.c.bf16 %v860_v3, %v859_v1  ;;  %v861_v4 = vsel %vm845_vm13, %v837_v15, %v853_v49  ;;  %v862_v5 = vsel %vm846_vm14, %v838_v45, %v854_v48  ;;  %v855_v8 = vmul.f32 0.2, %v839_v56 }
 0x422   :  { %v876_v9 = vpack.c.bf16 %v862_v5, %v861_v4  ;;  %v856_v10 = vmul.f32 0.2, %v840_v54  ;;  %vm849_vm5 = vcmp.gt.f32.partialorder %v841_v58, 0.0  ;;  %vm850_vm6 = vcmp.gt.f32.partialorder %v842_v62, 0.0 }
 0x423   :  { %3970 = vmatprep.mubr.msk.bf16.mxu0 %vm745_vm9, %v875_v11  ;;  %v863_v12 = vsel %vm847_vm15, %v839_v56, %v855_v8  ;;  %v857_v13 = vmul.f32 0.2, %v841_v58  ;;  %v858_v17 = vmul.f32 0.2, %v842_v62  ;;  %v1110_v31 = vpack.c.bf16 %v1099_v29, %v1098_v27 }
 0x424   :  { %3971 = vmatmul.mubr.msk.bf16.vlgmr.msra.gmra.mrb[16].mxu0 %vm745_vm9, %v876_v9  ;;  %v864_v18 = vsel %vm848_vm4, %v840_v54, %v856_v10  ;;  %v1111_v57 = vpack.c.bf16 %v1101_v28, %v1100_v34  ;;  %v1112_v41 = vpack.c.bf16 %v1103_v35, %v1102_v60  ;;  %v1113_v42 = vpack.c.bf16 %v1105_v59, %v1104_v40 }
 0x425   :  { %v877_v22 = vpack.c.bf16 %v864_v18, %v863_v12  ;;  %v865_v23 = vsel %vm849_vm5, %v841_v58, %v857_v13  ;;  %v866_v25 = vsel %vm850_vm6, %v842_v62, %v858_v17  ;;  %3978 = vmatprep.subr.bf16.mxu0 %v1110_v31  ;;  %v887_v46 = vrot.slane %v4709_v14, %v4374_v38 }
 0x426   :  { %v878_v26 = vpack.c.bf16 %v866_v25, %v865_v23  ;;  %3979 = vmatpush3.bf16.msra.mxu0 %v1110_v31 }
 0x427   :  { %3974 = vmatprep.mubr.msk.bf16.mxu0 %vm745_vm9, %v877_v22  ;;  %3980 = vmatprep.subr.bf16.mxu0 %v1111_v57 }
 0x42a   :  { %3981 = vmatpush3.bf16.msra.mxu0 %v1111_v57 }
 0x42b   :  { %3982 = vmatprep.subr.bf16.mxu0 %v1112_v41 }
 0x42c   :  { %3975 = vmatmul.mubr.msk.bf16.gmra.mrb[20].mxu0 %vm745_vm9, %v878_v26 }
 0x42e   :  { %3983 = vmatpush3.bf16.msra.mxu0 %v1112_v41 }
 0x42f   :  { %3984 = vmatprep.subr.bf16.mxu0 %v1113_v42 }
 0x432   :  { %3985 = vmatpush3.bf16.msra.mxu0 %v1113_v42 }
 0x4f7   :  { %v3972_v21 = vpop.f32.mrb[16].mxu0 }
 0x4f8   :  { %v934_v32 = vpop.f32.mrb[17].mxu0  ;;  %v4713_v47 = vadd.f32 %v3972_v21, %v887_v46 }
 0x4f9   :  { %v4715_v50 = vadd.f32 %v934_v32, %v887_v46  ;;  %v3973_v51 = vpop.f32.mrb[18].mxu0 }
 0x4fa   :  { %v937_v52 = vpop.f32.mrb[19].mxu0  ;;  %v4719_v39 = vadd.f32 %v3973_v51, %v887_v46  ;;  %v988_v54 = vmul.f32 %v4713_v47, %v4713_v47  ;;  %v968_v56 = vsel %vm745_vm9, %v4713_v47, 0.0 }
 0x4fb   :  { %v986_v16 = vmul.f32 %v4715_v50, %v4715_v50  ;;  %v4721_v53 = vadd.f32 %v937_v52, %v887_v46  ;;  %v965_v20 = vsel %vm745_vm9, %v4715_v50, 0.0 }
 0x4fc   :  { %v989_v62 = vmul.f32 %v4719_v39, %v4719_v39  ;;  %v997_v3 = vsel %vm745_vm9, %v988_v54, 0.0  ;;  %v970_v11 = vsel %vm745_vm9, %v4719_v39, 0.0 }
 0x4fd   :  { %v966_v55 = vsel %vm745_vm9, %v4721_v53, 0.0  ;;  %v987_v15 = vmul.f32 %v4721_v53, %v4721_v53  ;;  %v994_v58 = vsel %vm745_vm9, %v986_v16, 0.0 }
 0x4fe   :  { %v967_v45 = vadd.f32 %v966_v55, %v965_v20  ;;  %v999_v13 = vsel %vm745_vm9, %v989_v62, 0.0 }
 0x4ff   :  { %v995_v63 = vsel %vm745_vm9, %v987_v15, 0.0  ;;  %v3976_v43 = vpop.f32.mrb[20].mxu0 }
 0x500   :  { %v969_v49 = vadd.f32 %v968_v56, %v967_v45  ;;  %v996_v48 = vadd.f32 %v995_v63, %v994_v58  ;;  %v950_v1 = vpop.f32.mrb[21].mxu0  ;;  %v4742_v9 = vadd.f32 %v3976_v43, %v887_v46 }
 0x501   :  { %v4740_v4 = vadd.f32 %v950_v1, %v887_v46  ;;  %v3977_v5 = vpop.f32.mrb[22].mxu0 }
 0x502   :  { %v998_v8 = vadd.f32 %v997_v3, %v996_v48  ;;  %v971_v10 = vadd.f32 %v970_v11, %v969_v49  ;;  %v953_v12 = vpop.f32.mrb[23].mxu0  ;;  %v962_v26 = vadd.f32 %v3977_v5, %v887_v46  ;;  %v992_v31 = vmul.f32 %v4742_v9, %v4742_v9 }
 0x503   :  { %v972_v17 = vsel %vm745_vm9, %v4740_v4, 0.0  ;;  %v990_v18 = vmul.f32 %v4740_v4, %v4740_v4  ;;  %v954_v22 = vadd.f32 %v953_v12, %v887_v46  ;;  %v976_v60 = vsel %vm745_vm9, %v4742_v9, 0.0 }
 0x504   :  { %v973_v23 = vadd.f32 %v972_v17, %v971_v10  ;;  %v1000_v25 = vadd.f32 %v999_v13, %v998_v8  ;;  %v993_v35 = vmul.f32 %v962_v26, %v962_v26  ;;  %v978_v59 = vsel %vm745_vm9, %v962_v26, 0.0 }
 0x505   :  { %v1001_v27 = vsel %vm745_vm9, %v990_v18, 0.0  ;;  %v974_v29 = vsel %vm745_vm9, %v954_v22, 0.0  ;;  %v991_v57 = vmul.f32 %v954_v22, %v954_v22  ;;  %v1005_v46 = vsel %vm745_vm9, %v992_v31, 0.0 }
 0x506   :  { %v1002_v34 = vadd.f32 %v1001_v27, %v1000_v25  ;;  %v975_v28 = vadd.f32 %v974_v29, %v973_v23  ;;  %v1007_v51 = vsel %vm745_vm9, %v993_v35, 0.0 }
 0x507   :  { %v1003_v41 = vsel %vm745_vm9, %v991_v57, 0.0 }
 0x508   :  { %v977_v40 = vadd.f32 %v976_v60, %v975_v28  ;;  %v1004_v42 = vadd.f32 %v1003_v41, %v1002_v34 }
 0x50a   :  { %v979_v21 = vadd.f32 %v978_v59, %v977_v40  ;;  %v1006_v32 = vadd.f32 %v1005_v46, %v1004_v42 }
 0x50c   :  { %v980_v52 = vrot.slane %v979_v21, 4  ;;  %v1008_v16 = vadd.f32 %v1007_v51, %v1006_v32 }
 0x50e   :  { %v981_v54 = vadd.f32 %v980_v52, %v979_v21  ;;  %v1009_v20 = vrot.slane %v1008_v16, 4 }
 0x510   :  { %v982_v55 = vrot.slane %v981_v54, 2  ;;  %v1010_v15 = vadd.f32 %v1009_v20, %v1008_v16 }
 0x512   :  { %v983_v45 = vadd.f32 %v982_v55, %v981_v54  ;;  %v1011_v56 = vrot.slane %v1010_v15, 2 }
 0x514   :  { %v984_v58 = vrot.slane %v983_v45, 1  ;;  %v1012_v62 = vadd.f32 %v1011_v56, %v1010_v15 }
 0x516   :  { %v985_v63 = vadd.f32 %v984_v58, %v983_v45  ;;  %v1013_v43 = vrot.slane %v1012_v62, 1 }
 0x518   :  { %v1015_v49 = vmul.f32 0.015625, %v985_v63  ;;  %v1014_v48 = vadd.f32 %v1013_v43, %v1012_v62 }
 0x51a   :  { %v1017_v1 = vmul.f32 %v1015_v49, %v1015_v49  ;;  %v1025_v3 = vsub.f32 %v954_v22, %v1015_v49  ;;  %v1020_v11 = vsub.f32 %v4715_v50, %v1015_v49  ;;  %v1021_v5 = vsub.f32 %v4721_v53, %v1015_v49 }
 0x51b   :  { %v1016_v8 = vmul.f32 0.015625, %v1014_v48  ;;  %v1022_v10 = vsub.f32 %v4713_v47, %v1015_v49  ;;  %v1023_v12 = vsub.f32 %v4719_v39, %v1015_v49  ;;  %v1024_v13 = vsub.f32 %v4740_v4, %v1015_v49 }
 0x51c   :  { %v1026_v17 = vsub.f32 %v4742_v9, %v1015_v49  ;;  %v1027_v18 = vsub.f32 %v962_v26, %v1015_v49  ;;  %v1041_v22 = vrot.slane %v4709_v14, %v4436_v2  ;;  %v1053_v53 = vrot.slane %v4709_v14, %v4439_v44 }
 0x51d   :  { %v1018_v23 = vsub.f32 %v1016_v8, %v1017_v1 }
 0x51f   :  { %v1019_v25 = vmax.f32 %v1018_v23, 0.0  ;;  %v1087_v23 = vld [vmem:[%s5862_s3 + $0x8] sm:$0xff] }
 0x521   :  { %v1028_v27 = vadd.f32 1e-05, %v1019_v25 }
 0x523   :  { %4239 = vrsqrt.f32 %v1028_v27 }
 0x52d   :  { %v4240_v50 = vpop.eup %4239 }
 0x52e   :  { %v1035_v29 = vmul.f32 %v4240_v50, %v1025_v3  ;;  %v1030_v47 = vmul.f32 %v4240_v50, %v1020_v11  ;;  %v1031_v31 = vmul.f32 %v4240_v50, %v1021_v5  ;;  %v1032_v39 = vmul.f32 %v4240_v50, %v1022_v10 }
 0x52f   :  { %v1033_v34 = vmul.f32 %v4240_v50, %v1023_v12  ;;  %v1034_v4 = vmul.f32 %v4240_v50, %v1024_v13  ;;  %v1036_v28 = vmul.f32 %v4240_v50, %v1026_v17  ;;  %v1037_v9 = vmul.f32 %v4240_v50, %v1027_v18  ;;  %v1086_v18 = vld [vmem:[%s5862_s3] sm:$0xff] }
 0x530   :  { %v1047_v26 = vmul.f32 %v1041_v22, %v1035_v29  ;;  %v1042_v57 = vmul.f32 %v1041_v22, %v1030_v47  ;;  %v1043_v60 = vmul.f32 %v1041_v22, %v1031_v31  ;;  %v1044_v35 = vmul.f32 %v1041_v22, %v1032_v39 }
 0x531   :  { %v1045_v40 = vmul.f32 %v1041_v22, %v1033_v34  ;;  %v1046_v41 = vmul.f32 %v1041_v22, %v1034_v4  ;;  %v1048_v59 = vmul.f32 %v1041_v22, %v1036_v28  ;;  %v1049_v42 = vmul.f32 %v1041_v22, %v1037_v9 }
 0x532   :  { %v1059_v46 = vadd.f32 %v1053_v53, %v1047_v26  ;;  %v1054_v21 = vadd.f32 %v1053_v53, %v1042_v57  ;;  %v1055_v32 = vadd.f32 %v1053_v53, %v1043_v60  ;;  %v1056_v14 = vadd.f32 %v1053_v53, %v1044_v35  ;;  %v1088_v26 = vld [vmem:[%s5862_s3 + $0x10] sm:$0xff]  ;;  %v1089_v57 = vld [vmem:[%s5862_s3 + $0x18] sm:$0xff]  ;;  %v1090_v60 = vld [vmem:[%s5862_s3 + $0x20] sm:$0xff] }
 0x533   :  { %v1057_v51 = vadd.f32 %v1053_v53, %v1045_v40  ;;  %v1058_v52 = vadd.f32 %v1053_v53, %v1046_v41  ;;  %v1060_v16 = vadd.f32 %v1053_v53, %v1048_v59  ;;  %v1061_v54 = vadd.f32 %v1053_v53, %v1049_v42  ;;  %v1091_v35 = vld [vmem:[%s5862_s3 + $0x28] sm:$0xff]  ;;  %v1092_v59 = vld [vmem:[%s5862_s3 + $0x30] sm:$0xff]  ;;  %v1093_v42 = vld [vmem:[%s5862_s3 + $0x38] sm:$0xff] }
 0x534   :  { %vm1062_vm7 = vcmp.gt.f32.partialorder %v1054_v21, 0.0  ;;  %vm1063_vm8 = vcmp.gt.f32.partialorder %v1055_v32, 0.0  ;;  %v1070_v20 = vmul.f32 0.2, %v1054_v21  ;;  %v1071_v55 = vmul.f32 0.2, %v1055_v32 }
 0x535   :  { %vm1064_vm10 = vcmp.gt.f32.partialorder %v1056_v14, 0.0  ;;  %vm1065_vm11 = vcmp.gt.f32.partialorder %v1057_v51, 0.0  ;;  %v1072_v15 = vmul.f32 0.2, %v1056_v14  ;;  %v1073_v45 = vmul.f32 0.2, %v1057_v51 }
 0x536   :  { %v1078_v56 = vsel %vm1062_vm7, %v1054_v21, %v1070_v20  ;;  %v1079_v58 = vsel %vm1063_vm8, %v1055_v32, %v1071_v55  ;;  %vm1066_vm13 = vcmp.gt.f32.partialorder %v1058_v52, 0.0  ;;  %vm1067_vm14 = vcmp.gt.f32.partialorder %v1059_v46, 0.0  ;;  %v1395_v21 = vld [vmem:[%s5861_s0 + $0x108] sm:$0xff]  ;;  %v1396_v32 = vld [vmem:[%s5861_s0 + $0x110] sm:$0xff] }
 0x537   :  { %v4769_v62 = vpack.c.bf16 %v1079_v58, %v1078_v56  ;;  %v1080_v63 = vsel %vm1064_vm10, %v1056_v14, %v1072_v15  ;;  %v1081_v43 = vsel %vm1065_vm11, %v1057_v51, %v1073_v45  ;;  %v1074_v49 = vmul.f32 0.2, %v1058_v52  ;;  %v1397_v14 = vld [vmem:[%s5861_s0 + $0x118] sm:$0xff] }
 0x538   :  { %v4771_v48 = vpack.c.bf16 %v1081_v43, %v1080_v63  ;;  %v1075_v1 = vmul.f32 0.2, %v1059_v46  ;;  %vm1068_vm15 = vcmp.gt.f32.partialorder %v1060_v16, 0.0  ;;  %vm1069_vm4 = vcmp.gt.f32.partialorder %v1061_v54, 0.0 }
 0x539   :  { %3986 = vmatprep.mubr.msk.bf16.mxu0 %vm745_vm9, %v4769_v62  ;;  %v1082_v3 = vsel %vm1066_vm13, %v1058_v52, %v1074_v49  ;;  %v1076_v11 = vmul.f32 0.2, %v1060_v16  ;;  %v1077_v5 = vmul.f32 0.2, %v1061_v54  ;;  %v4791_v25 = vpack.c.bf16 %v1087_v23, %v1086_v18  ;;  %v1398_v52 = vld [vmem:[%s5861_s0 + $0x120] sm:$0xff] }
 0x53a   :  { %3987 = vmatmul.mubr.msk.bf16.vlgmr.msra.gmra.mrb[24].mxu0 %vm745_vm9, %v4771_v48  ;;  %v1083_v8 = vsel %vm1067_vm14, %v1059_v46, %v1075_v1  ;;  %v4807_v40 = vpack.c.bf16 %v1089_v57, %v1088_v26  ;;  %v4809_v41 = vpack.c.bf16 %v1091_v35, %v1090_v60  ;;  %v4821_v46 = vpack.c.bf16 %v1093_v42, %v1092_v59 }
 0x53b   :  { %v4777_v10 = vpack.c.bf16 %v1083_v8, %v1082_v3  ;;  %v1084_v12 = vsel %vm1068_vm15, %v1060_v16, %v1076_v11  ;;  %v1085_v13 = vsel %vm1069_vm4, %v1061_v54, %v1077_v5  ;;  %4002 = vmatprep.mubr.msk.bf16.mxu1 %vm745_vm9, %v4791_v25  ;;  %v1403_v51 = vpack.c.bf16 %v1396_v32, %v1395_v21  ;;  %v4842_v54 = vld [vmem:[%s5861_s0 + $0x100] sm:$0xf] }
 0x53c   :  { %v4779_v17 = vpack.c.bf16 %v1085_v13, %v1084_v12  ;;  %v1404_v16 = vpack.c.bf16 %v1398_v52, %v1397_v14  ;;  %v1199_v20 = vrot.slane %v4842_v54, %v4374_v38 }
 0x53d   :  { %3990 = vmatprep.mubr.msk.bf16.mxu0 %vm745_vm9, %v4777_v10  ;;  %4010 = vmatprep.subr.bf16.mxu0 %v1403_v51 }
 0x53e   :  { %4011 = vmatpush3.bf16.msra.mxu0 %v1403_v51 }
 0x53f   :  { %4012 = vmatprep.subr.bf16.mxu0 %v1404_v16 }
 0x542   :  { %3991 = vmatmul.mubr.msk.bf16.gmra.mrb[28].mxu0 %vm745_vm9, %v4779_v17 }
 0x543   :  { %4013 = vmatpush3.bf16.msra.mxu0 %v1404_v16 }
 0x60d   :  { %v3988_v27 = vpop.f32.mrb[24].mxu0 }
 0x60e   :  { %v1160_v22 = vpop.f32.mrb[25].mxu0 }
 0x60f   :  { %v3989_v50 = vpop.f32.mrb[26].mxu0 }
 0x610   :  { %v1192_v53 = vpack.c.bf16 %v3989_v50, %v3988_v27  ;;  %v1163_v29 = vpop.f32.mrb[27].mxu0 }
 0x611   :  { %v1191_v47 = vpack.c.bf16 %v1163_v29, %v1160_v22 }
 0x613   :  { %3994 = vmatprep.subr.bf16.mxu1 %v1191_v47 }
 0x614   :  { %3995 = vmatpush3.bf16.msra.mxu1 %v1191_v47 }
 0x615   :  { %v3992_v31 = vpop.f32.mrb[28].mxu0  ;;  %3996 = vmatprep.subr.bf16.mxu1 %v1192_v53 }
 0x616   :  { %v1176_v39 = vpop.f32.mrb[29].mxu0 }
 0x617   :  { %v3993_v34 = vpop.f32.mrb[30].mxu0 }
 0x618   :  { %v1194_v4 = vpack.c.bf16 %v3993_v34, %v3992_v31  ;;  %v1179_v28 = vpop.f32.mrb[31].mxu0  ;;  %3997 = vmatpush3.bf16.msra.mxu1 %v1192_v53 }
 0x619   :  { %v1193_v9 = vpack.c.bf16 %v1179_v28, %v1176_v39 }
 0x61b   :  { %3998 = vmatprep.subr.bf16.mxu1 %v1193_v9 }
 0x61c   :  { %3999 = vmatpush3.bf16.msra.mxu1 %v1193_v9 }
 0x61d   :  { %4000 = vmatprep.subr.bf16.mxu1 %v1194_v4 }
 0x620   :  { %4001 = vmatpush3.bf16.msra.mxu1 %v1194_v4 }
 0x623   :  { %4003 = vmatmul.mubr.msk.bf16.vlgmr.msra.gmra.mrb[16].mxu1 %vm745_vm9, %v4807_v40 }
 0x624   :  { %4006 = vmatprep.mubr.msk.bf16.mxu1 %vm745_vm9, %v4809_v41 }
 0x62b   :  { %4007 = vmatmul.mubr.msk.bf16.gmra.mrb[20].mxu1 %vm745_vm9, %v4821_v46 }
 0x62c   :  { %4030 = vmatprep.mubr.msk.bf16.mxu1 %vm745_vm9, %v4791_v25 }
 0x6f6   :  { %v4004_v55 = vpop.f32.mrb[16].mxu1 }
 0x6f7   :  { %v1246_v15 = vpop.f32.mrb[17].mxu1  ;;  %v4846_v45 = vadd.f32 %v4004_v55, %v1199_v20 }
 0x6f8   :  { %v4848_v56 = vadd.f32 %v1246_v15, %v1199_v20  ;;  %v4005_v58 = vpop.f32.mrb[18].mxu1 }
 0x6f9   :  { %v1249_v63 = vpop.f32.mrb[19].mxu1  ;;  %v4852_v49 = vadd.f32 %v4005_v58, %v1199_v20  ;;  %v1300_v3 = vmul.f32 %v4846_v45, %v4846_v45  ;;  %v1280_v13 = vsel %vm220_vm3, %v4846_v45, 0.0 }
 0x6fa   :  { %v1298_v43 = vmul.f32 %v4848_v56, %v4848_v56  ;;  %v4854_v1 = vadd.f32 %v1249_v63, %v1199_v20  ;;  %v1277_v11 = vsel %vm220_vm3, %v4848_v56, 0.0 }
 0x6fb   :  { %v1301_v23 = vmul.f32 %v4852_v49, %v4852_v49  ;;  %v1309_v47 = vsel %vm220_vm3, %v1300_v3, 0.0  ;;  %v1282_v31 = vsel %vm220_vm3, %v4852_v49, 0.0 }
 0x6fc   :  { %v1278_v5 = vsel %vm220_vm3, %v4854_v1, 0.0  ;;  %v1299_v8 = vmul.f32 %v4854_v1, %v4854_v1  ;;  %v1306_v18 = vsel %vm220_vm3, %v1298_v43, 0.0 }
 0x6fd   :  { %v1279_v12 = vadd.f32 %v1278_v5, %v1277_v11  ;;  %v1311_v57 = vsel %vm220_vm3, %v1301_v23, 0.0 }
 0x6fe   :  { %v1307_v27 = vsel %vm220_vm3, %v1299_v8, 0.0  ;;  %v4008_v22 = vpop.f32.mrb[20].mxu1 }
 0x6ff   :  { %v1281_v50 = vadd.f32 %v1280_v13, %v1279_v12  ;;  %v1308_v53 = vadd.f32 %v1307_v27, %v1306_v18  ;;  %v1262_v29 = vpop.f32.mrb[21].mxu1  ;;  %v4875_v28 = vadd.f32 %v4008_v22, %v1199_v20 }
 0x700   :  { %v4873_v39 = vadd.f32 %v1262_v29, %v1199_v20  ;;  %v4009_v34 = vpop.f32.mrb[22].mxu1 }
 0x701   :  { %v1310_v4 = vadd.f32 %v1309_v47, %v1308_v53  ;;  %v1283_v9 = vadd.f32 %v1282_v31, %v1281_v50  ;;  %v1265_v26 = vpop.f32.mrb[23].mxu1  ;;  %v4882_v32 = vadd.f32 %v4009_v34, %v1199_v20  ;;  %v1304_v52 = vmul.f32 %v4875_v28, %v4875_v28 }
 0x702   :  { %v1284_v60 = vsel %vm220_vm3, %v4873_v39, 0.0  ;;  %v1302_v35 = vmul.f32 %v4873_v39, %v4873_v39  ;;  %v1266_v59 = vadd.f32 %v1265_v26, %v1199_v20  ;;  %v1288_v58 = vsel %vm220_vm3, %v4875_v28, 0.0 }
 0x703   :  { %v1285_v42 = vadd.f32 %v1284_v60, %v1283_v9  ;;  %v1312_v21 = vadd.f32 %v1311_v57, %v1310_v4  ;;  %v1305_v63 = vmul.f32 %v4882_v32, %v4882_v32  ;;  %v1290_v3 = vsel %vm220_vm3, %v4882_v32, 0.0 }
 0x704   :  { %v1313_v14 = vsel %vm220_vm3, %v1302_v35, 0.0  ;;  %v1286_v51 = vsel %vm220_vm3, %v1266_v59, 0.0  ;;  %v1303_v15 = vmul.f32 %v1266_v59, %v1266_v59  ;;  %v1317_v5 = vsel %vm220_vm3, %v1304_v52, 0.0 }
 0x705   :  { %v1314_v16 = vadd.f32 %v1313_v14, %v1312_v21  ;;  %v1287_v55 = vadd.f32 %v1286_v51, %v1285_v42  ;;  %v1319_v13 = vsel %vm220_vm3, %v1305_v63, 0.0  ;;  %v1329_v34 = vmul.f32 2.0, %v4842_v54 }
 0x706   :  { %v1315_v20 = vsel %vm220_vm3, %v1303_v15, 0.0  ;;  %v1330_v4 = vmul.f32 %v4842_v54, %v4842_v54 }
 0x707   :  { %v1289_v43 = vadd.f32 %v1288_v58, %v1287_v55  ;;  %v1316_v11 = vadd.f32 %v1315_v20, %v1314_v16 }
 0x708   :  { %v1331_v35 = vsub.f32 %v1329_v34, %v1330_v4 }
 0x709   :  { %v1291_v8 = vadd.f32 %v1290_v3, %v1289_v43  ;;  %v1318_v12 = vadd.f32 %v1317_v5, %v1316_v11 }
 0x70b   :  { %v1292_v18 = vrot.slane %v1291_v8, 4  ;;  %v1320_v23 = vadd.f32 %v1319_v13, %v1318_v12  ;;  %v4910_v13 = vsub.s32 3, %v4371_v37 }
 0x70d   :  { %v1293_v27 = vadd.f32 %v1292_v18, %v1291_v8  ;;  %v1321_v22 = vrot.slane %v1320_v23, 4 }
 0x70f   :  { %v1294_v50 = vrot.slane %v1293_v27, 2  ;;  %v1322_v53 = vadd.f32 %v1321_v22, %v1320_v23 }
 0x711   :  { %v1295_v29 = vadd.f32 %v1294_v50, %v1293_v27  ;;  %v1323_v47 = vrot.slane %v1322_v53, 2 }
 0x713   :  { %v1296_v31 = vrot.slane %v1295_v29, 1  ;;  %v1324_v9 = vadd.f32 %v1323_v47, %v1322_v53 }
 0x715   :  { %v1297_v26 = vadd.f32 %v1296_v31, %v1295_v29  ;;  %v1325_v57 = vrot.slane %v1324_v9, 1 }
 0x717   :  { %v1327_v60 = vmul.f32 0.015625, %v1297_v26  ;;  %v1326_v42 = vadd.f32 %v1325_v57, %v1324_v9 }
 0x719   :  { %v1332_v21 = vmul.f32 %v1327_v60, %v1327_v60  ;;  %v1336_v14 = vmul.f32 %v1327_v60, %v4842_v54  ;;  %v1328_v51 = vmul.f32 0.015625, %v1326_v42 }
 0x71b   :  { %v1333_v52 = vmul.f32 %v1332_v21, %v1331_v35  ;;  %v1340_v16 = vrot.slane %v1336_v14, %v4436_v2 }
 0x71d   :  { %v1334_v55 = vsub.f32 %v1328_v51, %v1333_v52  ;;  %v1346_v15 = vsub.f32 %v1266_v59, %v1340_v16  ;;  %v1341_v58 = vsub.f32 %v4848_v56, %v1340_v16  ;;  %v1342_v63 = vsub.f32 %v4854_v1, %v1340_v16 }
 0x71e   :  { %v1343_v43 = vsub.f32 %v4846_v45, %v1340_v16  ;;  %v1344_v20 = vsub.f32 %v4852_v49, %v1340_v16  ;;  %v1345_v3 = vsub.f32 %v4873_v39, %v1340_v16  ;;  %v1347_v11 = vsub.f32 %v4875_v28, %v1340_v16 }
 0x71f   :  { %v1335_v5 = vmax.f32 %v1334_v55, 0.0  ;;  %v1348_v8 = vsub.f32 %v4882_v32, %v1340_v16  ;;  %v1366_v45 = vrot.slane %v4842_v54, %v4439_v44  ;;  %v1378_v49 = vrot.slane %v4842_v54, %v4910_v13 }
 0x721   :  { %v1349_v12 = vadd.f32 1e-05, %v1335_v5 }
 0x723   :  { %4241 = vrsqrt.f32 %v1349_v12 }
 0x72d   :  { %v4242_v59 = vpop.eup %4241 }
 0x72e   :  { %v1354_v56 = vrot.slane %v4242_v59, %v4436_v2 }
 0x730   :  { %v1360_v1 = vmul.f32 %v1354_v56, %v1346_v15  ;;  %v1355_v39 = vmul.f32 %v1354_v56, %v1341_v58  ;;  %v1356_v28 = vmul.f32 %v1354_v56, %v1342_v63  ;;  %v1357_v18 = vmul.f32 %v1354_v56, %v1343_v43 }
 0x731   :  { %v1358_v23 = vmul.f32 %v1354_v56, %v1344_v20  ;;  %v1359_v32 = vmul.f32 %v1354_v56, %v1345_v3  ;;  %v1361_v27 = vmul.f32 %v1354_v56, %v1347_v11  ;;  %v1362_v22 = vmul.f32 %v1354_v56, %v1348_v8 }
 0x732   :  { %v1372_v50 = vmul.f32 %v1366_v45, %v1360_v1  ;;  %v1367_v37 = vmul.f32 %v1366_v45, %v1355_v39  ;;  %v1368_v53 = vmul.f32 %v1366_v45, %v1356_v28  ;;  %v1369_v29 = vmul.f32 %v1366_v45, %v1357_v18 }
 0x733   :  { %v1370_v47 = vmul.f32 %v1366_v45, %v1358_v23  ;;  %v1371_v31 = vmul.f32 %v1366_v45, %v1359_v32  ;;  %v1373_v34 = vmul.f32 %v1366_v45, %v1361_v27  ;;  %v1374_v4 = vmul.f32 %v1366_v45, %v1362_v22  ;;  %v1674_v32 = vld [vmem:[%s5861_s0 + $0x130] sm:$0xff]  ;;  %v1675_v27 = vld [vmem:[%s5861_s0 + $0x138] sm:$0xff] }
 0x734   :  { %v1379_v9 = vadd.f32 %v1378_v49, %v1367_v37  ;;  %v1380_v26 = vadd.f32 %v1378_v49, %v1368_v53  ;;  %v1381_v57 = vadd.f32 %v1378_v49, %v1369_v29  ;;  %v1384_v54 = vadd.f32 %v1378_v49, %v1372_v50  ;;  %v4938_v50 = vld [vmem:[%s5861_s0 + $0x128] sm:$0xf] }
 0x735   :  { %v1382_v60 = vadd.f32 %v1378_v49, %v1370_v47  ;;  %v1383_v35 = vadd.f32 %v1378_v49, %v1371_v31  ;;  %v1385_v42 = vadd.f32 %v1378_v49, %v1373_v34  ;;  %v1386_v21 = vadd.f32 %v1378_v49, %v1374_v4 }
 0x736   :  { %v1387_v14 = vmax.f32 %v1379_v9, 0.0  ;;  %v1388_v51 = vmax.f32 %v1380_v26, 0.0  ;;  %v1389_v52 = vmax.f32 %v1381_v57, 0.0  ;;  %v1392_v16 = vmax.f32 %v1384_v54, 0.0 }
 0x737   :  { %v1390_v55 = vmax.f32 %v1382_v60, 0.0  ;;  %v1391_v15 = vmax.f32 %v1383_v35, 0.0  ;;  %v1393_v58 = vmax.f32 %v1385_v42, 0.0  ;;  %v1394_v63 = vmax.f32 %v1386_v21, 0.0 }
 0x738   :  { %v1399_v43 = vpack.c.bf16 %v1388_v51, %v1387_v14  ;;  %v1749_v22 = vpack.c.bf16 %v1675_v27, %v1674_v32  ;;  %v1490_v37 = vrot.slane %v4938_v50, %v4374_v38 }
 0x739   :  { %v1400_v20 = vpack.c.bf16 %v1390_v55, %v1389_v52  ;;  %v1401_v3 = vpack.c.bf16 %v1392_v16, %v1391_v15  ;;  %v1402_v11 = vpack.c.bf16 %v1394_v63, %v1393_v58 }
 0x73a   :  { %4014 = vmatprep.mubr.msk.bf16.mxu0 %vm220_vm3, %v1399_v43 }
 0x73b   :  { %4015 = vmatmul.mubr.msk.bf16.vlgmr.msra.gmra.mrb[32].mxu0 %vm220_vm3, %v1400_v20 }
 0x73c   :  { %4018 = vmatprep.mubr.msk.bf16.mxu0 %vm220_vm3, %v1401_v3 }
 0x743   :  { %4019 = vmatmul.mubr.msk.bf16.gmra.mrb[36].mxu0 %vm220_vm3, %v1402_v11 }
 0x744   :  { %4046 = vmatprep.mubr.msk.bf16.mxu0 %vm745_vm9, %v4791_v25 }
 0x80e   :  { %v4016_v5 = vpop.f32.mrb[32].mxu0 }
 0x80f   :  { %v1451_v8 = vpop.f32.mrb[33].mxu0 }
 0x810   :  { %v4017_v12 = vpop.f32.mrb[34].mxu0 }
 0x811   :  { %v1483_v59 = vpack.c.bf16 %v4017_v12, %v4016_v5  ;;  %v1454_v56 = vpop.f32.mrb[35].mxu0 }
 0x812   :  { %v1482_v45 = vpack.c.bf16 %v1454_v56, %v1451_v8 }
 0x814   :  { %4022 = vmatprep.subr.bf16.mxu1 %v1482_v45 }
 0x815   :  { %4023 = vmatpush3.bf16.msra.mxu1 %v1482_v45 }
 0x816   :  { %v4020_v49 = vpop.f32.mrb[36].mxu0  ;;  %4024 = vmatprep.subr.bf16.mxu1 %v1483_v59 }
 0x817   :  { %v1467_v1 = vpop.f32.mrb[37].mxu0 }
 0x818   :  { %v4021_v39 = vpop.f32.mrb[38].mxu0 }
 0x819   :  { %v1485_v28 = vpack.c.bf16 %v4021_v39, %v4020_v49  ;;  %v1470_v18 = vpop.f32.mrb[39].mxu0  ;;  %4025 = vmatpush3.bf16.msra.mxu1 %v1483_v59 }
 0x81a   :  { %v1484_v23 = vpack.c.bf16 %v1470_v18, %v1467_v1 }
 0x81c   :  { %4026 = vmatprep.subr.bf16.mxu1 %v1484_v23 }
 0x81d   :  { %4027 = vmatpush3.bf16.msra.mxu1 %v1484_v23 }
 0x81e   :  { %4028 = vmatprep.subr.bf16.mxu1 %v1485_v28 }
 0x821   :  { %4029 = vmatpush3.bf16.msra.mxu1 %v1485_v28 }
 0x822   :  { %4054 = vmatprep.subr.bf16.mxu1 %v1749_v22 }
 0x824   :  { %4031 = vmatmul.mubr.msk.bf16.vlgmr.msra.gmra.mrb[24].mxu1 %vm745_vm9, %v4807_v40 }
 0x825   :  { %4034 = vmatprep.mubr.msk.bf16.mxu1 %vm745_vm9, %v4809_v41  ;;  %4055 = vmatpush3.bf16.msra.mxu1 %v1749_v22 }
 0x82c   :  { %4035 = vmatmul.mubr.msk.bf16.gmra.mrb[28].mxu1 %vm745_vm9, %v4821_v46 }
 0x8f7   :  { %v4032_v53 = vpop.f32.mrb[24].mxu1 }
 0x8f8   :  { %v1525_v29 = vpop.f32.mrb[25].mxu1  ;;  %v4942_v47 = vadd.f32 %v4032_v53, %v1490_v37 }
 0x8f9   :  { %v4944_v31 = vadd.f32 %v1525_v29, %v1490_v37  ;;  %v4033_v34 = vpop.f32.mrb[26].mxu1 }
 0x8fa   :  { %v1528_v4 = vpop.f32.mrb[27].mxu1  ;;  %v4948_v26 = vadd.f32 %v4033_v34, %v1490_v37  ;;  %v1579_v54 = vmul.f32 %v4942_v47, %v4942_v47  ;;  %v1559_v14 = vsel %vm49_vm0, %v4942_v47, 0.0 }
 0x8fb   :  { %v1577_v9 = vmul.f32 %v4944_v31, %v4944_v31  ;;  %v4950_v57 = vadd.f32 %v1528_v4, %v1490_v37  ;;  %v1556_v60 = vsel %vm49_vm0, %v4944_v31, 0.0 }
 0x8fc   :  { %v1580_v52 = vmul.f32 %v4948_v26, %v4948_v26  ;;  %v1588_v43 = vsel %vm49_vm0, %v1579_v54, 0.0  ;;  %v1561_v20 = vsel %vm49_vm0, %v4948_v26, 0.0 }
 0x8fd   :  { %v1557_v35 = vsel %vm49_vm0, %v4950_v57, 0.0  ;;  %v1578_v42 = vmul.f32 %v4950_v57, %v4950_v57  ;;  %v1585_v51 = vsel %vm49_vm0, %v1577_v9, 0.0 }
 0x8fe   :  { %v1558_v21 = vadd.f32 %v1557_v35, %v1556_v60  ;;  %v1590_v56 = vsel %vm49_vm0, %v1580_v52, 0.0 }
 0x8ff   :  { %v1586_v16 = vsel %vm49_vm0, %v1578_v42, 0.0  ;;  %v4036_v55 = vpop.f32.mrb[28].mxu1 }
 0x900   :  { %v1560_v15 = vadd.f32 %v1559_v14, %v1558_v21  ;;  %v1587_v58 = vadd.f32 %v1586_v16, %v1585_v51  ;;  %v1541_v63 = vpop.f32.mrb[29].mxu1  ;;  %v4971_v8 = vadd.f32 %v4036_v55, %v1490_v37 }
 0x901   :  { %v4969_v3 = vadd.f32 %v1541_v63, %v1490_v37  ;;  %v4037_v11 = vpop.f32.mrb[30].mxu1 }
 0x902   :  { %v1589_v5 = vadd.f32 %v1588_v43, %v1587_v58  ;;  %v1562_v12 = vadd.f32 %v1561_v20, %v1560_v15  ;;  %v1544_v59 = vpop.f32.mrb[31].mxu1  ;;  %v4978_v18 = vadd.f32 %v4037_v11, %v1490_v37  ;;  %v1583_v27 = vmul.f32 %v4971_v8, %v4971_v8 }
 0x903   :  { %v1563_v45 = vsel %vm49_vm0, %v4969_v3, 0.0  ;;  %v1581_v49 = vmul.f32 %v4969_v3, %v4969_v3  ;;  %v1545_v1 = vadd.f32 %v1544_v59, %v1490_v37  ;;  %v1567_v34 = vsel %vm49_vm0, %v4971_v8, 0.0 }
 0x904   :  { %v1564_v39 = vadd.f32 %v1563_v45, %v1562_v12  ;;  %v1591_v28 = vadd.f32 %v1590_v56, %v1589_v5  ;;  %v1584_v4 = vmul.f32 %v4978_v18, %v4978_v18  ;;  %v1569_v54 = vsel %vm49_vm0, %v4978_v18, 0.0 }
 0x905   :  { %v1592_v23 = vsel %vm49_vm0, %v1581_v49, 0.0  ;;  %v1565_v32 = vsel %vm49_vm0, %v1545_v1, 0.0  ;;  %v1582_v29 = vmul.f32 %v1545_v1, %v1545_v1  ;;  %v1596_v35 = vsel %vm49_vm0, %v1583_v27, 0.0 }
 0x906   :  { %v1593_v22 = vadd.f32 %v1592_v23, %v1591_v28  ;;  %v1566_v53 = vadd.f32 %v1565_v32, %v1564_v39  ;;  %v1598_v14 = vsel %vm49_vm0, %v1584_v4, 0.0  ;;  %v1608_v11 = vmul.f32 2.0, %v4938_v50 }
 0x907   :  { %v1594_v37 = vsel %vm49_vm0, %v1582_v29, 0.0  ;;  %v1609_v5 = vmul.f32 %v4938_v50, %v4938_v50 }
 0x908   :  { %v1568_v9 = vadd.f32 %v1567_v34, %v1566_v53  ;;  %v1595_v60 = vadd.f32 %v1594_v37, %v1593_v22 }
 0x909   :  { %v1610_v49 = vsub.f32 %v1608_v11, %v1609_v5 }
 0x90a   :  { %v1570_v42 = vadd.f32 %v1569_v54, %v1568_v9  ;;  %v1597_v21 = vadd.f32 %v1596_v35, %v1595_v60 }
 0x90c   :  { %v1571_v51 = vrot.slane %v1570_v42, 4  ;;  %v1599_v52 = vadd.f32 %v1598_v14, %v1597_v21 }
 0x90e   :  { %v1572_v16 = vadd.f32 %v1571_v51, %v1570_v42  ;;  %v1600_v55 = vrot.slane %v1599_v52, 4 }
 0x910   :  { %v1573_v15 = vrot.slane %v1572_v16, 2  ;;  %v1601_v58 = vadd.f32 %v1600_v55, %v1599_v52 }
 0x912   :  { %v1574_v63 = vadd.f32 %v1573_v15, %v1572_v16  ;;  %v1602_v43 = vrot.slane %v1601_v58, 2 }
 0x914   :  { %v1575_v20 = vrot.slane %v1574_v63, 1  ;;  %v1603_v12 = vadd.f32 %v1602_v43, %v1601_v58 }
 0x916   :  { %v1576_v59 = vadd.f32 %v1575_v20, %v1574_v63  ;;  %v1604_v56 = vrot.slane %v1603_v12, 1 }
 0x918   :  { %v1606_v45 = vmul.f32 0.015625, %v1576_v59  ;;  %v1605_v39 = vadd.f32 %v1604_v56, %v1603_v12 }
 0x91a   :  { %v1611_v28 = vmul.f32 %v1606_v45, %v1606_v45  ;;  %v1615_v23 = vmul.f32 %v1606_v45, %v4938_v50  ;;  %v1607_v32 = vmul.f32 0.015625, %v1605_v39 }
 0x91c   :  { %v1612_v27 = vmul.f32 %v1611_v28, %v1610_v49  ;;  %v1619_v22 = vrot.slane %v1615_v23, %v4436_v2 }
 0x91e   :  { %v1613_v53 = vsub.f32 %v1607_v32, %v1612_v27  ;;  %v1625_v29 = vsub.f32 %v1545_v1, %v1619_v22  ;;  %v1620_v34 = vsub.f32 %v4944_v31, %v1619_v22  ;;  %v1621_v4 = vsub.f32 %v4950_v57, %v1619_v22 }
 0x91f   :  { %v1622_v9 = vsub.f32 %v4942_v47, %v1619_v22  ;;  %v1623_v37 = vsub.f32 %v4948_v26, %v1619_v22  ;;  %v1624_v54 = vsub.f32 %v4969_v3, %v1619_v22  ;;  %v1626_v60 = vsub.f32 %v4971_v8, %v1619_v22 }
 0x920   :  { %v1614_v35 = vmax.f32 %v1613_v53, 0.0  ;;  %v1627_v42 = vsub.f32 %v4978_v18, %v1619_v22  ;;  %v1645_v31 = vrot.slane %v4938_v50, %v4439_v44  ;;  %v1657_v47 = vrot.slane %v4938_v50, %v4910_v13 }
 0x922   :  { %v1628_v21 = vadd.f32 1e-05, %v1614_v35 }
 0x924   :  { %4243 = vrsqrt.f32 %v1628_v21 }
 0x92e   :  { %v4244_v14 = vpop.eup %4243 }
 0x92f   :  { %v1633_v1 = vrot.slane %v4244_v14, %v4436_v2 }
 0x931   :  { %v1639_v57 = vmul.f32 %v1633_v1, %v1625_v29  ;;  %v1634_v26 = vmul.f32 %v1633_v1, %v1620_v34  ;;  %v1635_v51 = vmul.f32 %v1633_v1, %v1621_v4  ;;  %v1636_v3 = vmul.f32 %v1633_v1, %v1622_v9 }
 0x932   :  { %v1637_v52 = vmul.f32 %v1633_v1, %v1623_v37  ;;  %v1638_v8 = vmul.f32 %v1633_v1, %v1624_v54  ;;  %v1640_v16 = vmul.f32 %v1633_v1, %v1626_v60  ;;  %v1641_v55 = vmul.f32 %v1633_v1, %v1627_v42 }
 0x933   :  { %v1646_v18 = vmul.f32 %v1645_v31, %v1634_v26  ;;  %v1647_v15 = vmul.f32 %v1645_v31, %v1635_v51  ;;  %v1648_v58 = vmul.f32 %v1645_v31, %v1636_v3  ;;  %v1651_v63 = vmul.f32 %v1645_v31, %v1639_v57 }
 0x934   :  { %v1649_v43 = vmul.f32 %v1645_v31, %v1637_v52  ;;  %v1650_v20 = vmul.f32 %v1645_v31, %v1638_v8  ;;  %v1652_v11 = vmul.f32 %v1645_v31, %v1640_v16  ;;  %v1653_v5 = vmul.f32 %v1645_v31, %v1641_v55  ;;  %v1951_v8 = vld [vmem:[%s5861_s0 + $0x150] sm:$0xff]  ;;  %v1952_v16 = vld [vmem:[%s5861_s0 + $0x158] sm:$0xff] }
 0x935   :  { %v1658_v12 = vadd.f32 %v1657_v47, %v1646_v18  ;;  %v1659_v59 = vadd.f32 %v1657_v47, %v1647_v15  ;;  %v1660_v56 = vadd.f32 %v1657_v47, %v1648_v58  ;;  %v1663_v50 = vadd.f32 %v1657_v47, %v1651_v63  ;;  %v1953_v18 = vld [vmem:[%s5861_s0 + $0x160] sm:$0xff] }
 0x936   :  { %v1661_v45 = vadd.f32 %v1657_v47, %v1649_v43  ;;  %v1662_v49 = vadd.f32 %v1657_v47, %v1650_v20  ;;  %v1664_v39 = vadd.f32 %v1657_v47, %v1652_v11  ;;  %v1665_v28 = vadd.f32 %v1657_v47, %v1653_v5  ;;  %v5037_v58 = vld [vmem:[%s5861_s0 + $0x140] sm:$0xf] }
 0x937   :  { %v1666_v23 = vmax.f32 %v1658_v12, 0.0  ;;  %v1667_v32 = vmax.f32 %v1659_v59, 0.0  ;;  %v1668_v27 = vmax.f32 %v1660_v56, 0.0  ;;  %v1671_v22 = vmax.f32 %v1663_v50, 0.0 }
 0x938   :  { %v1669_v53 = vmax.f32 %v1661_v45, 0.0  ;;  %v1670_v29 = vmax.f32 %v1662_v49, 0.0  ;;  %v1672_v34 = vmax.f32 %v1664_v39, 0.0  ;;  %v1673_v4 = vmax.f32 %v1665_v28, 0.0 }
 0x939   :  { %v1676_v9 = vpack.c.bf16 %v1667_v32, %v1666_v23  ;;  %v2028_v15 = vpack.c.bf16 %v1953_v18, %v1952_v16  ;;  %v1754_v63 = vrot.slane %v5037_v58, %v4374_v38 }
 0x93a   :  { %v1677_v37 = vpack.c.bf16 %v1669_v53, %v1668_v27  ;;  %v1678_v54 = vpack.c.bf16 %v1671_v22, %v1670_v29  ;;  %v1679_v60 = vpack.c.bf16 %v1673_v4, %v1672_v34 }
 0x93b   :  { %4038 = vmatprep.subr.bf16.mxu0 %v1676_v9 }
 0x93c   :  { %4039 = vmatpush3.bf16.msra.mxu0 %v1676_v9 }
 0x93d   :  { %4040 = vmatprep.subr.bf16.mxu0 %v1677_v37 }
 0x940   :  { %4041 = vmatpush3.bf16.msra.mxu0 %v1677_v37 }
 0x941   :  { %4042 = vmatprep.subr.bf16.mxu0 %v1678_v54 }
 0x944   :  { %4043 = vmatpush3.bf16.msra.mxu0 %v1678_v54 }
 0x945   :  { %4044 = vmatprep.subr.bf16.mxu0 %v1679_v60 }
 0x948   :  { %4045 = vmatpush3.bf16.msra.mxu0 %v1679_v60 }
 0x94b   :  { %4047 = vmatmul.mubr.msk.bf16.vlgmr.msra.gmra.mrb[40].mxu0 %vm745_vm9, %v4807_v40 }
 0x94c   :  { %4050 = vmatprep.mubr.msk.bf16.mxu0 %vm745_vm9, %v4809_v41 }
 0x953   :  { %4051 = vmatmul.mubr.msk.bf16.gmra.mrb[44].mxu0 %vm745_vm9, %v4821_v46 }
 0x954   :  { %4072 = vmatprep.mubr.msk.bf16.mxu0 %vm745_vm9, %v4791_v25  ;;  %v1950_v25 = vld [vmem:[%s5861_s0 + $0x148] sm:$0xff] }
 0x955   :  { %v2027_v55 = vpack.c.bf16 %v1951_v8, %v1950_v25 }
 0x957   :  { %4080 = vmatprep.subr.bf16.mxu1 %v2027_v55 }
 0xa1e   :  { %v4048_v35 = vpop.f32.mrb[40].mxu0 }
 0xa1f   :  { %v1714_v42 = vpop.f32.mrb[41].mxu0 }
 0xa20   :  { %v4049_v21 = vpop.f32.mrb[42].mxu0 }
 0xa21   :  { %v1746_v14 = vpack.c.bf16 %v4049_v21, %v4048_v35  ;;  %v1717_v1 = vpop.f32.mrb[43].mxu0 }
 0xa22   :  { %v1745_v31 = vpack.c.bf16 %v1717_v1, %v1714_v42 }
 0xa24   :  { %4056 = vmatprep.mubr.msk.bf16.mxu1 %vm49_vm0, %v1745_v31 }
 0xa25   :  { %4057 = vmatmul.mubr.msk.bf16.vlgmr.msra.gmra.mrb[32].mxu1 %vm49_vm0, %v1746_v14 }
 0xa26   :  { %v4052_v47 = vpop.f32.mrb[44].mxu0  ;;  %4081 = vmatpush3.bf16.msra.mxu1 %v2027_v55 }
 0xa27   :  { %v1730_v57 = vpop.f32.mrb[45].mxu0  ;;  %4082 = vmatprep.subr.bf16.mxu1 %v2028_v15 }
 0xa28   :  { %v4053_v26 = vpop.f32.mrb[46].mxu0 }
 0xa29   :  { %v1748_v51 = vpack.c.bf16 %v4053_v26, %v4052_v47  ;;  %v1733_v3 = vpop.f32.mrb[47].mxu0 }
 0xa2a   :  { %v1747_v52 = vpack.c.bf16 %v1733_v3, %v1730_v57  ;;  %4083 = vmatpush3.bf16.msra.mxu1 %v2028_v15 }
 0xa2c   :  { %4060 = vmatprep.mubr.msk.bf16.mxu1 %vm49_vm0, %v1747_v52 }
 0xa2d   :  { %4061 = vmatmul.mubr.msk.bf16.gmra.mrb[36].mxu1 %vm49_vm0, %v1748_v51 }
 0xaf8   :  { %v4058_v43 = vpop.f32.mrb[32].mxu1 }
 0xaf9   :  { %v1801_v20 = vpop.f32.mrb[33].mxu1  ;;  %v5041_v11 = vadd.f32 %v4058_v43, %v1754_v63 }
 0xafa   :  { %v5043_v5 = vadd.f32 %v1801_v20, %v1754_v63  ;;  %v4059_v12 = vpop.f32.mrb[34].mxu1 }
 0xafb   :  { %v1804_v59 = vpop.f32.mrb[35].mxu1  ;;  %v5047_v50 = vadd.f32 %v4059_v12, %v1754_v63  ;;  %v1855_v49 = vmul.f32 %v5041_v11, %v5041_v11  ;;  %v1835_v27 = vsel %vm220_vm3, %v5041_v11, 0.0 }
 0xafc   :  { %v1853_v56 = vmul.f32 %v5043_v5, %v5043_v5  ;;  %v5049_v45 = vadd.f32 %v1804_v59, %v1754_v63  ;;  %v1832_v39 = vsel %vm220_vm3, %v5043_v5, 0.0 }
 0xafd   :  { %v1856_v53 = vmul.f32 %v5047_v50, %v5047_v50  ;;  %v1864_v54 = vsel %vm220_vm3, %v1855_v49, 0.0  ;;  %v1837_v60 = vsel %vm220_vm3, %v5047_v50, 0.0 }
 0xafe   :  { %v1833_v28 = vsel %vm220_vm3, %v5049_v45, 0.0  ;;  %v1854_v23 = vmul.f32 %v5049_v45, %v5049_v45  ;;  %v1861_v22 = vsel %vm220_vm3, %v1853_v56, 0.0 }
 0xaff   :  { %v1834_v32 = vadd.f32 %v1833_v28, %v1832_v39  ;;  %v1866_v47 = vsel %vm220_vm3, %v1856_v53, 0.0 }
 0xb00   :  { %v1862_v29 = vsel %vm220_vm3, %v1854_v23, 0.0  ;;  %v4062_v34 = vpop.f32.mrb[36].mxu1 }
 0xb01   :  { %v1836_v4 = vadd.f32 %v1835_v27, %v1834_v32  ;;  %v1863_v9 = vadd.f32 %v1862_v29, %v1861_v22  ;;  %v1817_v37 = vpop.f32.mrb[37].mxu1  ;;  %v5070_v14 = vadd.f32 %v4062_v34, %v1754_v63 }
 0xb02   :  { %v5068_v35 = vadd.f32 %v1817_v37, %v1754_v63  ;;  %v4063_v42 = vpop.f32.mrb[38].mxu1 }
 0xb03   :  { %v1865_v21 = vadd.f32 %v1864_v54, %v1863_v9  ;;  %v1838_v1 = vadd.f32 %v1837_v60, %v1836_v4  ;;  %v1820_v31 = vpop.f32.mrb[39].mxu1  ;;  %v5077_v25 = vadd.f32 %v4063_v42, %v1754_v63  ;;  %v1859_v55 = vmul.f32 %v5070_v14, %v5070_v14 }
 0xb04   :  { %v1839_v57 = vsel %vm220_vm3, %v5068_v35, 0.0  ;;  %v1857_v26 = vmul.f32 %v5068_v35, %v5068_v35  ;;  %v1821_v51 = vadd.f32 %v1820_v31, %v1754_v63  ;;  %v1843_v20 = vsel %vm220_vm3, %v5070_v14, 0.0 }
 0xb05   :  { %v1840_v3 = vadd.f32 %v1839_v57, %v1838_v1  ;;  %v1867_v52 = vadd.f32 %v1866_v47, %v1865_v21  ;;  %v1860_v12 = vmul.f32 %v5077_v25, %v5077_v25  ;;  %v1845_v56 = vsel %vm220_vm3, %v5077_v25, 0.0 }
 0xb06   :  { %v1868_v8 = vsel %vm220_vm3, %v1857_v26, 0.0  ;;  %v1841_v16 = vsel %vm220_vm3, %v1821_v51, 0.0  ;;  %v1858_v43 = vmul.f32 %v1821_v51, %v1821_v51  ;;  %v1872_v39 = vsel %vm220_vm3, %v1859_v55, 0.0 }
 0xb07   :  { %v1869_v18 = vadd.f32 %v1868_v8, %v1867_v52  ;;  %v1842_v15 = vadd.f32 %v1841_v16, %v1840_v3  ;;  %v1874_v32 = vsel %vm220_vm3, %v1860_v12, 0.0  ;;  %v1884_v60 = vmul.f32 2.0, %v5037_v58 }
 0xb08   :  { %v1870_v63 = vsel %vm220_vm3, %v1858_v43, 0.0  ;;  %v1885_v42 = vmul.f32 %v5037_v58, %v5037_v58 }
 0xb09   :  { %v1844_v59 = vadd.f32 %v1843_v20, %v1842_v15  ;;  %v1871_v49 = vadd.f32 %v1870_v63, %v1869_v18 }
 0xb0a   :  { %v1886_v57 = vsub.f32 %v1884_v60, %v1885_v42 }
 0xb0b   :  { %v1846_v28 = vadd.f32 %v1845_v56, %v1844_v59  ;;  %v1873_v23 = vadd.f32 %v1872_v39, %v1871_v49 }
 0xb0d   :  { %v1847_v27 = vrot.slane %v1846_v28, 4  ;;  %v1875_v22 = vadd.f32 %v1874_v32, %v1873_v23 }
 0xb0f   :  { %v1848_v53 = vadd.f32 %v1847_v27, %v1846_v28  ;;  %v1876_v29 = vrot.slane %v1875_v22, 4 }
 0xb11   :  { %v1849_v34 = vrot.slane %v1848_v53, 2  ;;  %v1877_v4 = vadd.f32 %v1876_v29, %v1875_v22 }
 0xb13   :  { %v1850_v9 = vadd.f32 %v1849_v34, %v1848_v53  ;;  %v1878_v37 = vrot.slane %v1877_v4, 2 }
 0xb15   :  { %v1851_v54 = vrot.slane %v1850_v9, 1  ;;  %v1879_v21 = vadd.f32 %v1878_v37, %v1877_v4 }
 0xb17   :  { %v1852_v1 = vadd.f32 %v1851_v54, %v1850_v9  ;;  %v1880_v31 = vrot.slane %v1879_v21, 1 }
 0xb19   :  { %v1882_v47 = vmul.f32 0.015625, %v1852_v1  ;;  %v1881_v26 = vadd.f32 %v1880_v31, %v1879_v21 }
 0xb1b   :  { %v1887_v3 = vmul.f32 %v1882_v47, %v1882_v47  ;;  %v1891_v52 = vmul.f32 %v1882_v47, %v5037_v58  ;;  %v1883_v8 = vmul.f32 0.015625, %v1881_v26 }
 0xb1d   :  { %v1888_v16 = vmul.f32 %v1887_v3, %v1886_v57  ;;  %v1895_v55 = vrot.slane %v1891_v52, %v4436_v2 }
 0xb1f   :  { %v1889_v18 = vsub.f32 %v1883_v8, %v1888_v16  ;;  %v1901_v15 = vsub.f32 %v1821_v51, %v1895_v55  ;;  %v1896_v43 = vsub.f32 %v5043_v5, %v1895_v55  ;;  %v1897_v20 = vsub.f32 %v5049_v45, %v1895_v55 }
 0xb20   :  { %v1898_v12 = vsub.f32 %v5041_v11, %v1895_v55  ;;  %v1899_v59 = vsub.f32 %v5047_v50, %v1895_v55  ;;  %v1900_v63 = vsub.f32 %v5068_v35, %v1895_v55  ;;  %v1902_v56 = vsub.f32 %v5070_v14, %v1895_v55 }
 0xb21   :  { %v1890_v49 = vmax.f32 %v1889_v18, 0.0  ;;  %v1903_v39 = vsub.f32 %v5077_v25, %v1895_v55  ;;  %v1921_v5 = vrot.slane %v5037_v58, %v4439_v44  ;;  %v1933_v11 = vrot.slane %v5037_v58, %v4910_v13 }
 0xb23   :  { %v1904_v28 = vadd.f32 1e-05, %v1890_v49  ;;  %v2246_v49 = vld [vmem:[%s5861_s0 + $0x1b8] sm:$0xff] }
 0xb25   :  { %4245 = vrsqrt.f32 %v1904_v28  ;;  %v2247_v28 = vld [vmem:[%s5861_s0 + $0x1c0] sm:$0xff] }
 0xb2f   :  { %v4246_v23 = vpop.eup %4245 }
 0xb30   :  { %v1909_v51 = vrot.slane %v4246_v23, %v4436_v2  ;;  %v2248_v23 = vld [vmem:[%s5861_s0 + $0x1c8] sm:$0xff] }
 0xb32   :  { %v1915_v45 = vmul.f32 %v1909_v51, %v1901_v15  ;;  %v1910_v50 = vmul.f32 %v1909_v51, %v1896_v43  ;;  %v1911_v32 = vmul.f32 %v1909_v51, %v1897_v20  ;;  %v1912_v35 = vmul.f32 %v1909_v51, %v1898_v12 }
 0xb33   :  { %v1913_v27 = vmul.f32 %v1909_v51, %v1899_v59  ;;  %v1914_v14 = vmul.f32 %v1909_v51, %v1900_v63  ;;  %v1916_v22 = vmul.f32 %v1909_v51, %v1902_v56  ;;  %v1917_v53 = vmul.f32 %v1909_v51, %v1903_v39  ;;  %v2245_v56 = vld [vmem:[%s5861_s0 + $0x1b0] sm:$0xff] }
 0xb34   :  { %v1922_v25 = vmul.f32 %v1921_v5, %v1910_v50  ;;  %v1923_v29 = vmul.f32 %v1921_v5, %v1911_v32  ;;  %v1924_v34 = vmul.f32 %v1921_v5, %v1912_v35  ;;  %v1927_v4 = vmul.f32 %v1921_v5, %v1915_v45  ;;  %v2251_v50 = vld [vmem:[%s5861_s0 + $0x1e0] sm:$0xff]  ;;  %v2252_v32 = vld [vmem:[%s5861_s0 + $0x1e8] sm:$0xff] }
 0xb35   :  { %v1925_v9 = vmul.f32 %v1921_v5, %v1913_v27  ;;  %v1926_v37 = vmul.f32 %v1921_v5, %v1914_v14  ;;  %v1928_v54 = vmul.f32 %v1921_v5, %v1916_v22  ;;  %v1929_v60 = vmul.f32 %v1921_v5, %v1917_v53  ;;  %v2249_v5 = vld [vmem:[%s5861_s0 + $0x1d0] sm:$0xff] }
 0xb36   :  { %v1934_v42 = vadd.f32 %v1933_v11, %v1922_v25  ;;  %v1935_v21 = vadd.f32 %v1933_v11, %v1923_v29  ;;  %v1936_v1 = vadd.f32 %v1933_v11, %v1924_v34  ;;  %v1939_v58 = vadd.f32 %v1933_v11, %v1927_v4 }
 0xb37   :  { %v1937_v31 = vadd.f32 %v1933_v11, %v1925_v9  ;;  %v1938_v47 = vadd.f32 %v1933_v11, %v1926_v37  ;;  %v1940_v57 = vadd.f32 %v1933_v11, %v1928_v54  ;;  %v1941_v26 = vadd.f32 %v1933_v11, %v1929_v60  ;;  %v2250_v11 = vld [vmem:[%s5861_s0 + $0x1d8] sm:$0xff]  ;;  %v2231_v9 = vld [vmem:[%s5861_s0 + $0x180] sm:$0xff]  ;;  %v2232_v37 = vld [vmem:[%s5861_s0 + $0x188] sm:$0xff] }
 0xb38   :  { %v1942_v3 = vmax.f32 %v1934_v42, 0.0  ;;  %v1943_v52 = vmax.f32 %v1935_v21, 0.0  ;;  %v1944_v8 = vmax.f32 %v1936_v1, 0.0  ;;  %v1947_v16 = vmax.f32 %v1939_v58, 0.0  ;;  %v2233_v60 = vld [vmem:[%s5861_s0 + $0x190] sm:$0xff]  ;;  %v2234_v42 = vld [vmem:[%s5861_s0 + $0x198] sm:$0xff] }
 0xb39   :  { %v1945_v55 = vmax.f32 %v1937_v31, 0.0  ;;  %v1946_v18 = vmax.f32 %v1938_v47, 0.0  ;;  %v1948_v15 = vmax.f32 %v1940_v57, 0.0  ;;  %v1949_v43 = vmax.f32 %v1941_v26, 0.0  ;;  %v2235_v1 = vld [vmem:[%s5861_s0 + $0x1a0] sm:$0xff]  ;;  %v2236_v58 = vld [vmem:[%s5861_s0 + $0x1a8] sm:$0xff] }
 0xb3a   :  { %v1954_v20 = vpack.c.bf16 %v1943_v52, %v1942_v3  ;;  %v2253_v39 = vpack.c.bf16 %v2246_v49, %v2245_v56  ;;  %v2254_v51 = vpack.c.bf16 %v2248_v23, %v2247_v28  ;;  %v2255_v45 = vpack.c.bf16 %v2250_v11, %v2249_v5  ;;  %v2399_v47 = vld [vmem:[%s5861_s0 + $0x1f0] sm:$0xff]  ;;  %v2400_v57 = vld [vmem:[%s5861_s0 + $0x1f8] sm:$0xff]  ;;  %v5187_v3 = vld [vmem:[%s5861_s0 + $0x168] sm:$0xf] }
 0xb3b   :  { %v1955_v12 = vpack.c.bf16 %v1945_v55, %v1944_v8  ;;  %v1956_v59 = vpack.c.bf16 %v1947_v16, %v1946_v18  ;;  %v1957_v63 = vpack.c.bf16 %v1949_v43, %v1948_v15  ;;  %v2256_v35 = vpack.c.bf16 %v2252_v32, %v2251_v50 }
 0xb3c   :  { %4064 = vmatprep.subr.bf16.mxu0 %v1954_v20  ;;  %v2242_v54 = vpack.c.bf16 %v2232_v37, %v2231_v9  ;;  %v2243_v21 = vpack.c.bf16 %v2234_v42, %v2233_v60  ;;  %v2244_v31 = vpack.c.bf16 %v2236_v58, %v2235_v1  ;;  %v5181_v26 = vpack.c.bf16 %v2400_v57, %v2399_v47 }
 0xb3d   :  { %4065 = vmatpush3.bf16.msra.mxu0 %v1954_v20  ;;  %v2033_v52 = vrot.slane %v5187_v3, %v4374_v38 }
 0xb3e   :  { %4066 = vmatprep.subr.bf16.mxu0 %v1955_v12 }
 0xb41   :  { %4067 = vmatpush3.bf16.msra.mxu0 %v1955_v12 }
 0xb42   :  { %4068 = vmatprep.subr.bf16.mxu0 %v1956_v59 }
 0xb45   :  { %4069 = vmatpush3.bf16.msra.mxu0 %v1956_v59 }
 0xb46   :  { %4070 = vmatprep.subr.bf16.mxu0 %v1957_v63 }
 0xb49   :  { %4071 = vmatpush3.bf16.msra.mxu0 %v1957_v63 }
 0xb4a   :  { %4092 = vmatprep.subr.bf16.mxu0 %v2253_v39 }
 0xb4c   :  { %4073 = vmatmul.mubr.msk.bf16.vlgmr.msra.gmra.mrb[48].mxu0 %vm745_vm9, %v4807_v40 }
 0xb4d   :  { %4093 = vmatpush3.bf16.msra.mxu0 %v2253_v39  ;;  %4076 = vmatprep.mubr.msk.bf16.mxu0 %vm745_vm9, %v4809_v41 }
 0xb4e   :  { %4094 = vmatprep.subr.bf16.mxu0 %v2254_v51 }
 0xb51   :  { %4095 = vmatpush3.bf16.msra.mxu0 %v2254_v51 }
 0xb52   :  { %4096 = vmatprep.subr.bf16.mxu0 %v2255_v45 }
 0xb54   :  { %4077 = vmatmul.mubr.msk.bf16.gmra.mrb[52].mxu0 %vm745_vm9, %v4821_v46 }
 0xb55   :  { %4097 = vmatpush3.bf16.msra.mxu0 %v2255_v45  ;;  %4100 = vmatprep.mubr.msk.bf16.mxu0 %vm745_vm9, %v4769_v62 }
 0xb56   :  { %4098 = vmatprep.subr.bf16.mxu0 %v2256_v35 }
 0xb59   :  { %4099 = vmatpush3.bf16.msra.mxu0 %v2256_v35 }
 0xb5c   :  { %4101 = vmatmul.mubr.msk.bf16.vlgmr.msra.gmra.mrb[56].mxu0 %vm745_vm9, %v4771_v48 }
 0xb5d   :  { %4104 = vmatprep.mubr.msk.bf16.mxu0 %vm745_vm9, %v4777_v10  ;;  %v2229_v10 = vld [vmem:[%s5861_s0 + $0x170] sm:$0xff] }
 0xb64   :  { %4105 = vmatmul.mubr.msk.bf16.gmra.mrb[60].mxu0 %vm745_vm9, %v4779_v17  ;;  %v2230_v17 = vld [vmem:[%s5861_s0 + $0x178] sm:$0xff] }
 0xb65   :  { %v2241_v4 = vpack.c.bf16 %v2230_v17, %v2229_v10 }
 0xb67   :  { %4108 = vmatprep.subr.bf16.mxu0 %v2241_v4 }
 0xb68   :  { %4109 = vmatpush3.bf16.msra.mxu0 %v2241_v4 }
 0xb69   :  { %4110 = vmatprep.subr.bf16.mxu0 %v2242_v54 }
 0xb6c   :  { %4111 = vmatpush3.bf16.msra.mxu0 %v2242_v54 }
 0xb6d   :  { %4112 = vmatprep.subr.bf16.mxu0 %v2243_v21 }
 0xb70   :  { %4113 = vmatpush3.bf16.msra.mxu0 %v2243_v21 }
 0xb71   :  { %4114 = vmatprep.subr.bf16.mxu0 %v2244_v31 }
 0xb74   :  { %4115 = vmatpush3.bf16.msra.mxu0 %v2244_v31 }
 0xb75   :  { %4124 = vmatprep.subr.bf16.mxu0 %v5181_v26 }
 0xc1f   :  { %v4074_v40 = vpop.f32.mrb[48].mxu0 }
 0xc20   :  { %v1992_v41 = vpop.f32.mrb[49].mxu0 }
 0xc21   :  { %v4075_v27 = vpop.f32.mrb[50].mxu0 }
 0xc22   :  { %v2024_v14 = vpack.c.bf16 %v4075_v27, %v4074_v40  ;;  %v1995_v46 = vpop.f32.mrb[51].mxu0 }
 0xc23   :  { %v2023_v22 = vpack.c.bf16 %v1995_v46, %v1992_v41 }
 0xc25   :  { %4084 = vmatprep.mubr.msk.bf16.mxu1 %vm220_vm3, %v2023_v22 }
 0xc26   :  { %4085 = vmatmul.mubr.msk.bf16.vlgmr.msra.gmra.mrb[40].mxu1 %vm220_vm3, %v2024_v14 }
 0xc27   :  { %v4078_v62 = vpop.f32.mrb[52].mxu0 }
 0xc28   :  { %v2008_v53 = vpop.f32.mrb[53].mxu0 }
 0xc29   :  { %v4079_v25 = vpop.f32.mrb[54].mxu0 }
 0xc2a   :  { %v2026_v48 = vpack.c.bf16 %v4079_v25, %v4078_v62  ;;  %v2011_v29 = vpop.f32.mrb[55].mxu0 }
 0xc2b   :  { %v2025_v34 = vpack.c.bf16 %v2011_v29, %v2008_v53 }
 0xc2d   :  { %4088 = vmatprep.mubr.msk.bf16.mxu1 %vm220_vm3, %v2025_v34 }
 0xc2e   :  { %4089 = vmatmul.mubr.msk.bf16.gmra.mrb[44].mxu1 %vm220_vm3, %v2026_v48 }
 0xcf9   :  { %v4086_v8 = vpop.f32.mrb[40].mxu1 }
 0xcfa   :  { %v2080_v16 = vpop.f32.mrb[41].mxu1  ;;  %v5191_v55 = vadd.f32 %v4086_v8, %v2033_v52 }
 0xcfb   :  { %v5193_v18 = vadd.f32 %v2080_v16, %v2033_v52  ;;  %v4087_v15 = vpop.f32.mrb[42].mxu1 }
 0xcfc   :  { %v2083_v43 = vpop.f32.mrb[43].mxu1  ;;  %v5197_v12 = vadd.f32 %v4087_v15, %v2033_v52  ;;  %v2134_v63 = vmul.f32 %v5191_v55, %v5191_v55  ;;  %v2114_v23 = vsel %vm745_vm9, %v5191_v55, 0.0 }
 0xcfd   :  { %v2132_v20 = vmul.f32 %v5193_v18, %v5193_v18  ;;  %v5199_v59 = vadd.f32 %v2083_v43, %v2033_v52  ;;  %v2111_v56 = vsel %vm745_vm9, %v5193_v18, 0.0 }
 0xcfe   :  { %v2135_v5 = vmul.f32 %v5197_v12, %v5197_v12  ;;  %v2143_v40 = vsel %vm745_vm9, %v2134_v63, 0.0  ;;  %v2116_v41 = vsel %vm745_vm9, %v5197_v12, 0.0 }
 0xcff   :  { %v2112_v49 = vsel %vm745_vm9, %v5199_v59, 0.0  ;;  %v2133_v39 = vmul.f32 %v5199_v59, %v5199_v59  ;;  %v2140_v51 = vsel %vm745_vm9, %v2132_v20, 0.0 }
 0xd00   :  { %v2113_v28 = vadd.f32 %v2112_v49, %v2111_v56  ;;  %v2145_v25 = vsel %vm745_vm9, %v2135_v5, 0.0 }
 0xd01   :  { %v2141_v11 = vsel %vm745_vm9, %v2133_v39, 0.0  ;;  %v4090_v45 = vpop.f32.mrb[44].mxu1 }
 0xd02   :  { %v2115_v50 = vadd.f32 %v2114_v23, %v2113_v28  ;;  %v2142_v32 = vadd.f32 %v2141_v11, %v2140_v51  ;;  %v2096_v35 = vpop.f32.mrb[45].mxu1  ;;  %v5220_v22 = vadd.f32 %v4090_v45, %v2033_v52  ;;  %v2163_v11 = vmul.f32 2.0, %v5187_v3 }
 0xd03   :  { %v5218_v27 = vadd.f32 %v2096_v35, %v2033_v52  ;;  %v4091_v14 = vpop.f32.mrb[46].mxu1  ;;  %v2164_v45 = vmul.f32 %v5187_v3, %v5187_v3 }
 0xd04   :  { %v2144_v46 = vadd.f32 %v2143_v40, %v2142_v32  ;;  %v2117_v62 = vadd.f32 %v2116_v41, %v2115_v50  ;;  %v2099_v53 = vpop.f32.mrb[47].mxu1  ;;  %v5227_v4 = vadd.f32 %v4091_v14, %v2033_v52  ;;  %v2138_v54 = vmul.f32 %v5220_v22, %v5220_v22 }
 0xd05   :  { %v2118_v48 = vsel %vm745_vm9, %v5218_v27, 0.0  ;;  %v2136_v29 = vmul.f32 %v5218_v27, %v5218_v27  ;;  %v2100_v34 = vadd.f32 %v2099_v53, %v2033_v52  ;;  %v2122_v1 = vsel %vm745_vm9, %v5220_v22, 0.0 }
 0xd06   :  { %v2119_v10 = vadd.f32 %v2118_v48, %v2117_v62  ;;  %v2146_v17 = vadd.f32 %v2145_v25, %v2144_v46  ;;  %v2139_v58 = vmul.f32 %v5227_v4, %v5227_v4  ;;  %v2124_v57 = vsel %vm745_vm9, %v5227_v4, 0.0 }
 0xd07   :  { %v2147_v9 = vsel %vm745_vm9, %v2136_v29, 0.0  ;;  %v2120_v37 = vsel %vm745_vm9, %v2100_v34, 0.0  ;;  %v2137_v21 = vmul.f32 %v2100_v34, %v2100_v34  ;;  %v2151_v8 = vsel %vm745_vm9, %v2138_v54, 0.0 }
 0xd08   :  { %v2148_v60 = vadd.f32 %v2147_v9, %v2146_v17  ;;  %v2121_v42 = vadd.f32 %v2120_v37, %v2119_v10  ;;  %v2153_v43 = vsel %vm745_vm9, %v2139_v58, 0.0  ;;  %v2165_v41 = vsub.f32 %v2163_v11, %v2164_v45 }
 0xd09   :  { %v2149_v47 = vsel %vm745_vm9, %v2137_v21, 0.0 }
 0xd0a   :  { %v2123_v31 = vadd.f32 %v2122_v1, %v2121_v42  ;;  %v2150_v52 = vadd.f32 %v2149_v47, %v2148_v60 }
 0xd0c   :  { %v2125_v16 = vadd.f32 %v2124_v57, %v2123_v31  ;;  %v2152_v15 = vadd.f32 %v2151_v8, %v2150_v52 }
 0xd0e   :  { %v2126_v20 = vrot.slane %v2125_v16, 4  ;;  %v2154_v63 = vadd.f32 %v2153_v43, %v2152_v15 }
 0xd10   :  { %v2127_v56 = vadd.f32 %v2126_v20, %v2125_v16  ;;  %v2155_v49 = vrot.slane %v2154_v63, 4 }
 0xd12   :  { %v2128_v39 = vrot.slane %v2127_v56, 2  ;;  %v2156_v28 = vadd.f32 %v2155_v49, %v2154_v63 }
 0xd14   :  { %v2129_v23 = vadd.f32 %v2128_v39, %v2127_v56  ;;  %v2157_v51 = vrot.slane %v2156_v28, 2 }
 0xd16   :  { %v2130_v5 = vrot.slane %v2129_v23, 1  ;;  %v2158_v50 = vadd.f32 %v2157_v51, %v2156_v28 }
 0xd18   :  { %v2131_v32 = vadd.f32 %v2130_v5, %v2129_v23  ;;  %v2159_v35 = vrot.slane %v2158_v50, 1 }
 0xd1a   :  { %v2161_v40 = vmul.f32 0.015625, %v2131_v32  ;;  %v2160_v14 = vadd.f32 %v2159_v35, %v2158_v50 }
 0xd1c   :  { %v2166_v46 = vmul.f32 %v2161_v40, %v2161_v40  ;;  %v2170_v62 = vmul.f32 %v2161_v40, %v5187_v3  ;;  %v2162_v53 = vmul.f32 0.015625, %v2160_v14  ;;  %v2401_v40 = vld [vmem:[%s5861_s0 + $0x200] sm:$0xff] }
 0xd1e   :  { %v2167_v25 = vmul.f32 %v2166_v46, %v2165_v41  ;;  %v2174_v48 = vrot.slane %v2170_v62, %v4436_v2  ;;  %v2402_v41 = vld [vmem:[%s5861_s0 + $0x208] sm:$0xff] }
 0xd20   :  { %v2168_v29 = vsub.f32 %v2162_v53, %v2167_v25  ;;  %v2180_v10 = vsub.f32 %v2100_v34, %v2174_v48  ;;  %v2175_v17 = vsub.f32 %v5193_v18, %v2174_v48  ;;  %v2176_v9 = vsub.f32 %v5199_v59, %v2174_v48 }
 0xd21   :  { %v2177_v37 = vsub.f32 %v5191_v55, %v2174_v48  ;;  %v2178_v54 = vsub.f32 %v5197_v12, %v2174_v48  ;;  %v2179_v60 = vsub.f32 %v5218_v27, %v2174_v48  ;;  %v2181_v42 = vsub.f32 %v5220_v22, %v2174_v48 }
 0xd22   :  { %v2169_v21 = vmax.f32 %v2168_v29, 0.0  ;;  %v2182_v1 = vsub.f32 %v5227_v4, %v2174_v48  ;;  %v2200_v18 = vrot.slane %v5187_v3, %v4439_v44  ;;  %v2212_v55 = vrot.slane %v5187_v3, %v4910_v13 }
 0xd24   :  { %v2183_v58 = vadd.f32 1e-05, %v2169_v21  ;;  %v2699_v21 = vld [vmem:[%s5861_s0 + $0x260] sm:$0xff] }
 0xd26   :  { %4247 = vrsqrt.f32 %v2183_v58  ;;  %v2700_v58 = vld [vmem:[%s5861_s0 + $0x268] sm:$0xff] }
 0xd30   :  { %v4248_v31 = vpop.eup %4247 }
 0xd31   :  { %v2188_v34 = vrot.slane %v4248_v31, %v4436_v2  ;;  %v2708_v31 = vpack.c.bf16 %v2700_v58, %v2699_v21 }
 0xd33   :  { %v2194_v59 = vmul.f32 %v2188_v34, %v2180_v10  ;;  %v2189_v12 = vmul.f32 %v2188_v34, %v2175_v17  ;;  %v2190_v47 = vmul.f32 %v2188_v34, %v2176_v9  ;;  %v2191_v27 = vmul.f32 %v2188_v34, %v2177_v37  ;;  %v2478_v9 = vld [vmem:[%s5861_s0 + $0x210] sm:$0xff]  ;;  %v2479_v37 = vld [vmem:[%s5861_s0 + $0x218] sm:$0xff] }
 0xd34   :  { %v2192_v57 = vmul.f32 %v2188_v34, %v2178_v54  ;;  %v2193_v22 = vmul.f32 %v2188_v34, %v2179_v60  ;;  %v2195_v52 = vmul.f32 %v2188_v34, %v2181_v42  ;;  %v2196_v8 = vmul.f32 %v2188_v34, %v2182_v1  ;;  %v2480_v60 = vld [vmem:[%s5861_s0 + $0x220] sm:$0xff]  ;;  %v5324_v34 = vld [vmem:[%s5861_s0 + $0x228] sm:$0xf] }
 0xd35   :  { %v2206_v4 = vmul.f32 %v2200_v18, %v2194_v59  ;;  %v2201_v16 = vmul.f32 %v2200_v18, %v2189_v12  ;;  %v2202_v15 = vmul.f32 %v2200_v18, %v2190_v47  ;;  %v2203_v43 = vmul.f32 %v2200_v18, %v2191_v27 }
 0xd36   :  { %v2204_v20 = vmul.f32 %v2200_v18, %v2192_v57  ;;  %v2205_v63 = vmul.f32 %v2200_v18, %v2193_v22  ;;  %v2207_v56 = vmul.f32 %v2200_v18, %v2195_v52  ;;  %v2208_v49 = vmul.f32 %v2200_v18, %v2196_v8 }
 0xd37   :  { %v2213_v39 = vadd.f32 %v2212_v55, %v2201_v16  ;;  %v2214_v28 = vadd.f32 %v2212_v55, %v2202_v15  ;;  %v2215_v23 = vadd.f32 %v2212_v55, %v2203_v43  ;;  %v2218_v13 = vadd.f32 %v2212_v55, %v2206_v4 }
 0xd38   :  { %v2216_v3 = vadd.f32 %v2212_v55, %v2204_v20  ;;  %v2217_v51 = vadd.f32 %v2212_v55, %v2205_v63  ;;  %v2219_v5 = vadd.f32 %v2212_v55, %v2207_v56  ;;  %v2220_v11 = vadd.f32 %v2212_v55, %v2208_v49 }
 0xd39   :  { %v2221_v45 = vmax.f32 %v2213_v39, 0.0  ;;  %v2222_v50 = vmax.f32 %v2214_v28, 0.0  ;;  %v2223_v32 = vmax.f32 %v2215_v23, 0.0  ;;  %v2226_v35 = vmax.f32 %v2218_v13, 0.0 }
 0xd3a   :  { %v2224_v14 = vmax.f32 %v2216_v3, 0.0  ;;  %v2225_v46 = vmax.f32 %v2217_v51, 0.0  ;;  %v2227_v62 = vmax.f32 %v2219_v5, 0.0  ;;  %v2228_v53 = vmax.f32 %v2220_v11, 0.0 }
 0xd3b   :  { %v2237_v25 = vpack.c.bf16 %v2222_v50, %v2221_v45  ;;  %v2404_v17 = vpack.c.bf16 %v2402_v41, %v2401_v40  ;;  %v2481_v54 = vpack.c.bf16 %v2479_v37, %v2478_v9  ;;  %v2482_v42 = vpack.c.bf16 %v2480_v60, %v2480_v60 }
 0xd3c   :  { %v2238_v48 = vpack.c.bf16 %v2224_v14, %v2223_v32  ;;  %v2239_v29 = vpack.c.bf16 %v2226_v35, %v2225_v46  ;;  %v2240_v10 = vpack.c.bf16 %v2228_v53, %v2227_v62  ;;  %v2563_v18 = vrot.slane %v5324_v34, %v4374_v38 }
 0xd3d   :  { %4116 = vmatprep.mubr.msk.bf16.mxu0 %vm745_vm9, %v2237_v25 }
 0xd3e   :  { %4117 = vmatmul.mubr.msk.bf16.vlgmr.msra.gmra.mrb[56].mxu0 %vm745_vm9, %v2238_v48 }
 0xd3f   :  { %4120 = vmatprep.mubr.msk.bf16.mxu0 %vm745_vm9, %v2239_v29  ;;  %4125 = vmatpush3.bf16.msra.mxu0 %v5181_v26  ;;  %v2484_v26 = vsel %vm151_vm1, %v2482_v42, 0 }
 0xd40   :  { %4126 = vmatprep.subr.bf16.mxu0 %v2404_v17 }
 0xd43   :  { %4127 = vmatpush3.bf16.msra.mxu0 %v2404_v17 }
 0xd44   :  { %4136 = vmatprep.subr.bf16.mxu0 %v2481_v54 }
 0xd46   :  { %4121 = vmatmul.mubr.msk.bf16.gmra.mrb[60].mxu0 %vm745_vm9, %v2240_v10 }
 0xd47   :  { %4128 = vmatprep.mubr.msk.bf16.mxu0 %vm220_vm3, %v4575_v19  ;;  %v2693_v19 = vld [vmem:[%s5861_s0 + $0x230] sm:$0xff] }
 0xd4e   :  { %4129 = vmatmul.mubr.msk.bf16.vlgmr.msra.gmra.mrb[56].mxu0 %vm220_vm3, %v4577_v24  ;;  %v2694_v24 = vld [vmem:[%s5861_s0 + $0x238] sm:$0xff] }
 0xd4f   :  { %4132 = vmatprep.mubr.msk.bf16.mxu0 %vm220_vm3, %v4583_v30  ;;  %4137 = vmatpush3.bf16.msra.mxu0 %v2481_v54  ;;  %v2705_v30 = vpack.c.bf16 %v2694_v24, %v2693_v19 }
 0xd50   :  { %4230 = vmatprep.subr.msk.bf16.mxu0 %vm151_vm1, %v2482_v42 }
 0xd51   :  { %4148 = vmatprep.subr.bf16.mxu1 %v2705_v30 }
 0xd52   :  { %4149 = vmatpush3.bf16.msra.mxu1 %v2705_v30 }
 0xd53   :  { %4139 = vmatpush3.bf16.msra.mxu0 %v2484_v26 }
 0xd56   :  { %4133 = vmatmul.mubr.msk.bf16.gmra.mrb[60].mxu0 %vm220_vm3, %v4585_v33  ;;  %v2698_v33 = vld [vmem:[%s5861_s0 + $0x258] sm:$0xff] }
 0xd57   :  { %4140 = vmatprep.mubr.msk.bf16.mxu0 %vm574_vm12, %v4466_v61  ;;  %v2695_v61 = vld [vmem:[%s5861_s0 + $0x240] sm:$0xff] }
 0xd5e   :  { %4141 = vmatmul.mubr.msk.bf16.vlgmr.msra.gmra.mrb[56].mxu0 %vm574_vm12, %v4474_v0  ;;  %v2696_v0 = vld [vmem:[%s5861_s0 + $0x248] sm:$0xff] }
 0xd5f   :  { %4144 = vmatprep.mubr.msk.bf16.mxu0 %vm574_vm12, %v4498_v6  ;;  %v2706_v6 = vpack.c.bf16 %v2696_v0, %v2695_v61 }
 0xd61   :  { %4150 = vmatprep.subr.bf16.mxu1 %v2706_v6 }
 0xd62   :  { %4151 = vmatpush3.bf16.msra.mxu1 %v2706_v6 }
 0xd66   :  { %4145 = vmatmul.mubr.msk.bf16.gmra.mrb[60].mxu0 %vm574_vm12, %v4500_v7  ;;  %v2697_v7 = vld [vmem:[%s5861_s0 + $0x250] sm:$0xff] }
 0xd67   :  { %v2707_v1 = vpack.c.bf16 %v2698_v33, %v2697_v7 }
 0xd69   :  { %4152 = vmatprep.subr.bf16.mxu1 %v2707_v1 }
 0xd6a   :  { %4153 = vmatpush3.bf16.msra.mxu1 %v2707_v1 }
 0xd6b   :  { %4154 = vmatprep.subr.bf16.mxu1 %v2708_v31 }
 0xd6e   :  { %4155 = vmatpush3.bf16.msra.mxu1 %v2708_v31 }
 0xe31   :  { %v4142_v55 = vpop.f32.mrb[56].mxu0 }
 0xe32   :  { %v2520_v59 = vpop.f32.mrb[57].mxu0  ;;  %v5328_v12 = vadd.f32 %v4142_v55, %v2563_v18 }
 0xe33   :  { %v5330_v47 = vadd.f32 %v2563_v18, %v2520_v59  ;;  %v4143_v27 = vpop.f32.mrb[58].mxu0 }
 0xe34   :  { %v2523_v57 = vpop.f32.mrb[59].mxu0  ;;  %v5334_v52 = vadd.f32 %v4143_v27, %v2563_v18  ;;  %v2595_v4 = vmul.f32 %v5328_v12, %v5328_v12  ;;  %v2575_v63 = vsel %vm745_vm9, %v5328_v12, 0.0 }
 0xe35   :  { %v2593_v22 = vmul.f32 %v5330_v47, %v5330_v47  ;;  %v5336_v8 = vadd.f32 %v2563_v18, %v2523_v57  ;;  %v2572_v16 = vsel %vm745_vm9, %v5330_v47, 0.0 }
 0xe36   :  { %v2596_v49 = vmul.f32 %v5334_v52, %v5334_v52  ;;  %v2604_v51 = vsel %vm745_vm9, %v2595_v4, 0.0  ;;  %v2577_v5 = vsel %vm745_vm9, %v5334_v52, 0.0 }
 0xe37   :  { %v2573_v15 = vsel %vm745_vm9, %v5336_v8, 0.0  ;;  %v2594_v43 = vmul.f32 %v5336_v8, %v5336_v8  ;;  %v2601_v56 = vsel %vm745_vm9, %v2593_v22, 0.0 }
 0xe38   :  { %v2574_v20 = vadd.f32 %v2573_v15, %v2572_v16  ;;  %v2606_v41 = vsel %vm745_vm9, %v2596_v49, 0.0 }
 0xe39   :  { %v2602_v39 = vsel %vm745_vm9, %v2594_v43, 0.0  ;;  %v4146_v28 = vpop.f32.mrb[60].mxu0 }
 0xe3a   :  { %v2576_v23 = vadd.f32 %v2575_v63, %v2574_v20  ;;  %v2603_v13 = vadd.f32 %v2602_v39, %v2601_v56  ;;  %v2536_v3 = vpop.f32.mrb[61].mxu0  ;;  %v5357_v32 = vadd.f32 %v4146_v28, %v2563_v18 }
 0xe3b   :  { %v5355_v11 = vadd.f32 %v2563_v18, %v2536_v3  ;;  %v4147_v45 = vpop.f32.mrb[62].mxu0 }
 0xe3c   :  { %v2605_v50 = vadd.f32 %v2604_v51, %v2603_v13  ;;  %v2578_v35 = vadd.f32 %v2577_v5, %v2576_v23  ;;  %v2539_v40 = vpop.f32.mrb[63].mxu0  ;;  %v2571_v48 = vadd.f32 %v4147_v45, %v2563_v18  ;;  %v2599_v17 = vmul.f32 %v5357_v32, %v5357_v32 }
 0xe3d   :  { %v2579_v14 = vsel %vm745_vm9, %v5355_v11, 0.0  ;;  %v2597_v46 = vmul.f32 %v5355_v11, %v5355_v11  ;;  %v2569_v62 = vadd.f32 %v2563_v18, %v2539_v40  ;;  %v2583_v60 = vsel %vm745_vm9, %v5357_v32, 0.0 }
 0xe3e   :  { %v2580_v53 = vadd.f32 %v2579_v14, %v2578_v35  ;;  %v2607_v25 = vadd.f32 %v2606_v41, %v2605_v50  ;;  %v2600_v42 = vmul.f32 %v2571_v48, %v2571_v48  ;;  %v2585_v24 = vsel %vm745_vm9, %v2571_v48, 0.0 }
 0xe3f   :  { %v2608_v29 = vsel %vm745_vm9, %v2597_v46, 0.0  ;;  %v2581_v10 = vsel %vm745_vm9, %v2569_v62, 0.0  ;;  %v2598_v54 = vmul.f32 %v2569_v62, %v2569_v62  ;;  %v2612_v61 = vsel %vm745_vm9, %v2599_v17, 0.0 }
 0xe40   :  { %v2609_v9 = vadd.f32 %v2608_v29, %v2607_v25  ;;  %v2582_v37 = vadd.f32 %v2581_v10, %v2580_v53  ;;  %v2614_v7 = vsel %vm745_vm9, %v2600_v42, 0.0  ;;  %v2648_v50 = vrot.slane %v5324_v34, %v4436_v2 }
 0xe41   :  { %v2610_v19 = vsel %vm745_vm9, %v2598_v54, 0.0 }
 0xe42   :  { %v2584_v26 = vadd.f32 %v2583_v60, %v2582_v37  ;;  %v2611_v30 = vadd.f32 %v2610_v19, %v2609_v9 }
 0xe44   :  { %v2586_v0 = vadd.f32 %v2585_v24, %v2584_v26  ;;  %v2613_v6 = vadd.f32 %v2612_v61, %v2611_v30 }
 0xe46   :  { %v2587_v33 = vrot.slane %v2586_v0, 4  ;;  %v2615_v21 = vadd.f32 %v2614_v7, %v2613_v6 }
 0xe48   :  { %v2588_v1 = vadd.f32 %v2587_v33, %v2586_v0  ;;  %v2616_v58 = vrot.slane %v2615_v21, 4 }
 0xe4a   :  { %v2589_v31 = vrot.slane %v2588_v1, 2  ;;  %v2617_v18 = vadd.f32 %v2616_v58, %v2615_v21 }
 0xe4c   :  { %v2590_v55 = vadd.f32 %v2589_v31, %v2588_v1  ;;  %v2618_v59 = vrot.slane %v2617_v18, 2 }
 0xe4e   :  { %v2591_v27 = vrot.slane %v2590_v55, 1  ;;  %v2619_v57 = vadd.f32 %v2618_v59, %v2617_v18 }
 0xe50   :  { %v2592_v22 = vadd.f32 %v2591_v27, %v2590_v55  ;;  %v2620_v4 = vrot.slane %v2619_v57, 1 }
 0xe52   :  { %v2622_v16 = vmul.f32 0.015625, %v2592_v22  ;;  %v2621_v15 = vadd.f32 %v2620_v4, %v2619_v57 }
 0xe54   :  { %v2624_v43 = vmul.f32 %v2622_v16, %v2622_v16  ;;  %v2632_v20 = vsub.f32 %v2569_v62, %v2622_v16  ;;  %v2627_v63 = vsub.f32 %v5330_v47, %v2622_v16  ;;  %v2628_v56 = vsub.f32 %v5336_v8, %v2622_v16 }
 0xe55   :  { %v2623_v49 = vmul.f32 0.015625, %v2621_v15  ;;  %v2629_v39 = vsub.f32 %v5328_v12, %v2622_v16  ;;  %v2630_v28 = vsub.f32 %v5334_v52, %v2622_v16  ;;  %v2631_v23 = vsub.f32 %v5355_v11, %v2622_v16 }
 0xe56   :  { %v2633_v13 = vsub.f32 %v5357_v32, %v2622_v16  ;;  %v2634_v3 = vsub.f32 %v2571_v48, %v2622_v16  ;;  %v2660_v8 = vrot.slane %v5324_v34, %v4439_v44 }
 0xe57   :  { %v2625_v51 = vsub.f32 %v2623_v49, %v2624_v43  ;;  %v2912_v43 = vld [vmem:[%s5861_s0 + $0x278] sm:$0xff]  ;;  %v2915_v49 = vld [vmem:[%s5861_s0 + $0x290] sm:$0xff] }
 0xe59   :  { %v2626_v5 = vmax.f32 %v2625_v51, 0.0 }
 0xe5b   :  { %v2635_v45 = vadd.f32 1e-05, %v2626_v5 }
 0xe5d   :  { %4249 = vrsqrt.f32 %v2635_v45 }
 0xe67   :  { %v4250_v47 = vpop.eup %4249 }
 0xe68   :  { %v2642_v35 = vmul.f32 %v4250_v47, %v2632_v20  ;;  %v2637_v12 = vmul.f32 %v4250_v47, %v2627_v63  ;;  %v2638_v40 = vmul.f32 %v4250_v47, %v2628_v56  ;;  %v2639_v52 = vmul.f32 %v4250_v47, %v2629_v39  ;;  %v2913_v20 = vld [vmem:[%s5861_s0 + $0x280] sm:$0xff]  ;;  %v2914_v63 = vld [vmem:[%s5861_s0 + $0x288] sm:$0xff] }
 0xe69   :  { %v2640_v41 = vmul.f32 %v4250_v47, %v2630_v28  ;;  %v2641_v11 = vmul.f32 %v4250_v47, %v2631_v23  ;;  %v2643_v14 = vmul.f32 %v4250_v47, %v2633_v13  ;;  %v2644_v32 = vmul.f32 %v4250_v47, %v2634_v3  ;;  %v5403_v28 = vld [vmem:[%s5861_s0 + $0x270] sm:$0xf] }
 0xe6a   :  { %v2654_v46 = vmul.f32 %v2648_v50, %v2642_v35  ;;  %v2649_v62 = vmul.f32 %v2648_v50, %v2637_v12  ;;  %v2650_v53 = vmul.f32 %v2648_v50, %v2638_v40  ;;  %v2651_v25 = vmul.f32 %v2648_v50, %v2639_v52 }
 0xe6b   :  { %v2652_v48 = vmul.f32 %v2648_v50, %v2640_v41  ;;  %v2653_v29 = vmul.f32 %v2648_v50, %v2641_v11  ;;  %v2655_v10 = vmul.f32 %v2648_v50, %v2643_v14  ;;  %v2656_v17 = vmul.f32 %v2648_v50, %v2644_v32 }
 0xe6c   :  { %v2666_v9 = vadd.f32 %v2660_v8, %v2654_v46  ;;  %v2661_v37 = vadd.f32 %v2660_v8, %v2649_v62  ;;  %v2662_v54 = vadd.f32 %v2660_v8, %v2650_v53  ;;  %v2663_v34 = vadd.f32 %v2660_v8, %v2651_v25 }
 0xe6d   :  { %v2664_v60 = vadd.f32 %v2660_v8, %v2652_v48  ;;  %v2665_v42 = vadd.f32 %v2660_v8, %v2653_v29  ;;  %v2667_v26 = vadd.f32 %v2660_v8, %v2655_v10  ;;  %v2668_v19 = vadd.f32 %v2660_v8, %v2656_v17 }
 0xe6e   :  { %vm2669_vm12 = vcmp.gt.f32.partialorder %v2661_v37, 0.0  ;;  %vm2670_vm5 = vcmp.gt.f32.partialorder %v2662_v54, 0.0  ;;  %v2677_v24 = vmul.f32 0.2, %v2661_v37  ;;  %v2678_v30 = vmul.f32 0.2, %v2662_v54 }
 0xe6f   :  { %vm2671_vm6 = vcmp.gt.f32.partialorder %v2663_v34, 0.0  ;;  %vm2672_vm7 = vcmp.gt.f32.partialorder %v2664_v60, 0.0  ;;  %v2679_v61 = vmul.f32 0.2, %v2663_v34  ;;  %v2680_v0 = vmul.f32 0.2, %v2664_v60 }
 0xe70   :  { %v2685_v6 = vsel %vm2669_vm12, %v2661_v37, %v2677_v24  ;;  %v2686_v7 = vsel %vm2670_vm5, %v2662_v54, %v2678_v30  ;;  %vm2673_vm8 = vcmp.gt.f32.partialorder %v2665_v42, 0.0  ;;  %vm2674_vm10 = vcmp.gt.f32.partialorder %v2666_v9, 0.0 }
 0xe71   :  { %v2701_v33 = vpack.c.bf16 %v2686_v7, %v2685_v6  ;;  %v2687_v21 = vsel %vm2671_vm6, %v2663_v34, %v2679_v61  ;;  %v2688_v1 = vsel %vm2672_vm7, %v2664_v60, %v2680_v0  ;;  %v2681_v58 = vmul.f32 0.2, %v2665_v42 }
 0xe72   :  { %v2702_v31 = vpack.c.bf16 %v2688_v1, %v2687_v21  ;;  %v2682_v18 = vmul.f32 0.2, %v2666_v9  ;;  %vm2675_vm11 = vcmp.gt.f32.partialorder %v2667_v26, 0.0  ;;  %vm2676_vm13 = vcmp.gt.f32.partialorder %v2668_v19, 0.0 }
 0xe73   :  { %4156 = vmatprep.mubr.msk.bf16.mxu1 %vm745_vm9, %v2701_v33  ;;  %v2689_v55 = vsel %vm2673_vm8, %v2665_v42, %v2681_v58  ;;  %v2683_v59 = vmul.f32 0.2, %v2667_v26  ;;  %v2684_v27 = vmul.f32 0.2, %v2668_v19  ;;  %v2920_v56 = vpack.c.bf16 %v2913_v20, %v2912_v43 }
 0xe74   :  { %4157 = vmatmul.mubr.msk.bf16.vlgmr.msra.gmra.mrb[48].mxu1 %vm745_vm9, %v2702_v31  ;;  %v2690_v57 = vsel %vm2674_vm10, %v2666_v9, %v2682_v18  ;;  %v2921_v39 = vpack.c.bf16 %v2915_v49, %v2914_v63  ;;  %v2713_v23 = vrot.slane %v5403_v28, %v4374_v38 }
 0xe75   :  { %v2703_v22 = vpack.c.bf16 %v2690_v57, %v2689_v55  ;;  %v2691_v4 = vsel %vm2675_vm11, %v2667_v26, %v2683_v59  ;;  %v2692_v16 = vsel %vm2676_vm13, %v2668_v19, %v2684_v27  ;;  %4164 = vmatprep.subr.bf16.mxu1 %v2920_v56 }
 0xe76   :  { %v2704_v15 = vpack.c.bf16 %v2692_v16, %v2691_v4  ;;  %4165 = vmatpush3.bf16.msra.mxu1 %v2920_v56 }
 0xe77   :  { %4160 = vmatprep.mubr.msk.bf16.mxu1 %vm745_vm9, %v2703_v22  ;;  %4166 = vmatprep.subr.bf16.mxu1 %v2921_v39 }
 0xe7a   :  { %4167 = vmatpush3.bf16.msra.mxu1 %v2921_v39 }
 0xe7c   :  { %4161 = vmatmul.mubr.msk.bf16.gmra.mrb[52].mxu1 %vm745_vm9, %v2704_v15 }
 0xf47   :  { %v4158_v13 = vpop.f32.mrb[48].mxu1 }
 0xf48   :  { %v2760_v3 = vpop.f32.mrb[49].mxu1  ;;  %v5407_v51 = vadd.f32 %v4158_v13, %v2713_v23 }
 0xf49   :  { %v5409_v5 = vadd.f32 %v2760_v3, %v2713_v23  ;;  %v4159_v45 = vpop.f32.mrb[50].mxu1 }
 0xf4a   :  { %v2763_v50 = vpop.f32.mrb[51].mxu1  ;;  %v5413_v8 = vadd.f32 %v4159_v45, %v2713_v23  ;;  %v2814_v12 = vmul.f32 %v5407_v51, %v5407_v51  ;;  %v2794_v14 = vsel %vm220_vm3, %v5407_v51, 0.0 }
 0xf4b   :  { %v2812_v47 = vmul.f32 %v5409_v5, %v5409_v5  ;;  %v5415_v35 = vadd.f32 %v2763_v50, %v2713_v23  ;;  %v2791_v40 = vsel %vm220_vm3, %v5409_v5, 0.0 }
 0xf4c   :  { %v2815_v46 = vmul.f32 %v5413_v8, %v5413_v8  ;;  %v2823_v10 = vsel %vm220_vm3, %v2814_v12, 0.0  ;;  %v2796_v17 = vsel %vm220_vm3, %v5413_v8, 0.0 }
 0xf4d   :  { %v2792_v52 = vsel %vm220_vm3, %v5415_v35, 0.0  ;;  %v2813_v41 = vmul.f32 %v5415_v35, %v5415_v35  ;;  %v2820_v32 = vsel %vm220_vm3, %v2812_v47, 0.0 }
 0xf4e   :  { %v2793_v11 = vadd.f32 %v2792_v52, %v2791_v40  ;;  %v2825_v26 = vsel %vm220_vm3, %v2815_v46, 0.0 }
 0xf4f   :  { %v2821_v62 = vsel %vm220_vm3, %v2813_v41, 0.0  ;;  %v4162_v53 = vpop.f32.mrb[52].mxu1 }
 0xf50   :  { %v2795_v25 = vadd.f32 %v2794_v14, %v2793_v11  ;;  %v2822_v48 = vadd.f32 %v2821_v62, %v2820_v32  ;;  %v2776_v29 = vpop.f32.mrb[53].mxu1  ;;  %v5436_v34 = vadd.f32 %v4162_v53, %v2713_v23 }
 0xf51   :  { %v5434_v9 = vadd.f32 %v2776_v29, %v2713_v23  ;;  %v4163_v37 = vpop.f32.mrb[54].mxu1 }
 0xf52   :  { %v2824_v54 = vadd.f32 %v2823_v10, %v2822_v48  ;;  %v2797_v60 = vadd.f32 %v2796_v17, %v2795_v25  ;;  %v2779_v42 = vpop.f32.mrb[55].mxu1  ;;  %v2788_v6 = vadd.f32 %v4163_v37, %v2713_v23  ;;  %v2818_v21 = vmul.f32 %v5436_v34, %v5436_v34 }
 0xf53   :  { %v2798_v19 = vsel %vm220_vm3, %v5434_v9, 0.0  ;;  %v2816_v24 = vmul.f32 %v5434_v9, %v5434_v9  ;;  %v2780_v30 = vadd.f32 %v2779_v42, %v2713_v23  ;;  %v2802_v18 = vsel %vm220_vm3, %v5436_v34, 0.0 }
 0xf54   :  { %v2799_v61 = vadd.f32 %v2798_v19, %v2797_v60  ;;  %v2826_v0 = vadd.f32 %v2825_v26, %v2824_v54  ;;  %v2819_v55 = vmul.f32 %v2788_v6, %v2788_v6  ;;  %v2804_v57 = vsel %vm220_vm3, %v2788_v6, 0.0 }
 0xf55   :  { %v2827_v7 = vsel %vm220_vm3, %v2816_v24, 0.0  ;;  %v2800_v33 = vsel %vm220_vm3, %v2780_v30, 0.0  ;;  %v2817_v31 = vmul.f32 %v2780_v30, %v2780_v30  ;;  %v2831_v4 = vsel %vm220_vm3, %v2818_v21, 0.0 }
 0xf56   :  { %v2828_v1 = vadd.f32 %v2827_v7, %v2826_v0  ;;  %v2801_v58 = vadd.f32 %v2800_v33, %v2799_v61  ;;  %v2833_v43 = vsel %vm220_vm3, %v2819_v55, 0.0  ;;  %v2867_v54 = vrot.slane %v5403_v28, %v4436_v2 }
 0xf57   :  { %v2829_v27 = vsel %vm220_vm3, %v2817_v31, 0.0 }
 0xf58   :  { %v2803_v59 = vadd.f32 %v2802_v18, %v2801_v58  ;;  %v2830_v22 = vadd.f32 %v2829_v27, %v2828_v1 }
 0xf5a   :  { %v2805_v16 = vadd.f32 %v2804_v57, %v2803_v59  ;;  %v2832_v15 = vadd.f32 %v2831_v4, %v2830_v22 }
 0xf5c   :  { %v2806_v20 = vrot.slane %v2805_v16, 4  ;;  %v2834_v63 = vadd.f32 %v2833_v43, %v2832_v15 }
 0xf5e   :  { %v2807_v56 = vadd.f32 %v2806_v20, %v2805_v16  ;;  %v2835_v49 = vrot.slane %v2834_v63, 4 }
 0xf60   :  { %v2808_v39 = vrot.slane %v2807_v56, 2  ;;  %v2836_v23 = vadd.f32 %v2835_v49, %v2834_v63 }
 0xf62   :  { %v2809_v13 = vadd.f32 %v2808_v39, %v2807_v56  ;;  %v2837_v3 = vrot.slane %v2836_v23, 2 }
 0xf64   :  { %v2810_v45 = vrot.slane %v2809_v13, 1  ;;  %v2838_v50 = vadd.f32 %v2837_v3, %v2836_v23 }
 0xf66   :  { %v2811_v47 = vadd.f32 %v2810_v45, %v2809_v13  ;;  %v2839_v12 = vrot.slane %v2838_v50, 1 }
 0xf68   :  { %v2841_v40 = vmul.f32 0.015625, %v2811_v47  ;;  %v2840_v52 = vadd.f32 %v2839_v12, %v2838_v50 }
 0xf6a   :  { %v2843_v41 = vmul.f32 %v2841_v40, %v2841_v40  ;;  %v2851_v11 = vsub.f32 %v2780_v30, %v2841_v40  ;;  %v2846_v14 = vsub.f32 %v5409_v5, %v2841_v40  ;;  %v2847_v32 = vsub.f32 %v5415_v35, %v2841_v40 }
 0xf6b   :  { %v2842_v46 = vmul.f32 0.015625, %v2840_v52  ;;  %v2848_v62 = vsub.f32 %v5407_v51, %v2841_v40  ;;  %v2849_v53 = vsub.f32 %v5413_v8, %v2841_v40  ;;  %v2850_v25 = vsub.f32 %v5434_v9, %v2841_v40 }
 0xf6c   :  { %v2852_v48 = vsub.f32 %v5436_v34, %v2841_v40  ;;  %v2853_v29 = vsub.f32 %v2788_v6, %v2841_v40  ;;  %v2879_v35 = vrot.slane %v5403_v28, %v4439_v44 }
 0xf6d   :  { %v2844_v10 = vsub.f32 %v2842_v46, %v2843_v41  ;;  %v3125_v41 = vld [vmem:[%s5861_s0 + $0x2a0] sm:$0xff] }
 0xf6f   :  { %v2845_v17 = vmax.f32 %v2844_v10, 0.0 }
 0xf71   :  { %v2854_v37 = vadd.f32 1e-05, %v2845_v17 }
 0xf73   :  { %4251 = vrsqrt.f32 %v2854_v37 }
 0xf7d   :  { %v4252_v5 = vpop.eup %4251 }
 0xf7e   :  { %v2861_v60 = vmul.f32 %v4252_v5, %v2851_v11  ;;  %v2856_v51 = vmul.f32 %v4252_v5, %v2846_v14  ;;  %v2857_v42 = vmul.f32 %v4252_v5, %v2847_v32  ;;  %v2858_v8 = vmul.f32 %v4252_v5, %v2848_v62  ;;  %v3126_v11 = vld [vmem:[%s5861_s0 + $0x2a8] sm:$0xff]  ;;  %v5476_v32 = vld [vmem:[%s5861_s0 + $0x298] sm:$0xf] }
 0xf7f   :  { %v2859_v26 = vmul.f32 %v4252_v5, %v2849_v53  ;;  %v2860_v9 = vmul.f32 %v4252_v5, %v2850_v25  ;;  %v2862_v19 = vmul.f32 %v4252_v5, %v2852_v48  ;;  %v2863_v34 = vmul.f32 %v4252_v5, %v2853_v29 }
 0xf80   :  { %v2873_v24 = vmul.f32 %v2867_v54, %v2861_v60  ;;  %v2868_v30 = vmul.f32 %v2867_v54, %v2856_v51  ;;  %v2869_v61 = vmul.f32 %v2867_v54, %v2857_v42  ;;  %v2870_v0 = vmul.f32 %v2867_v54, %v2858_v8 }
 0xf81   :  { %v2871_v6 = vmul.f32 %v2867_v54, %v2859_v26  ;;  %v2872_v7 = vmul.f32 %v2867_v54, %v2860_v9  ;;  %v2874_v33 = vmul.f32 %v2867_v54, %v2862_v19  ;;  %v2875_v21 = vmul.f32 %v2867_v54, %v2863_v34 }
 0xf82   :  { %v2885_v1 = vadd.f32 %v2879_v35, %v2873_v24  ;;  %v2880_v58 = vadd.f32 %v2879_v35, %v2868_v30  ;;  %v2881_v31 = vadd.f32 %v2879_v35, %v2869_v61  ;;  %v2882_v28 = vadd.f32 %v2879_v35, %v2870_v0 }
 0xf83   :  { %v2883_v18 = vadd.f32 %v2879_v35, %v2871_v6  ;;  %v2884_v55 = vadd.f32 %v2879_v35, %v2872_v7  ;;  %v2886_v59 = vadd.f32 %v2879_v35, %v2874_v33  ;;  %v2887_v27 = vadd.f32 %v2879_v35, %v2875_v21 }
 0xf84   :  { %vm2888_vm9 = vcmp.gt.f32.partialorder %v2880_v58, 0.0  ;;  %vm2889_vm14 = vcmp.gt.f32.partialorder %v2881_v31, 0.0  ;;  %v2896_v57 = vmul.f32 0.2, %v2880_v58  ;;  %v2897_v22 = vmul.f32 0.2, %v2881_v31 }
 0xf85   :  { %vm2890_vm15 = vcmp.gt.f32.partialorder %v2882_v28, 0.0  ;;  %vm2891_vm4 = vcmp.gt.f32.partialorder %v2883_v18, 0.0  ;;  %v2898_v4 = vmul.f32 0.2, %v2882_v28  ;;  %v2899_v16 = vmul.f32 0.2, %v2883_v18 }
 0xf86   :  { %v2904_v15 = vsel %vm2888_vm9, %v2880_v58, %v2896_v57  ;;  %v2905_v43 = vsel %vm2889_vm14, %v2881_v31, %v2897_v22  ;;  %vm2892_vm12 = vcmp.gt.f32.partialorder %v2884_v55, 0.0  ;;  %vm2893_vm5 = vcmp.gt.f32.partialorder %v2885_v1, 0.0 }
 0xf87   :  { %v2916_v20 = vpack.c.bf16 %v2905_v43, %v2904_v15  ;;  %v2906_v63 = vsel %vm2890_vm15, %v2882_v28, %v2898_v4  ;;  %v2907_v56 = vsel %vm2891_vm4, %v2883_v18, %v2899_v16  ;;  %v2900_v49 = vmul.f32 0.2, %v2884_v55 }
 0xf88   :  { %v2917_v39 = vpack.c.bf16 %v2907_v56, %v2906_v63  ;;  %v2901_v23 = vmul.f32 0.2, %v2885_v1  ;;  %vm2894_vm6 = vcmp.gt.f32.partialorder %v2886_v59, 0.0  ;;  %vm2895_vm7 = vcmp.gt.f32.partialorder %v2887_v27, 0.0 }
 0xf89   :  { %4168 = vmatprep.mubr.msk.bf16.mxu1 %vm220_vm3, %v2916_v20  ;;  %v2908_v13 = vsel %vm2892_vm12, %v2884_v55, %v2900_v49  ;;  %v2902_v3 = vmul.f32 0.2, %v2886_v59  ;;  %v2903_v45 = vmul.f32 0.2, %v2887_v27  ;;  %v3131_v14 = vpack.c.bf16 %v3126_v11, %v3125_v41 }
 0xf8a   :  { %4169 = vmatmul.mubr.msk.bf16.vlgmr.msra.gmra.mrb[56].mxu1 %vm220_vm3, %v2917_v39  ;;  %v2909_v50 = vsel %vm2893_vm5, %v2885_v1, %v2901_v23  ;;  %v2926_v46 = vrot.slane %v5476_v32, %v4374_v38 }
 0xf8b   :  { %v2918_v47 = vpack.c.bf16 %v2909_v50, %v2908_v13  ;;  %v2910_v12 = vsel %vm2894_vm6, %v2886_v59, %v2902_v3  ;;  %v2911_v40 = vsel %vm2895_vm7, %v2887_v27, %v2903_v45  ;;  %4176 = vmatprep.subr.bf16.mxu1 %v3131_v14 }
 0xf8c   :  { %v2919_v52 = vpack.c.bf16 %v2911_v40, %v2910_v12  ;;  %4177 = vmatpush3.bf16.msra.mxu1 %v3131_v14 }
 0xf8d   :  { %4172 = vmatprep.mubr.msk.bf16.mxu1 %vm220_vm3, %v2918_v47 }
 0xf92   :  { %4173 = vmatmul.mubr.msk.bf16.gmra.mrb[60].mxu1 %vm220_vm3, %v2919_v52 }
0x105d   :  { %v4170_v62 = vpop.f32.mrb[56].mxu1 }
0x105e   :  { %v2973_v53 = vpop.f32.mrb[57].mxu1  ;;  %v5480_v25 = vadd.f32 %v4170_v62, %v2926_v46 }
0x105f   :  { %v5482_v48 = vadd.f32 %v2973_v53, %v2926_v46  ;;  %v4171_v29 = vpop.f32.mrb[58].mxu1 }
0x1060   :  { %v2976_v10 = vpop.f32.mrb[59].mxu1  ;;  %v5486_v37 = vadd.f32 %v4171_v29, %v2926_v46  ;;  %v3027_v5 = vmul.f32 %v5480_v25, %v5480_v25  ;;  %v3007_v8 = vsel %vm49_vm0, %v5480_v25, 0.0 }
0x1061   :  { %v3025_v17 = vmul.f32 %v5482_v48, %v5482_v48  ;;  %v5488_v54 = vadd.f32 %v2976_v10, %v2926_v46  ;;  %v3004_v35 = vsel %vm49_vm0, %v5482_v48, 0.0 }
0x1062   :  { %v3028_v9 = vmul.f32 %v5486_v37, %v5486_v37  ;;  %v3036_v0 = vsel %vm49_vm0, %v3027_v5, 0.0  ;;  %v3009_v6 = vsel %vm49_vm0, %v5486_v37, 0.0 }
0x1063   :  { %v3005_v60 = vsel %vm49_vm0, %v5488_v54, 0.0  ;;  %v3026_v51 = vmul.f32 %v5488_v54, %v5488_v54  ;;  %v3033_v26 = vsel %vm49_vm0, %v3025_v17, 0.0 }
0x1064   :  { %v3006_v42 = vadd.f32 %v3005_v60, %v3004_v35  ;;  %v3038_v28 = vsel %vm49_vm0, %v3028_v9, 0.0 }
0x1065   :  { %v3034_v19 = vsel %vm49_vm0, %v3026_v51, 0.0  ;;  %v4174_v34 = vpop.f32.mrb[60].mxu1 }
0x1066   :  { %v3008_v24 = vadd.f32 %v3007_v8, %v3006_v42  ;;  %v3035_v30 = vadd.f32 %v3034_v19, %v3033_v26  ;;  %v2989_v61 = vpop.f32.mrb[61].mxu1  ;;  %v5509_v1 = vadd.f32 %v4174_v34, %v2926_v46 }
0x1067   :  { %v5507_v7 = vadd.f32 %v2989_v61, %v2926_v46  ;;  %v4175_v33 = vpop.f32.mrb[62].mxu1 }
0x1068   :  { %v3037_v21 = vadd.f32 %v3036_v0, %v3035_v30  ;;  %v3010_v58 = vadd.f32 %v3009_v6, %v3008_v24  ;;  %v2992_v31 = vpop.f32.mrb[63].mxu1  ;;  %v3001_v22 = vadd.f32 %v4175_v33, %v2926_v46  ;;  %v3031_v15 = vmul.f32 %v5509_v1, %v5509_v1 }
0x1069   :  { %v3011_v18 = vsel %vm49_vm0, %v5507_v7, 0.0  ;;  %v3029_v55 = vmul.f32 %v5507_v7, %v5507_v7  ;;  %v2993_v59 = vadd.f32 %v2992_v31, %v2926_v46  ;;  %v3015_v56 = vsel %vm49_vm0, %v5509_v1, 0.0 }
0x106a   :  { %v3012_v27 = vadd.f32 %v3011_v18, %v3010_v58  ;;  %v3039_v57 = vadd.f32 %v3038_v28, %v3037_v21  ;;  %v3032_v49 = vmul.f32 %v3001_v22, %v3001_v22  ;;  %v3017_v13 = vsel %vm49_vm0, %v3001_v22, 0.0 }
0x106b   :  { %v3040_v4 = vsel %vm49_vm0, %v3029_v55, 0.0  ;;  %v3013_v16 = vsel %vm49_vm0, %v2993_v59, 0.0  ;;  %v3030_v63 = vmul.f32 %v2993_v59, %v2993_v59  ;;  %v3044_v45 = vsel %vm49_vm0, %v3031_v15, 0.0 }
0x106c   :  { %v3041_v43 = vadd.f32 %v3040_v4, %v3039_v57  ;;  %v3014_v20 = vadd.f32 %v3013_v16, %v3012_v27  ;;  %v3046_v12 = vsel %vm49_vm0, %v3032_v49, 0.0  ;;  %v3080_v21 = vrot.slane %v5476_v32, %v4436_v2 }
0x106d   :  { %v3042_v23 = vsel %vm49_vm0, %v3030_v63, 0.0 }
0x106e   :  { %v3016_v39 = vadd.f32 %v3015_v56, %v3014_v20  ;;  %v3043_v3 = vadd.f32 %v3042_v23, %v3041_v43 }
0x1070   :  { %v3018_v50 = vadd.f32 %v3017_v13, %v3016_v39  ;;  %v3045_v47 = vadd.f32 %v3044_v45, %v3043_v3 }
0x1072   :  { %v3019_v40 = vrot.slane %v3018_v50, 4  ;;  %v3047_v52 = vadd.f32 %v3046_v12, %v3045_v47 }
0x1074   :  { %v3020_v41 = vadd.f32 %v3019_v40, %v3018_v50  ;;  %v3048_v11 = vrot.slane %v3047_v52, 4 }
0x1076   :  { %v3021_v14 = vrot.slane %v3020_v41, 2  ;;  %v3049_v46 = vadd.f32 %v3048_v11, %v3047_v52 }
0x1078   :  { %v3022_v62 = vadd.f32 %v3021_v14, %v3020_v41  ;;  %v3050_v53 = vrot.slane %v3049_v46, 2 }
0x107a   :  { %v3023_v29 = vrot.slane %v3022_v62, 1  ;;  %v3051_v10 = vadd.f32 %v3050_v53, %v3049_v46 }
0x107c   :  { %v3024_v17 = vadd.f32 %v3023_v29, %v3022_v62  ;;  %v3052_v5 = vrot.slane %v3051_v10, 1 }
0x107e   :  { %v3054_v35 = vmul.f32 0.015625, %v3024_v17  ;;  %v3053_v60 = vadd.f32 %v3052_v5, %v3051_v10 }
0x1080   :  { %v3056_v51 = vmul.f32 %v3054_v35, %v3054_v35  ;;  %v3064_v42 = vsub.f32 %v2993_v59, %v3054_v35  ;;  %v3059_v8 = vsub.f32 %v5482_v48, %v3054_v35  ;;  %v3060_v26 = vsub.f32 %v5488_v54, %v3054_v35 }
0x1081   :  { %v3055_v9 = vmul.f32 0.015625, %v3053_v60  ;;  %v3061_v19 = vsub.f32 %v5480_v25, %v3054_v35  ;;  %v3062_v34 = vsub.f32 %v5486_v37, %v3054_v35  ;;  %v3063_v24 = vsub.f32 %v5507_v7, %v3054_v35 }
0x1082   :  { %v3065_v30 = vsub.f32 %v5509_v1, %v3054_v35  ;;  %v3066_v61 = vsub.f32 %v3001_v22, %v3054_v35  ;;  %v3092_v54 = vrot.slane %v5476_v32, %v4439_v44 }
0x1083   :  { %v3057_v0 = vsub.f32 %v3055_v9, %v3056_v51  ;;  %v3335_v51 = vld [vmem:[%s5861_s0 + $0x2b8] sm:$0xff] }
0x1085   :  { %v3058_v6 = vmax.f32 %v3057_v0, 0.0 }
0x1087   :  { %v3067_v33 = vadd.f32 1e-05, %v3058_v6 }
0x1089   :  { %4253 = vrsqrt.f32 %v3067_v33 }
0x1093   :  { %v4254_v48 = vpop.eup %4253 }
0x1094   :  { %v3074_v58 = vmul.f32 %v4254_v48, %v3064_v42  ;;  %v3069_v25 = vmul.f32 %v4254_v48, %v3059_v8  ;;  %v3070_v31 = vmul.f32 %v4254_v48, %v3060_v26  ;;  %v3071_v37 = vmul.f32 %v4254_v48, %v3061_v19  ;;  %v5548_v26 = vld [vmem:[%s5861_s0 + $0x2b0] sm:$0xf] }
0x1095   :  { %v3072_v28 = vmul.f32 %v4254_v48, %v3062_v34  ;;  %v3073_v7 = vmul.f32 %v4254_v48, %v3063_v24  ;;  %v3075_v18 = vmul.f32 %v4254_v48, %v3065_v30  ;;  %v3076_v1 = vmul.f32 %v4254_v48, %v3066_v61 }
0x1096   :  { %v3086_v55 = vmul.f32 %v3080_v21, %v3074_v58  ;;  %v3081_v59 = vmul.f32 %v3080_v21, %v3069_v25  ;;  %v3082_v27 = vmul.f32 %v3080_v21, %v3070_v31  ;;  %v3083_v57 = vmul.f32 %v3080_v21, %v3071_v37 }
0x1097   :  { %v3084_v22 = vmul.f32 %v3080_v21, %v3072_v28  ;;  %v3085_v4 = vmul.f32 %v3080_v21, %v3073_v7  ;;  %v3087_v16 = vmul.f32 %v3080_v21, %v3075_v18  ;;  %v3088_v15 = vmul.f32 %v3080_v21, %v3076_v1 }
0x1098   :  { %v3098_v43 = vadd.f32 %v3092_v54, %v3086_v55  ;;  %v3093_v20 = vadd.f32 %v3092_v54, %v3081_v59  ;;  %v3094_v63 = vadd.f32 %v3092_v54, %v3082_v27  ;;  %v3095_v32 = vadd.f32 %v3092_v54, %v3083_v57 }
0x1099   :  { %v3096_v56 = vadd.f32 %v3092_v54, %v3084_v22  ;;  %v3097_v49 = vadd.f32 %v3092_v54, %v3085_v4  ;;  %v3099_v39 = vadd.f32 %v3092_v54, %v3087_v16  ;;  %v3100_v23 = vadd.f32 %v3092_v54, %v3088_v15 }
0x109a   :  { %vm3101_vm3 = vcmp.gt.f32.partialorder %v3093_v20, 0.0  ;;  %vm3102_vm8 = vcmp.gt.f32.partialorder %v3094_v63, 0.0  ;;  %v3109_v13 = vmul.f32 0.2, %v3093_v20  ;;  %v3110_v3 = vmul.f32 0.2, %v3094_v63 }
0x109b   :  { %vm3103_vm10 = vcmp.gt.f32.partialorder %v3095_v32, 0.0  ;;  %vm3104_vm11 = vcmp.gt.f32.partialorder %v3096_v56, 0.0  ;;  %v3111_v45 = vmul.f32 0.2, %v3095_v32  ;;  %v3112_v50 = vmul.f32 0.2, %v3096_v56 }
0x109c   :  { %v3117_v47 = vsel %vm3101_vm3, %v3093_v20, %v3109_v13  ;;  %v3118_v12 = vsel %vm3102_vm8, %v3094_v63, %v3110_v3  ;;  %vm3105_vm13 = vcmp.gt.f32.partialorder %v3097_v49, 0.0  ;;  %vm3106_vm9 = vcmp.gt.f32.partialorder %v3098_v43, 0.0 }
0x109d   :  { %v3127_v40 = vpack.c.bf16 %v3118_v12, %v3117_v47  ;;  %v3119_v52 = vsel %vm3103_vm10, %v3095_v32, %v3111_v45  ;;  %v3120_v41 = vsel %vm3104_vm11, %v3096_v56, %v3112_v50  ;;  %v3113_v11 = vmul.f32 0.2, %v3097_v49 }
0x109e   :  { %v3128_v14 = vpack.c.bf16 %v3120_v41, %v3119_v52  ;;  %v3114_v46 = vmul.f32 0.2, %v3098_v43  ;;  %vm3107_vm14 = vcmp.gt.f32.partialorder %v3099_v39, 0.0  ;;  %vm3108_vm15 = vcmp.gt.f32.partialorder %v3100_v23, 0.0 }
0x109f   :  { %4178 = vmatprep.mubr.msk.bf16.mxu1 %vm49_vm0, %v3127_v40  ;;  %v3121_v62 = vsel %vm3105_vm13, %v3097_v49, %v3113_v11  ;;  %v3115_v53 = vmul.f32 0.2, %v3099_v39  ;;  %v3116_v29 = vmul.f32 0.2, %v3100_v23  ;;  %v3340_v42 = vpack.c.bf16 %v3335_v51, %v3335_v51 }
0x10a0   :  { %4179 = vmatmul.mubr.msk.bf16.vlgmr.msra.gmra.mrb[64].mxu1 %vm49_vm0, %v3128_v14  ;;  %v3122_v10 = vsel %vm3106_vm9, %v3098_v43, %v3114_v46  ;;  %v3136_v9 = vrot.slane %v5548_v26, %v4374_v38 }
0x10a1   :  { %v3129_v17 = vpack.c.bf16 %v3122_v10, %v3121_v62  ;;  %v3123_v5 = vsel %vm3107_vm14, %v3099_v39, %v3115_v53  ;;  %v3124_v35 = vsel %vm3108_vm15, %v3100_v23, %v3116_v29  ;;  %4231 = vmatprep.subr.msk.bf16.mxu1 %vm151_vm1, %v3340_v42  ;;  %v3359_v8 = vsel %vm151_vm1, %v3340_v42, 0 }
0x10a2   :  { %v3130_v60 = vpack.c.bf16 %v3124_v35, %v3123_v5  ;;  %4187 = vmatpush3.bf16.msra.mxu1 %v3359_v8 }
0x10a3   :  { %4182 = vmatprep.mubr.msk.bf16.mxu1 %vm49_vm0, %v3129_v17 }
0x10a8   :  { %4183 = vmatmul.mubr.msk.bf16.gmra.mrb[68].mxu1 %vm49_vm0, %v3130_v60 }
0x1173   :  { %v4180_v19 = vpop.f32.mrb[64].mxu1 }
0x1174   :  { %v3183_v34 = vpop.f32.mrb[65].mxu1  ;;  %v5552_v24 = vadd.f32 %v4180_v19, %v3136_v9 }
0x1175   :  { %v5554_v30 = vadd.f32 %v3183_v34, %v3136_v9  ;;  %v4181_v61 = vpop.f32.mrb[66].mxu1 }
0x1176   :  { %v3186_v0 = vpop.f32.mrb[67].mxu1  ;;  %v5558_v33 = vadd.f32 %v4181_v61, %v3136_v9  ;;  %v3237_v48 = vmul.f32 %v5552_v24, %v5552_v24  ;;  %v3217_v31 = vsel %vm138_vm2, %v5552_v24, 0.0 }
0x1177   :  { %v3235_v6 = vmul.f32 %v5554_v30, %v5554_v30  ;;  %v5560_v21 = vadd.f32 %v3186_v0, %v3136_v9  ;;  %v3214_v38 = vsel %vm138_vm2, %v5554_v30, 0.0 }
0x1178   :  { %v3238_v28 = vmul.f32 %v5558_v33, %v5558_v33  ;;  %v3246_v27 = vsel %vm138_vm2, %v3237_v48, 0.0  ;;  %v3219_v57 = vsel %vm138_vm2, %v5558_v33, 0.0 }
0x1179   :  { %v3215_v54 = vsel %vm138_vm2, %v5560_v21, 0.0  ;;  %v3236_v58 = vmul.f32 %v5560_v21, %v5560_v21  ;;  %v3243_v37 = vsel %vm138_vm2, %v3235_v6, 0.0 }
0x117a   :  { %v3216_v25 = vadd.f32 %v3215_v54, %v3214_v38  ;;  %v3248_v63 = vsel %vm138_vm2, %v3238_v28, 0.0 }
0x117b   :  { %v3244_v7 = vsel %vm138_vm2, %v3236_v58, 0.0  ;;  %v4184_v18 = vpop.f32.mrb[68].mxu1 }
0x117c   :  { %v3218_v1 = vadd.f32 %v3217_v31, %v3216_v25  ;;  %v3245_v55 = vadd.f32 %v3244_v7, %v3243_v37  ;;  %v3199_v59 = vpop.f32.mrb[69].mxu1  ;;  %v5581_v15 = vadd.f32 %v4184_v18, %v3136_v9 }
0x117d   :  { %v5579_v22 = vadd.f32 %v3199_v59, %v3136_v9  ;;  %v4185_v4 = vpop.f32.mrb[70].mxu1 }
0x117e   :  { %v3247_v16 = vadd.f32 %v3246_v27, %v3245_v55  ;;  %v3220_v43 = vadd.f32 %v3219_v57, %v3218_v1  ;;  %v3202_v20 = vpop.f32.mrb[71].mxu1  ;;  %v3211_v13 = vadd.f32 %v4185_v4, %v3136_v9  ;;  %v3241_v50 = vmul.f32 %v5581_v15, %v5581_v15 }
0x117f   :  { %v3221_v32 = vsel %vm138_vm2, %v5579_v22, 0.0  ;;  %v3239_v56 = vmul.f32 %v5579_v22, %v5579_v22  ;;  %v3203_v49 = vadd.f32 %v3202_v20, %v3136_v9  ;;  %v3225_v52 = vsel %vm138_vm2, %v5581_v15, 0.0 }
0x1180   :  { %v3222_v39 = vadd.f32 %v3221_v32, %v3220_v43  ;;  %v3249_v23 = vadd.f32 %v3248_v63, %v3247_v16  ;;  %v3242_v41 = vmul.f32 %v3211_v13, %v3211_v13  ;;  %v3227_v46 = vsel %vm138_vm2, %v3211_v13, 0.0 }
0x1181   :  { %v3250_v3 = vsel %vm138_vm2, %v3239_v56, 0.0  ;;  %v3223_v45 = vsel %vm138_vm2, %v3203_v49, 0.0  ;;  %v3240_v40 = vmul.f32 %v3203_v49, %v3203_v49  ;;  %v3254_v53 = vsel %vm138_vm2, %v3241_v50, 0.0 }
0x1182   :  { %v3251_v47 = vadd.f32 %v3250_v3, %v3249_v23  ;;  %v3224_v12 = vadd.f32 %v3223_v45, %v3222_v39  ;;  %v3256_v17 = vsel %vm138_vm2, %v3242_v41, 0.0  ;;  %v3290_v4 = vrot.slane %v5548_v26, %v4436_v2 }
0x1183   :  { %v3252_v14 = vsel %vm138_vm2, %v3240_v40, 0.0 }
0x1184   :  { %v3226_v11 = vadd.f32 %v3225_v52, %v3224_v12  ;;  %v3253_v62 = vadd.f32 %v3252_v14, %v3251_v47 }
0x1186   :  { %v3228_v29 = vadd.f32 %v3227_v46, %v3226_v11  ;;  %v3255_v10 = vadd.f32 %v3254_v53, %v3253_v62 }
0x1188   :  { %v3229_v5 = vrot.slane %v3228_v29, 4  ;;  %v3257_v35 = vadd.f32 %v3256_v17, %v3255_v10 }
0x118a   :  { %v3230_v60 = vadd.f32 %v3229_v5, %v3228_v29  ;;  %v3258_v51 = vrot.slane %v3257_v35, 4 }
0x118c   :  { %v3231_v42 = vrot.slane %v3230_v60, 2  ;;  %v3259_v8 = vadd.f32 %v3258_v51, %v3257_v35 }
0x118e   :  { %v3232_v9 = vadd.f32 %v3231_v42, %v3230_v60  ;;  %v3260_v19 = vrot.slane %v3259_v8, 2 }
0x1190   :  { %v3233_v34 = vrot.slane %v3232_v9, 1  ;;  %v3261_v61 = vadd.f32 %v3260_v19, %v3259_v8 }
0x1192   :  { %v3234_v0 = vadd.f32 %v3233_v34, %v3232_v9  ;;  %v3262_v6 = vrot.slane %v3261_v61, 1 }
0x1194   :  { %v3264_v48 = vmul.f32 0.015625, %v3234_v0  ;;  %v3263_v38 = vadd.f32 %v3262_v6, %v3261_v61  ;;  %v3756_v6 = vld [vmem:[%s5861_s0 + $0x2c0] ss:$0 sm:$0xff] }
0x1196   :  { %v3266_v54 = vmul.f32 %v3264_v48, %v3264_v48  ;;  %v3274_v58 = vsub.f32 %v3203_v49, %v3264_v48  ;;  %v3269_v25 = vsub.f32 %v5554_v30, %v3264_v48  ;;  %v3270_v31 = vsub.f32 %v5560_v21, %v3264_v48 }
0x1197   :  { %v3265_v37 = vmul.f32 0.015625, %v3263_v38  ;;  %v3271_v28 = vsub.f32 %v5552_v24, %v3264_v48  ;;  %v3272_v7 = vsub.f32 %v5558_v33, %v3264_v48  ;;  %v3273_v18 = vsub.f32 %v5579_v22, %v3264_v48 }
0x1198   :  { %v3275_v1 = vsub.f32 %v5581_v15, %v3264_v48  ;;  %v3276_v55 = vsub.f32 %v3211_v13, %v3264_v48  ;;  %v3302_v21 = vrot.slane %v5548_v26, %v4439_v44  ;;  %v36_v48 = vld [vmem:[%s5860_s1 + $0x40] sm:$0xff] }
0x1199   :  { %v3267_v59 = vsub.f32 %v3265_v37, %v3266_v54 }
0x119b   :  { %v3268_v27 = vmax.f32 %v3267_v59, 0.0 }
0x119d   :  { %v3277_v57 = vadd.f32 1e-05, %v3268_v27  ;;  %v35_v27 = vld [vmem:[%s5860_s1 + $0x28] sm:$0xff] }
0x119f   :  { %4255 = vrsqrt.f32 %v3277_v57 }
0x11a9   :  { %v4256_v30 = vpop.eup %4255 }
0x11aa   :  { %v3284_v16 = vmul.f32 %v4256_v30, %v3274_v58  ;;  %v3279_v24 = vmul.f32 %v4256_v30, %v3269_v25  ;;  %v3280_v43 = vmul.f32 %v4256_v30, %v3270_v31  ;;  %v3281_v33 = vmul.f32 %v4256_v30, %v3271_v28  ;;  %v34_v58 = vld [vmem:[%s5860_s1 + $0x10] sm:$0xff] }
0x11ab   :  { %v3282_v20 = vmul.f32 %v4256_v30, %v3272_v7  ;;  %v3283_v22 = vmul.f32 %v4256_v30, %v3273_v18  ;;  %v3285_v63 = vmul.f32 %v4256_v30, %v3275_v1  ;;  %v3286_v15 = vmul.f32 %v4256_v30, %v3276_v55  ;;  %v37_v55 = vld [vmem:[%s5860_s1 + $0x58] sm:$0xff] }
0x11ac   :  { %v3296_v32 = vmul.f32 %v3290_v4, %v3284_v16  ;;  %v3291_v56 = vmul.f32 %v3290_v4, %v3279_v24  ;;  %v3292_v49 = vmul.f32 %v3290_v4, %v3280_v43  ;;  %v3293_v39 = vmul.f32 %v3290_v4, %v3281_v33  ;;  %v39_v33 = vld [vmem:[%s5860_s1 + $0x88] sm:$0xff] }
0x11ad   :  { %v3294_v23 = vmul.f32 %v3290_v4, %v3282_v20  ;;  %v3295_v13 = vmul.f32 %v3290_v4, %v3283_v22  ;;  %v3297_v3 = vmul.f32 %v3290_v4, %v3285_v63  ;;  %v3298_v2 = vmul.f32 %v3290_v4, %v3286_v15 }
0x11ae   :  { %v3308_v45 = vadd.f32 %v3302_v21, %v3296_v32  ;;  %v3303_v50 = vadd.f32 %v3302_v21, %v3291_v56  ;;  %v3304_v47 = vadd.f32 %v3302_v21, %v3292_v49  ;;  %v3305_v44 = vadd.f32 %v3302_v21, %v3293_v39  ;;  %v40_v32 = vld [vmem:[%s5860_s1 + $0xa0] sm:$0xff]  ;;  %v41_v39 = vld [vmem:[%s5860_s1 + $0xb8] sm:$0xff] }
0x11af   :  { %v3306_v26 = vadd.f32 %v3302_v21, %v3294_v23  ;;  %v3307_v12 = vadd.f32 %v3302_v21, %v3295_v13  ;;  %v3309_v40 = vadd.f32 %v3302_v21, %v3297_v3  ;;  %v3310_v52 = vadd.f32 %v3302_v21, %v3298_v2  ;;  %v38_v21 = vld [vmem:[%s5860_s1 + $0x70] sm:$0xff] }
0x11b0   :  { %vm3311_vm0 = vcmp.gt.f32.partialorder %v3303_v50, 0.0  ;;  %vm3312_vm1 = vcmp.gt.f32.partialorder %v3304_v47, 0.0  ;;  %v3319_v41 = vmul.f32 0.2, %v3303_v50  ;;  %v3320_v11 = vmul.f32 0.2, %v3304_v47 }
0x11b1   :  { %vm3313_vm4 = vcmp.gt.f32.partialorder %v3305_v44, 0.0  ;;  %vm3314_vm12 = vcmp.gt.f32.partialorder %v3306_v26, 0.0  ;;  %v3321_v14 = vmul.f32 0.2, %v3305_v44  ;;  %v3322_v46 = vmul.f32 0.2, %v3306_v26 }
0x11b2   :  { %v3327_v62 = vsel %vm3311_vm0, %v3303_v50, %v3319_v41  ;;  %v3328_v53 = vsel %vm3312_vm1, %v3304_v47, %v3320_v11  ;;  %vm3315_vm5 = vcmp.gt.f32.partialorder %v3307_v12, 0.0  ;;  %vm3316_vm6 = vcmp.gt.f32.partialorder %v3308_v45, 0.0 }
0x11b3   :  { %v3336_v29 = vpack.c.bf16 %v3328_v53, %v3327_v62  ;;  %v3329_v10 = vsel %vm3313_vm4, %v3305_v44, %v3321_v14  ;;  %v3330_v17 = vsel %vm3314_vm12, %v3306_v26, %v3322_v46  ;;  %v3323_v5 = vmul.f32 0.2, %v3307_v12 }
0x11b4   :  { %v3337_v35 = vpack.c.bf16 %v3330_v17, %v3329_v10  ;;  %v3324_v60 = vmul.f32 0.2, %v3308_v45  ;;  %vm3317_vm7 = vcmp.gt.f32.partialorder %v3309_v40, 0.0  ;;  %vm3318_vm3 = vcmp.gt.f32.partialorder %v3310_v52, 0.0 }
0x11b5   :  { %4188 = vmatprep.mubr.msk.bf16.mxu1 %vm138_vm2, %v3336_v29  ;;  %v3331_v51 = vsel %vm3315_vm5, %v3307_v12, %v3323_v5  ;;  %v3325_v42 = vmul.f32 0.2, %v3309_v40  ;;  %v3326_v8 = vmul.f32 0.2, %v3310_v52  ;;  %v5655_v3 = vand.u32 127, %v134_v36 }
0x11b6   :  { %4189 = vmatmul.mubr.msk.bf16.vlgmr.msra.gmra.mrb[72].mxu1 %vm138_vm2, %v3337_v35  ;;  %v3332_v9 = vsel %vm3316_vm6, %v3308_v45, %v3324_v60 }
0x11b7   :  { %v3338_v19 = vpack.c.bf16 %v3332_v9, %v3331_v51  ;;  %v3333_v34 = vsel %vm3317_vm7, %v3309_v40, %v3325_v42  ;;  %v3334_v61 = vsel %vm3318_vm3, %v3310_v52, %v3326_v8 }
0x11b8   :  { %v3339_v0 = vpack.c.bf16 %v3334_v61, %v3333_v34 }
0x11b9   :  { %4192 = vmatprep.mubr.msk.bf16.mxu1 %vm138_vm2, %v3338_v19 }
0x11be   :  { %4193 = vmatmul.mubr.msk.bf16.gmra.mrb[76].mxu1 %vm138_vm2, %v3339_v0 }
0x1289   :  { %v4190_v38 = vpop.f32.mrb[72].mxu1 }
0x128a   :  { %v3404_v54 = vadd.f32 %v4190_v38, %v3756_v6  ;;  %v3395_v25 = vpop.f32.mrb[73].mxu1 }
0x128b   :  { %v3396_v31 = vadd.f32 %v3756_v6, %v3395_v25  ;;  %v4191_v37 = vpop.f32.mrb[74].mxu1 }
0x128c   :  { %v5621_v28 = vadd.f32 %v3404_v54, %v36_v48  ;;  %v3407_v7 = vadd.f32 %v4191_v37, %v3756_v6  ;;  %v3398_v18 = vpop.f32.mrb[75].mxu1 }
0x128d   :  { %v3426_v1 = vadd.f32 %v3396_v31, %v34_v58  ;;  %v3399_v59 = vadd.f32 %v3756_v6, %v3398_v18 }
0x128e   :  { %3438 = vmax.xlane.f32.xlu1 %v5621_v28  ;;  %v3429_v57 = vadd.f32 %v3407_v7, %v37_v55 }
0x128f   :  { %3434 = vmax.xlane.f32.xlu0 %v3426_v1  ;;  %v5630_v4 = vadd.f32 %v3399_v59, %v35_v27 }
0x1291   :  { %v4194_v30 = vpop.f32.mrb[76].mxu1 }
0x1292   :  { %3440 = vmax.xlane.f32.xlu1 %v3429_v57  ;;  %v3411_v16 = vpop.f32.mrb[77].mxu1  ;;  %v3420_v22 = vadd.f32 %v4194_v30, %v3756_v6 }
0x1293   :  { %v3412_v24 = vadd.f32 %v3756_v6, %v3411_v16  ;;  %v4195_v43 = vpop.f32.mrb[78].mxu1  ;;  %3436 = vmax.xlane.f32.xlu0 %v5630_v4 }
0x1294   :  { %v3414_v20 = vpop.f32.mrb[79].mxu1  ;;  %v3423_v56 = vadd.f32 %v4195_v43, %v3756_v6  ;;  %v3432_v23 = vadd.f32 %v3420_v22, %v40_v32 }
0x1295   :  { %v5639_v63 = vadd.f32 %v3412_v24, %v38_v21  ;;  %v3415_v15 = vadd.f32 %v3756_v6, %v3414_v20 }
0x1296   :  { %v5651_v13 = vadd.f32 %v3423_v56, %v41_v39 }
0x1297   :  { %v5644_v49 = vadd.f32 %v3415_v15, %v39_v33  ;;  %3442 = vmax.xlane.f32.xlu0 %v5639_v63 }
0x1299   :  { %3444 = vmax.xlane.f32.xlu1 %v5644_v49 }
0x129b   :  { %3446 = vmax.xlane.f32.xlu0 %v3432_v23 }
0x129d   :  { %3448 = vmax.xlane.f32.xlu1 %v5651_v13 }
0x131b   :  { %v3439_v2 = vpop.xlane.xlu1 %3438 }
0x131c   :  { %vm3510_vm2 = vcmp.eq.f32.partialorder %v5621_v28, %v3439_v2  ;;  %v3435_v45 = vpop.xlane.xlu0 %3434  ;;  %v3452_v17 = vsub.f32 %v5621_v28, %v3439_v2 }
0x131d   :  { %v5659_v50 = vsel %vm3510_vm2, %v5655_v3, 128  ;;  %vm3508_vm8 = vcmp.eq.f32.partialorder %v3426_v1, %v3435_v45  ;;  %v3450_v52 = vsub.f32 %v3426_v1, %v3435_v45 }
0x131e   :  { %v5662_v47 = vsel %vm3508_vm8, %v5655_v3, 128  ;;  %v3553_v44 = vshra.s32 %v5659_v50, 16  ;;  %v3462_v61 = vmul.f32 1.442695, %v3452_v17  ;;  %v3552_v15 = vand.u32 65535, %v5659_v50 }
0x131f   :  { %v3441_v26 = vpop.xlane.xlu1 %3440  ;;  %v3525_v36 = vshra.s32 %v5662_v47, 16  ;;  %v3458_v5 = vmul.f32 1.442695, %v3450_v52  ;;  %v3524_v39 = vand.u32 65535, %v5662_v47 }
0x1320   :  { %vm3511_vm10 = vcmp.eq.f32.partialorder %v3429_v57, %v3441_v26  ;;  %v3437_v12 = vpop.xlane.xlu0 %3436  ;;  %v5665_v40 = vcvt.s32.f32 %v3553_v44  ;;  %v3453_v46 = vsub.f32 %v3429_v57, %v3441_v26  ;;  %v3554_v56 = vcvt.s32.f32 %v3552_v15 }
0x1321   :  { %v5669_v41 = vsel %vm3511_vm10, %v5655_v3, 128  ;;  %vm3509_vm11 = vcmp.eq.f32.partialorder %v5630_v4, %v3437_v12  ;;  %v5679_v29 = vcvt.s32.f32 %v3525_v36  ;;  %v3451_v42 = vsub.f32 %v5630_v4, %v3437_v12 }
0x1322   :  { %v5673_v11 = vsel %vm3509_vm11, %v5655_v3, 128  ;;  %3556 = vmin.xlane.f32.xlu0 %v5665_v40  ;;  %v3567_v14 = vshra.s32 %v5669_v41, 16  ;;  %v3464_v51 = vmul.f32 1.442695, %v3453_v46  ;;  %4257 = vpow2.f32 %v3458_v5 }
0x1323   :  { %v3539_v10 = vshra.s32 %v5673_v11, 16  ;;  %v3460_v58 = vmul.f32 1.442695, %v3451_v42  ;;  %v3526_v44 = vcvt.s32.f32 %v3524_v39  ;;  %v3538_v50 = vand.u32 65535, %v5673_v11 }
0x1324   :  { %v3443_v62 = vpop.xlane.xlu0 %3442  ;;  %v5677_v53 = vcvt.s32.f32 %v3567_v14  ;;  %4259 = vpow2.f32 %v3464_v51 }
0x1325   :  { %vm3512_vm13 = vcmp.eq.f32.partialorder %v5639_v63, %v3443_v62  ;;  %v5695_v34 = vcvt.s32.f32 %v3539_v10  ;;  %4261 = vpow2.f32 %v3462_v61  ;;  %v3454_v7 = vsub.f32 %v5639_v63, %v3443_v62 }
0x1326   :  { %v5685_v35 = vsel %vm3512_vm13, %v5655_v3, 128  ;;  %3570 = vmin.xlane.f32.xlu1 %v5677_v53  ;;  %v3445_v60 = vpop.xlane.xlu1 %3444  ;;  %3528 = vmin.xlane.f32.xlu0 %v5679_v29  ;;  %4263 = vpow2.f32 %v3460_v58  ;;  %v3540_v36 = vcvt.s32.f32 %v3538_v50  ;;  %v4289_v50 = vmov 0.0  }
0x1327   :  { %vm3513_vm9 = vcmp.eq.f32.partialorder %v5644_v49, %v3445_v60  ;;  %v3581_v8 = vshra.s32 %v5685_v35, 16  ;;  %v3455_v59 = vsub.f32 %v5644_v49, %v3445_v60  ;;  %v3466_v4 = vmul.f32 1.442695, %v3454_v7 }
0x1328   :  { %v5693_v9 = vsel %vm3513_vm9, %v5655_v3, 128  ;;  %v3447_v19 = vpop.xlane.xlu0 %3446  ;;  %v3566_v49 = vand.u32 65535, %v5669_v41  ;;  %v3580_v12 = vand.u32 65535, %v5685_v35 }
0x1329   :  { %v3456_v0 = vsub.f32 %v3432_v23, %v3447_v19  ;;  %vm3514_vm14 = vcmp.eq.f32.partialorder %v3432_v23, %v3447_v19  ;;  %v5701_v38 = vcvt.s32.f32 %v3581_v8  ;;  %v3595_v54 = vshra.s32 %v5693_v9, 16 }
0x132a   :  { %v5698_v6 = vsel %vm3514_vm14, %v5655_v3, 128  ;;  %v3449_v48 = vpop.xlane.xlu1 %3448  ;;  %3542 = vmin.xlane.f32.xlu1 %v5695_v34  ;;  %v3468_v21 = vmul.f32 1.442695, %v3455_v59  ;;  %v3568_v45 = vcvt.s32.f32 %v3566_v49  ;;  %v3594_v52 = vand.u32 65535, %v5693_v9 }
0x132b   :  { %v3457_v25 = vsub.f32 %v5651_v13, %v3449_v48  ;;  %vm3515_vm15 = vcmp.eq.f32.partialorder %v5651_v13, %v3449_v48  ;;  %3584 = vmin.xlane.f32.xlu0 %v5701_v38  ;;  %v5710_v37 = vcvt.s32.f32 %v3595_v54  ;;  %v3609_v28 = vshra.s32 %v5698_v6, 16 }
0x132c   :  { %v5707_v31 = vsel %vm3515_vm15, %v5655_v3, 128  ;;  %v3470_v18 = vmul.f32 1.442695, %v3456_v0  ;;  %v5723_v30 = vpop.eup %4257  ;;  %v3582_v14 = vcvt.s32.f32 %v3580_v12  ;;  %v3608_v46 = vand.u32 65535, %v5698_v6 }
0x132d   :  { %v3623_v1 = vshra.s32 %v5707_v31, 16  ;;  %v5716_v55 = vcvt.s32.f32 %v3609_v28  ;;  %v3472_v27 = vmul.f32 1.442695, %v3457_v25  ;;  %v3622_v10 = vand.u32 65535, %v5707_v31 }
0x132e   :  { %3598 = vmin.xlane.f32.xlu1 %v5710_v37  ;;  %4265 = vpow2.f32 %v3470_v18  ;;  %v5726_v16 = vpop.eup %4259  ;;  %v3610_v35 = vcvt.s32.f32 %v3608_v46 }
0x132f   :  { %v5719_v57 = vcvt.s32.f32 %v3623_v1  ;;  %3612 = vmin.xlane.f32.xlu0 %v5716_v55  ;;  %4267 = vpow2.f32 %v3472_v27  ;;  %v5729_v24 = vpop.eup %4261  ;;  %v3624_v42 = vcvt.s32.f32 %v3622_v10 }
0x1330   :  { %4269 = vpow2.f32 %v3466_v4  ;;  %v5732_v43 = vpop.eup %4263 }
0x1331   :  { %4271 = vpow2.f32 %v3468_v21 }
0x1332   :  { %3626 = vmin.xlane.f32.xlu1 %v5719_v57 }
0x1333   :  { %3474 = vadd.xlane.f32.xlu0 %v5723_v30 }
0x1336   :  { %3480 = vadd.xlane.f32.xlu1 %v5726_v16 }
0x1337   :  { %3478 = vadd.xlane.f32.xlu0 %v5729_v24 }
0x1338   :  { %v5735_v33 = vpop.eup %4265 }
0x1339   :  { %v5738_v20 = vpop.eup %4267 }
0x133a   :  { %3476 = vadd.xlane.f32.xlu1 %v5732_v43  ;;  %v5741_v22 = vpop.eup %4269 }
0x133b   :  { %3486 = vadd.xlane.f32.xlu0 %v5735_v33  ;;  %v5744_v63 = vpop.eup %4271 }
0x133e   :  { %3488 = vadd.xlane.f32.xlu1 %v5738_v20 }
0x133f   :  { %3482 = vadd.xlane.f32.xlu0 %v5741_v22 }
0x1342   :  { %3484 = vadd.xlane.f32.xlu1 %v5744_v63 }
0x13af   :  { %v5748_v32 = vpop.xlane.xlu0 %3556 }
0x13b0   :  { %vm3558_vm0 = vcmp.eq.f32.partialorder %v5665_v40, %v5748_v32 }
0x13b1   :  { %v3559_v23 = vsel %vm3558_vm0, %v3554_v56, inf }
0x13b2   :  { %3560 = vmin.xlane.f32.xlu0 %v3559_v23 }
0x13b3   :  { %v5754_v13 = vpop.xlane.xlu1 %3570  ;;  %v5756_v2 = vpop.xlane.xlu0 %3528 }
0x13b4   :  { %vm3572_vm1 = vcmp.eq.f32.partialorder %v5677_v53, %v5754_v13  ;;  %vm3530_vm4 = vcmp.eq.f32.partialorder %v5679_v29, %v5756_v2  ;;  %v3596_v29 = vcvt.s32.f32 %v3594_v52 }
0x13b5   :  { %v3573_v47 = vsel %vm3572_vm1, %v3568_v45, inf  ;;  %v3531_v26 = vsel %vm3530_vm4, %v3526_v44, inf }
0x13b6   :  { %3574 = vmin.xlane.f32.xlu1 %v3573_v47  ;;  %3532 = vmin.xlane.f32.xlu0 %v3531_v26 }
0x13b7   :  { %v5764_v40 = vpop.xlane.xlu1 %3542 }
0x13b8   :  { %vm3544_vm12 = vcmp.eq.f32.partialorder %v5695_v34, %v5764_v40  ;;  %v5769_v41 = vpop.xlane.xlu0 %3584 }
0x13b9   :  { %v3545_v11 = vsel %vm3544_vm12, %v3540_v36, inf  ;;  %vm3586_vm5 = vcmp.eq.f32.partialorder %v5701_v38, %v5769_v41 }
0x13ba   :  { %3546 = vmin.xlane.f32.xlu1 %v3545_v11  ;;  %v3587_v53 = vsel %vm3586_vm5, %v3582_v14, inf }
0x13bb   :  { %v5774_v62 = vpop.xlane.xlu1 %3598  ;;  %3588 = vmin.xlane.f32.xlu0 %v3587_v53 }
0x13bc   :  { %vm3600_vm6 = vcmp.eq.f32.partialorder %v5710_v37, %v5774_v62  ;;  %v5779_v17 = vpop.xlane.xlu0 %3612  ;;  %v3605_v26 = vcvt.f32.s32 %v5774_v62 }
0x13bd   :  { %v3601_v5 = vsel %vm3600_vm6, %v3596_v29, inf  ;;  %vm3614_vm7 = vcmp.eq.f32.partialorder %v5716_v55, %v5779_v17 }
0x13be   :  { %3602 = vmin.xlane.f32.xlu1 %v3601_v5  ;;  %v3615_v51 = vsel %vm3614_vm7, %v3610_v35, inf  ;;  %v3606_v29 = vshll.u32 %v3605_v26, 16 }
0x13bf   :  { %v5783_v60 = vpop.xlane.xlu1 %3626  ;;  %3616 = vmin.xlane.f32.xlu0 %v3615_v51 }
0x13c0   :  { %vm3628_vm3 = vcmp.eq.f32.partialorder %v5719_v57, %v5783_v60  ;;  %v3475_v8 = vpop.xlane.xlu0 %3474  ;;  %v3633_v5 = vcvt.f32.s32 %v5783_v60 }
0x13c1   :  { %v3629_v9 = vsel %vm3628_vm3, %v3624_v42, inf  ;;  %4273 = vrcp.f32 %v3475_v8 }
0x13c2   :  { %3630 = vmin.xlane.f32.xlu1 %v3629_v9 }
0x13c3   :  { %v3481_v19 = vpop.xlane.xlu1 %3480 }
0x13c4   :  { %4275 = vrcp.f32 %v3481_v19  ;;  %v3479_v34 = vpop.xlane.xlu0 %3478 }
0x13c5   :  { %4277 = vrcp.f32 %v3479_v34 }
0x13c7   :  { %v3477_v61 = vpop.xlane.xlu1 %3476 }
0x13c8   :  { %4279 = vrcp.f32 %v3477_v61  ;;  %v3487_v0 = vpop.xlane.xlu0 %3486 }
0x13c9   :  { %4281 = vrcp.f32 %v3487_v0  ;;  %v3634_v0 = vshll.u32 %v3633_v5, 16 }
0x13cb   :  { %v3489_v6 = vpop.xlane.xlu1 %3488  ;;  %v4274_v48 = vpop.eup %4273 }
0x13cc   :  { %4283 = vrcp.f32 %v3489_v6  ;;  %v3491_v38 = vmul.f32 %v4274_v48, %v5723_v30  ;;  %v3483_v54 = vpop.xlane.xlu0 %3482 }
0x13cd   :  { %4285 = vrcp.f32 %v3483_v54 }
0x13ce   :  { %v4276_v58 = vpop.eup %4275  ;;  %3652 = vst [vmem:[%s5863_s4] sm:$0xff] %v3491_v38 }
0x13cf   :  { %v3497_v25 = vmul.f32 %v4276_v58, %v5726_v16  ;;  %v3485_v31 = vpop.xlane.xlu1 %3484  ;;  %v4278_v37 = vpop.eup %4277  ;;  %v3563_v16 = vcvt.f32.s32 %v5748_v32 }
0x13d0   :  { %4287 = vrcp.f32 %v3485_v31  ;;  %v3495_v28 = vmul.f32 %v4278_v37, %v5729_v24  ;;  %v3577_v24 = vcvt.f32.s32 %v5754_v13  ;;  %v3591_v13 = vcvt.f32.s32 %v5769_v41 }
0x13d1   :  { %3655 = vst [vmem:[%s5863_s4 + $0x30] sm:$0xff] %v3497_v25  ;;  %v3619_v41 = vcvt.f32.s32 %v5779_v17 }
0x13d2   :  { %v4280_v7 = vpop.eup %4279  ;;  %3654 = vst [vmem:[%s5863_s4 + $0x20] sm:$0xff] %v3495_v28  ;;  %v3578_v56 = vshll.u32 %v3577_v24, 16  ;;  %v3592_v46 = vshll.u32 %v3591_v13, 16 }
0x13d3   :  { %v3493_v18 = vmul.f32 %v4280_v7, %v5732_v43  ;;  %v4282_v1 = vpop.eup %4281  ;;  %v3535_v43 = vcvt.f32.s32 %v5756_v2  ;;  %v3620_v8 = vshll.u32 %v3619_v41, 16 }
0x13d4   :  { %v3503_v55 = vmul.f32 %v4282_v1, %v5735_v33 }
0x13d5   :  { %3653 = vst [vmem:[%s5863_s4 + $0x10] sm:$0xff] %v3493_v18  ;;  %v3536_v49 = vshll.u32 %v3535_v43, 16 }
0x13d6   :  { %v4284_v59 = vpop.eup %4283  ;;  %3658 = vst [vmem:[%s5863_s4 + $0x60] sm:$0xff] %v3503_v55 }
0x13d7   :  { %v3505_v27 = vmul.f32 %v4284_v59, %v5738_v20  ;;  %v4286_v57 = vpop.eup %4285  ;;  %v3564_v20 = vshll.u32 %v3563_v16, 16 }
0x13d8   :  { %v3499_v4 = vmul.f32 %v4286_v57, %v5741_v22 }
0x13d9   :  { %3659 = vst [vmem:[%s5863_s4 + $0x70] sm:$0xff] %v3505_v27 }
0x13da   :  { %v4288_v30 = vpop.eup %4287  ;;  %3656 = vst [vmem:[%s5863_s4 + $0x40] sm:$0xff] %v3499_v4 }
0x13db   :  { %v3501_v21 = vmul.f32 %v4288_v30, %v5744_v63  ;;  %v3549_v63 = vcvt.f32.s32 %v5764_v40 }
0x13dd   :  { %3657 = vst [vmem:[%s5863_s4 + $0x50] sm:$0xff] %v3501_v21  ;;  %v3550_v36 = vshll.u32 %v3549_v63, 16 }
0x143f   :  { %v3561_v33 = vpop.xlane.xlu0 %3560 }
0x1440   :  { %v3562_v22 = vcvt.f32.s32 %v3561_v33 }
0x1442   :  { %v3565_v15 = vadd.s32 %v3564_v20, %v3562_v22 }
0x1443   :  { %v3575_v39 = vpop.xlane.xlu1 %3574  ;;  %v3533_v23 = vpop.xlane.xlu0 %3532 }
0x1444   :  { %vm3638_vm2 = vcmp.eq.s32.totalorder %v5655_v3, %v3565_v15  ;;  %v3576_v45 = vcvt.f32.s32 %v3575_v39  ;;  %v3534_v44 = vcvt.f32.s32 %v3533_v23 }
0x1445   :  { %v3646_v32 = vsel %vm3638_vm2, 1.0, %v4289_v50 }
0x1446   :  { %3662 = vst [vmem:[%s5863_s4 + $0x28] sm:$0xff] %v3646_v32  ;;  %v3579_v2 = vadd.s32 %v3578_v56, %v3576_v45  ;;  %v3537_v47 = vadd.s32 %v3536_v49, %v3534_v44 }
0x1447   :  { %v3547_v12 = vpop.xlane.xlu1 %3546 }
0x1448   :  { %vm3639_vm8 = vcmp.eq.s32.totalorder %v5655_v3, %v3579_v2  ;;  %vm3636_vm10 = vcmp.eq.s32.totalorder %v5655_v3, %v3537_v47  ;;  %v3548_v40 = vcvt.f32.s32 %v3547_v12  ;;  %v3589_v14 = vpop.xlane.xlu0 %3588 }
0x1449   :  { %v3647_v52 = vsel %vm3639_vm8, 1.0, %v4289_v50  ;;  %v3644_v11 = vsel %vm3636_vm10, 1.0, %v4289_v50  ;;  %v3590_v53 = vcvt.f32.s32 %v3589_v14 }
0x144a   :  { %3663 = vst [vmem:[%s5863_s4 + $0x38] sm:$0xff] %v3647_v52  ;;  %3660 = vst [vmem:[%s5863_s4 + $0x8] sm:$0xff] %v3644_v11  ;;  %v3551_v62 = vadd.s32 %v3550_v36, %v3548_v40 }
0x144b   :  { %v3603_v10 = vpop.xlane.xlu1 %3602  ;;  %v3593_v35 = vadd.s32 %v3592_v46, %v3590_v53 }
0x144c   :  { %vm3637_vm11 = vcmp.eq.s32.totalorder %v5655_v3, %v3551_v62  ;;  %v3604_v51 = vcvt.f32.s32 %v3603_v10  ;;  %v3617_v17 = vpop.xlane.xlu0 %3616 }
0x144d   :  { %v3645_v42 = vsel %vm3637_vm11, 1.0, %v4289_v50  ;;  %vm3640_vm13 = vcmp.eq.s32.totalorder %v5655_v3, %v3593_v35  ;;  %v3618_v19 = vcvt.f32.s32 %v3617_v17 }
0x144e   :  { %3661 = vst [vmem:[%s5863_s4 + $0x18] sm:$0xff] %v3645_v42  ;;  %v3607_v9 = vadd.s32 %v3606_v29, %v3604_v51  ;;  %v3648_v34 = vsel %vm3640_vm13, 1.0, %v4289_v50 }
0x144f   :  { %v3631_v61 = vpop.xlane.xlu1 %3630  ;;  %3664 = vst [vmem:[%s5863_s4 + $0x48] sm:$0xff] %v3648_v34  ;;  %v3621_v60 = vadd.s32 %v3620_v8, %v3618_v19 }
0x1450   :  { %vm3641_vm9 = vcmp.eq.s32.totalorder %v5655_v3, %v3607_v9  ;;  %v3632_v6 = vcvt.f32.s32 %v3631_v61 }
0x1451   :  { %v3649_v48 = vsel %vm3641_vm9, 1.0, %v4289_v50  ;;  %vm3642_vm14 = vcmp.eq.s32.totalorder %v5655_v3, %v3621_v60 }
0x1452   :  { %3665 = vst [vmem:[%s5863_s4 + $0x58] sm:$0xff] %v3649_v48  ;;  %v3635_v38 = vadd.s32 %v3634_v0, %v3632_v6  ;;  %v3650_v54 = vsel %vm3642_vm14, 1.0, %v4289_v50 }
0x1453   :  { %3666 = vst [vmem:[%s5863_s4 + $0x68] sm:$0xff] %v3650_v54 }
0x1454   :  { %vm3643_vm15 = vcmp.eq.s32.totalorder %v5655_v3, %v3635_v38 }
0x1455   :  { %v3651_v58 = vsel %vm3643_vm15, 1.0, %v4289_v50 }
0x1456   :  { %3667 = vst [vmem:[%s5863_s4 + $0x78] sm:$0xff] %v3651_v58 }

</bundles_post_ra>
